<compile_context>
chip_gen: v5e
topology: v5e:2x2
jax: 0.10.0
libtpu: 0.0.40
codegen_flags: <defaults>
</compile_context>

<pallas_src>
import functools
import math

import jax
import jax.numpy as jnp
from jax.experimental import pallas as pl
from jax.experimental.pallas import tpu as pltpu


def _round_up(x: int, m: int) -> int:
    return (x + m - 1) // m * m


def _pack_width(d: int) -> int:
    """Samples packed per physical row.

    Minimum packing makes rows 128-lane dense; then widen (powers of two) so
    exp / stores amortize over more lanes, capped at K = P*D <= 1024 so the
    block-diagonal MXU contraction stays tiny relative to the activation DMA.
    """
    p = 128 // math.gcd(d, 128)
    while p * 2 <= 128 and p * 2 * d <= 1024:
        p *= 2
    return p


def poisson_kernel(xp_ref, wblk_ref, b_ref, o_ref):
    # xp_ref  : [TR, P*D]  packed, lane-dense activations (P samples per row)
    # wblk_ref: [P*D, P]   block-diagonal weight kron(I_P, w); constant index -> VMEM resident
    # b_ref   : [1, 1]     bias scalar in SMEM
    # o_ref   : [TR, P]    packed predictions (P samples per row)
    logits = jnp.dot(
        xp_ref[...],
        wblk_ref[...],
        preferred_element_type=jnp.float32,
        precision=jax.lax.Precision.HIGHEST,  # exact-ish f32; MXU stays far under the DMA
    )
    # Scalar SMEM bias folds into the VPU add; exp runs on the EUP (free slot).
    o_ref[...] = jnp.exp(logits + b_ref[0, 0]).astype(o_ref.dtype)


@functools.partial(jax.jit, static_argnames=("block_rows",))
def poisson_regression(x, weight, bias, *, block_rows: int = 512):
    """exp(x @ weight.T + bias).

    x: [B, D] f32, weight: [1, D] f32 (PyTorch nn.Linear layout), bias: [1] f32.
    Returns [B, 1] f32.
    """
    B, D = x.shape

    # --- lane-dense packing: P consecutive samples per physical row (free reshape) ---
    P = _pack_width(D)                     # D=32 -> P=32, packed row width P*D = 1024 lanes
    PD = P * D

    n_rows = pl.cdiv(B, P)                                   # packed rows of real data
    tr = min(block_rows, _round_up(n_rows, 8))               # rows per grid step (x8 sublanes)
    n_rows_pad = _round_up(n_rows, tr)
    b_pad = n_rows_pad * P

    # Per-tile VMEM (defaults, D=32): x block 512*1024*4 B = 2 MiB (double-buffered
    # by the pipeline -> 4 MiB) + resident weight 128 KiB + output block ~0.5 MiB.
    # Well inside the scoped-VMEM defaults on v5e/v6e and the smaller-VMEM v7x.
    # Each grid step moves 2 MiB of activations (~1.5 us on v6e), comfortably
    # amortizing the ~0.35 us per-step overhead; raise block_rows for huge batches.
    if b_pad != B:
        # Ragged batches only; padded rows are computed (exp(bias), finite) and sliced away.
        x = jnp.pad(x, ((0, b_pad - B), (0, 0)))
    xp = x.reshape(n_rows_pad, PD)                           # free: contiguous row-major

    # Block-diagonal weight: (xp @ w_blk)[r, s] == dot(x[r*P + s], w).
    w_col = weight.reshape(D, 1).astype(jnp.float32)
    w_blk = jnp.kron(jnp.eye(P, dtype=jnp.float32), w_col)   # [P*D, P]
    b2d = jnp.reshape(bias, (1, 1)).astype(jnp.float32)

    out_packed = pl.pallas_call(
        poisson_kernel,
        out_shape=jax.ShapeDtypeStruct((n_rows_pad, P), jnp.float32),
        grid=(n_rows_pad // tr,),
        in_specs=[
            # Activations: tiled over batch rows, auto double-buffered by Pallas.
            pl.BlockSpec((tr, PD), lambda i: (i, 0)),
            # Weight: constant block index -> DMA'd once, stays resident in VMEM.
            pl.BlockSpec((PD, P), lambda i: (0, 0)),
            # Bias: single scalar in SMEM.
            pl.BlockSpec(memory_space=pltpu.MemorySpace.SMEM),
        ],
        out_specs=pl.BlockSpec((tr, P), lambda i: (i, 0)),
        compiler_params=pltpu.CompilerParams(
            # Batch tiles are independent (no carried accumulator) -> megacore-shardable.
            dimension_semantics=("parallel",),
        ),
    )(xp, w_blk, b2d)

    # Free reshape back to [B, 1]; drop padded rows for ragged batches.
    return out_packed.reshape(b_pad, 1)[:B]


if __name__ == "__main__":
    key = jax.random.PRNGKey(0)
    kx, kw, kb, kx2 = jax.random.split(key, 4)

    input_dim = 32

    # Parameters with nn.Linear(input_dim, 1) shapes/convention.
    weight = jax.random.normal(kw, (1, input_dim), dtype=jnp.float32) * 0.1
    bias = jax.random.normal(kb, (1,), dtype=jnp.float32) * 0.1

    def reference(x):
        # Exact-f32 elementwise reference of exp(Linear(x)).
        return jnp.exp(
            jnp.sum(x * weight.reshape(1, -1), axis=-1, keepdims=True)
            + bias.reshape(1, 1)
        )

    # Case 1: aligned batch, multiple pipelined grid steps (small block_rows to
    # force >1 grid step at this small demo size).
    batch = 4096
    x = jax.random.normal(kx, (batch, input_dim), dtype=jnp.float32)
    out = jax.block_until_ready(poisson_regression(x, weight, bias, block_rows=32))
    assert out.shape == (batch, 1)
    assert jnp.allclose(out, reference(x), rtol=1e-4, atol=1e-4)

    # Case 2: small ragged batch exercising the padding path (single grid step).
    batch2 = 50
    x2 = jax.random.normal(kx2, (batch2, input_dim), dtype=jnp.float32)
    out2 = jax.block_until_ready(poisson_regression(x2, weight, bias))
    assert out2.shape == (batch2, 1)
    assert jnp.allclose(out2, reference(x2), rtol=1e-4, atol=1e-4)

    print("KERNEL_OK")
</pallas_src>

<mosaic_0001>
module attributes {stable_mosaic.version = 11 : i64} {
  func.func @poisson_kernel(%arg0: i32, %arg1: memref<32x1024xf32, #tpu.memory_space<vmem>>, %arg2: memref<1024x32xf32, #tpu.memory_space<vmem>>, %arg3: memref<1x1xf32, #tpu.memory_space<smem>>, %arg4: memref<32x32xf32, #tpu.memory_space<vmem>>) attributes {dimension_semantics = [#tpu.dimension_semantics<parallel>], iteration_bounds = array<i64: 4>, scalar_prefetch = 0 : i64, scratch_operands = 0 : i64, tpu.core_type = #tpu.core_type<tc>, window_params = [{transform_indices = @transform_0, window_bounds = array<i64: 32, 1024>}, {pipeline_mode = #tpu.pipeline_mode<synchronous>, transform_indices = @transform_1, window_bounds = array<i64: 1024, 32>}, {transform_indices = @transform_2, window_bounds = array<i64: 1, 1>}, {transform_indices = @transform_3, window_bounds = array<i64: 32, 32>}]} {
    %c0 = arith.constant 0 : index
    %c0_0 = arith.constant 0 : index
    %0 = vector.load %arg1[%c0, %c0_0] : memref<32x1024xf32, #tpu.memory_space<vmem>>, vector<32x1024xf32>
    %c0_1 = arith.constant 0 : index
    %c0_2 = arith.constant 0 : index
    %1 = vector.load %arg2[%c0_1, %c0_2] : memref<1024x32xf32, #tpu.memory_space<vmem>>, vector<1024x32xf32>
    %cst = arith.constant dense<0.000000e+00> : vector<32x32xf32>
    %2 = tpu.matmul %0, %1, %cst {dimension_numbers = #tpu.dot_dimension_numbers<[1], [0], [0], [1], [0, 0, 1, 1], [], []>, precision = #tpu.contract_precision<fp32>} : vector<32x1024xf32>, vector<1024x32xf32>, vector<32x32xf32> -> vector<32x32xf32>
    %c0_3 = arith.constant 0 : index
    %c0_4 = arith.constant 0 : index
    %3 = memref.load %arg3[%c0_3, %c0_4] : memref<1x1xf32, #tpu.memory_space<smem>>
    %4 = vector.broadcast %3 : f32 to vector<32x32xf32>
    %5 = arith.addf %2, %4 : vector<32x32xf32>
    %6 = math.exp %5 : vector<32x32xf32>
    %c0_5 = arith.constant 0 : index
    %c0_6 = arith.constant 0 : index
    %7 = vector.load %arg4[%c0_5, %c0_6] : memref<32x32xf32, #tpu.memory_space<vmem>>, vector<32x32xf32>
    tpu.vector_store %arg4[%c0_5, %c0_6], %6 {strides = array<i32>} : memref<32x32xf32, #tpu.memory_space<vmem>>, vector<32x32xf32>,
    return
  }
  func.func @transform_0(%arg0: i32) -> (i32, i32) {
    %c0_i32 = arith.constant 0 : i32
    %c0_i32_0 = arith.constant 0 : i32
    return %arg0, %c0_i32 : i32, i32
  }
  func.func @transform_1(%arg0: i32) -> (i32, i32) {
    %c0_i32 = arith.constant 0 : i32
    %c0_i32_0 = arith.constant 0 : i32
    %c0_i32_1 = arith.constant 0 : i32
    return %c0_i32, %c0_i32_0 : i32, i32
  }
  func.func @transform_2(%arg0: i32) -> (i32, i32) {
    %c0_i32 = arith.constant 0 : i32
    %c0_i32_0 = arith.constant 0 : i32
    %c0_i32_1 = arith.constant 0 : i32
    return %c0_i32, %c0_i32_0 : i32, i32
  }
  func.func @transform_3(%arg0: i32) -> (i32, i32) {
    %c0_i32 = arith.constant 0 : i32
    %c0_i32_0 = arith.constant 0 : i32
    return %arg0, %c0_i32 : i32, i32
  }
}

</mosaic_0001>

<bundles_post_ra>
// kernel: poisson_regression.1
= control target key start
LH: loop header
LB: loop body
LE: loop exit
PB: predicated region body
PF: predicated region fallthrough
CT: control target
= control target key end

     0   :  { %s3941_s14 = smov 0   ;;  %s7099_s0 = inlined_call_operand.vmem [shape: f32[128,1024], index: 0, kind: input, shape index: {}]   ;;  %s7100_s1 = inlined_call_operand.vmem [shape: f32[1024,32], index: 1, kind: input, shape index: {}]   ;;  %s7101_s2 = inlined_call_operand.<no memory space> [shape: f32[1,1], index: 2, kind: input, shape index: {}]   ;;  %s7102_s3 = inlined_call_operand.vmem [shape: f32[128,32], index: 3, kind: output, shape index: {}]  }
   0x1   :  { %8 = sst [smem:[#allocation2]] %s7101_s2 }
   0x2 LB: > { %s3881_s15 = sadd.s32 4294967295, %s3916_s14   ;;  %p3885_p0 = scmp.ge.s32.totalorder %s3916_s14, 1  ;;  %s3916_s14 = sphi %s3941_s14, %s14_s14  }
   0x3   : > { %p140_p1 = scmp.lt.s32.totalorder %s3916_s14, 5 }
   0x5   : > { %p141_p2 = pnand %p3885_p0, %p140_p1 }
   0x7   : > { %144 = sbr.rel (%p141_p2) target bundleno = 659 (0x293), region = 32 }
   0xc   : > { %v225_v0 = vld [vmem:[%s7100_s1 + $0x78] sm:$0xff]  ;;  %v224_v1 = vld [vmem:[%s7100_s1 + $0x70] sm:$0xff]  ;;  %v223_v2 = vld [vmem:[%s7100_s1 + $0x68] sm:$0xff]  ;;  %s3886_s21 = sshll.u32 %s3881_s15, 2  ;;  %s338_s9 = sld [smem:[#allocation2]]  ;;  %vm3820_vm0 = vcmask 261120  }
   0xd   : > { %v3958_v3 = vand.u32 4294901760, %v225_v0  ;;  %v3960_v4 = vand.u32 4294901760, %v224_v1  ;;  %v3962_v5 = vand.u32 4294901760, %v223_v2  ;;  %v222_v6 = vld [vmem:[%s7100_s1 + $0x60] sm:$0xff]  ;;  %v221_v7 = vld [vmem:[%s7100_s1 + $0x58] sm:$0xff]  ;;  %v220_v8 = vld [vmem:[%s7100_s1 + $0x50] sm:$0xff] }
   0xe   : > { %v3973_v9 = vand.u32 4294901760, %v222_v6  ;;  %v3975_v10 = vand.u32 4294901760, %v221_v7  ;;  %v3977_v11 = vand.u32 4294901760, %v220_v8  ;;  %v219_v12 = vld [vmem:[%s7100_s1 + $0x48] sm:$0xff]  ;;  %v218_v13 = vld [vmem:[%s7100_s1 + $0x40] sm:$0xff]  ;;  %v217_v18 = vld [vmem:[%s7100_s1 + $0x38] sm:$0xff] }
   0xf   : > { %341 = vmatpush.msra.mxu0 %v3958_v3  ;;  %v3987_v14 = vsub.f32 %v225_v0, %v3958_v3  ;;  %v3990_v15 = vsub.f32 %v224_v1, %v3960_v4  ;;  %588 = vmatpush.msra.mxu3 %v3958_v3  ;;  %v3994_v16 = vsub.f32 %v223_v2, %v3962_v5  ;;  %v3996_v17 = vand.u32 4294901760, %v219_v12  ;;  %p166_p3 = scmp.lt.s32.totalorder %s3886_s21, 15  ;;  %v216_v29 = vld [vmem:[%s7100_s1 + $0x30] sm:$0xff]  ;;  %v215_v36 = vld [vmem:[%s7100_s1 + $0x28] sm:$0xff]  ;;  %v214_v43 = vld [vmem:[%s7100_s1 + $0x20] sm:$0xff] }
  0x10   : > { %v4002_v19 = vsub.f32 %v222_v6, %v3973_v9  ;;  %v4005_v20 = vsub.f32 %v221_v7, %v3975_v10  ;;  %v4007_v21 = vand.u32 4294901760, %v218_v13  ;;  %v4010_v22 = vsub.f32 %v220_v8, %v3977_v11  ;;  %v213_v49 = vld [vmem:[%s7100_s1 + $0x18] sm:$0xff]  ;;  %v212_v55 = vld [vmem:[%s7100_s1 + $0x10] sm:$0xff]  ;;  %v211_v62 = vld [vmem:[%s7100_s1 + $0x8] sm:$0xff] }
  0x11   : > { %343 = vmatpush.msra.mxu0 %v3960_v4  ;;  %520 = vmatpush.msra.mxu2 %v3987_v14  ;;  %v407_v23 = vand.u32 4294901760, %v3987_v14  ;;  %v7117_v24 = vand.u32 4294901760, %v3990_v15  ;;  %v7115_v25 = vand.u32 4294901760, %v3994_v16  ;;  %s7644_s21 = smov (!%p166_p3, %s3886_s21), 15  ;;  %v4021_v27 = vand.u32 4294901760, %v217_v18  ;;  %v241_v6 = vld [vmem:[%s7100_s1 + $0xf8] sm:$0xff] }
  0x12   : > { %590 = vmatpush.msra.mxu3 %v3960_v4  ;;  %v7113_v26 = vand.u32 4294901760, %v4002_v19  ;;  %v4024_v28 = vsub.f32 %v219_v12, %v3996_v17  ;;  %v7111_v33 = vand.u32 4294901760, %v4005_v20  ;;  %v7110_v34 = vand.u32 4294901760, %v4010_v22  ;;  %s3893_s11 = sshll.u32 %s7644_s21, 6  ;;  %v210_v12 = vld [vmem:[%s7100_s1] sm:$0xff] }
  0x13   : > { %345 = vmatpush.msra.mxu0 %v3962_v5  ;;  %523 = vmatpush.msra.mxu2 %v3990_v15  ;;  %v408_v30 = vsub.f32 %v3987_v14, %v407_v23  ;;  %v414_v31 = vsub.f32 %v3990_v15, %v7117_v24  ;;  %v420_v32 = vsub.f32 %v3994_v16, %v7115_v25  ;;  %v4055_v40 = vand.u32 4294901760, %v216_v29  ;;  %s4074_s17 = scalar_lea.vmem %s7099_s0, %s3893_s11  ;;  %v235_v24 = vld [vmem:[%s7100_s1 + $0xc8] sm:$0xff]  ;;  %v234_v14 = vld [vmem:[%s7100_s1 + $0xc0] sm:$0xff] }
  0x14   : > { %592 = vmatpush.msra.mxu3 %v3962_v5  ;;  %v4044_v35 = vsub.f32 %v218_v13, %v4007_v21  ;;  %v426_v39 = vsub.f32 %v4002_v19, %v7113_v26  ;;  %v7109_v41 = vand.u32 4294901760, %v4024_v28  ;;  %v4060_v42 = vsub.f32 %v217_v18, %v4021_v27  ;;  %v178_v56 = vld [vmem:[%s4074_s17] sm:$0xff] }
  0x15   : > { %347 = vmatpush.msra.mxu0 %v3973_v9  ;;  %v409_v37 = vand.u32 4294901760, %v408_v30  ;;  %526 = vmatpush.msra.mxu2 %v3994_v16  ;;  %v415_v38 = vand.u32 4294901760, %v414_v31  ;;  %v421_v44 = vand.u32 4294901760, %v420_v32  ;;  %v432_v45 = vsub.f32 %v4005_v20, %v7111_v33  ;;  %v194_v33 = vld [vmem:[%s4074_s17 + $0x80] sm:$0xff] }
  0x16   : > { %594 = vmatpush.msra.mxu3 %v3973_v9  ;;  %v4069_v46 = vand.u32 4294901760, %v215_v36  ;;  %v438_v47 = vsub.f32 %v4010_v22, %v7110_v34  ;;  %v7107_v48 = vand.u32 4294901760, %v4044_v35  ;;  %v427_v50 = vand.u32 4294901760, %v426_v39 }
  0x17   : > { %349 = vmatpush.msra.mxu0 %v3975_v10  ;;  %410 = vmatpush.msra.mxu1 %v409_v37  ;;  %v4086_v51 = vand.u32 4294901760, %v214_v43  ;;  %v4089_v52 = vsub.f32 %v216_v29, %v4055_v40  ;;  %v444_v53 = vsub.f32 %v4024_v28, %v7109_v41  ;;  %v7106_v54 = vand.u32 4294901760, %v4060_v42 }
  0x18   : > { %529 = vmatpush.msra.mxu2 %v4002_v19  ;;  %596 = vmatpush.msra.mxu3 %v3975_v10  ;;  %v433_v57 = vand.u32 4294901760, %v432_v45  ;;  %v4102_v58 = vand.u32 4294901760, %v213_v49  ;;  %v4105_v59 = vsub.f32 %v215_v36, %v4069_v46  ;;  %v439_v60 = vand.u32 4294901760, %v438_v47  ;;  %v186_v36 = vld [vmem:[%s4074_s17 + $0x40] sm:$0xff] }
  0x19   : > { %351 = vmatpush.msra.mxu0 %v3977_v11  ;;  %416 = vmatpush.msra.mxu1 %v415_v38  ;;  %v450_v61 = vsub.f32 %v4044_v35, %v7107_v48  ;;  %v4116_v63 = vand.u32 4294901760, %v212_v55  ;;  %v7105_v0 = vand.u32 4294901760, %v4089_v52  ;;  %v4120_v1 = vsub.f32 %v214_v43, %v4086_v51 }
  0x1a   : > { %532 = vmatpush.msra.mxu2 %v4005_v20  ;;  %598 = vmatpush.msra.mxu3 %v3977_v11  ;;  %v4122_v2 = vand.u32 4294901760, %v178_v56  ;;  %v445_v7 = vand.u32 4294901760, %v444_v53  ;;  %v456_v8 = vsub.f32 %v4060_v42, %v7106_v54  ;;  %v4136_v13 = vand.u32 4294901760, %v211_v62 }
  0x1b   : > { %353 = vmatpush.msra.mxu0 %v3996_v17  ;;  %422 = vmatpush.msra.mxu1 %v421_v44  ;;  %v7103_v18 = vand.u32 4294901760, %v4105_v59  ;;  %v4140_v29 = vsub.f32 %v213_v49, %v4102_v58  ;;  %v451_v31 = vand.u32 4294901760, %v450_v61  ;;  %v4147_v32 = vand.u32 4294901760, %v241_v6  ;;  %v240_v44 = vld [vmem:[%s7100_s1 + $0xf0] sm:$0xff] }
  0x1c   : > { %535 = vmatpush.msra.mxu2 %v4010_v22  ;;  %600 = vmatpush.msra.mxu3 %v3996_v17  ;;  %v4143_v30 = vsub.f32 %v178_v56, %v4122_v2  ;;  %v462_v37 = vsub.f32 %v4089_v52, %v7105_v0  ;;  %v4154_v38 = vand.u32 4294901760, %v210_v12  ;;  %v7104_v39 = vand.u32 4294901760, %v4120_v1  ;;  %v239_v56 = vld [vmem:[%s7100_s1 + $0xe8] sm:$0xff] }
  0x1d   : > { %355 = vmatpush.msra.mxu0 %v4007_v21  ;;  %428 = vmatpush.msra.mxu1 %v427_v50  ;;  %v4158_v43 = vsub.f32 %v212_v55, %v4116_v63  ;;  %v457_v45 = vand.u32 4294901760, %v456_v8  ;;  %v468_v49 = vsub.f32 %v4105_v59, %v7103_v18  ;;  %v7108_v50 = vand.u32 4294901760, %v4140_v29 }
  0x1e   : > { %538 = vmatpush.msra.mxu2 %v4024_v28  ;;  %602 = vmatpush.msra.mxu3 %v4007_v21  ;;  %7239 = vst [vmem:[#allocation3_spill] sm:$0xff] %v4154_v38  ;;  %v7116_v47 = vand.u32 4294901760, %v4143_v30  ;;  %v4172_v53 = vsub.f32 %v211_v62, %v4136_v13  ;;  %v4174_v55 = vand.u32 4294901760, %v186_v36  ;;  %v463_v61 = vand.u32 4294901760, %v462_v37 }
  0x1f   : > { %357 = vmatpush.msra.mxu0 %v4021_v27  ;;  %434 = vmatpush.msra.mxu1 %v433_v57  ;;  %v4181_v57 = vand.u32 4294901760, %v240_v44  ;;  %v474_v62 = vsub.f32 %v4120_v1, %v7104_v39  ;;  %v4192_v8 = vsub.f32 %v210_v12, %v4154_v38  ;;  %v4199_v18 = vand.u32 4294901760, %v239_v56 }
  0x20   : > { %541 = vmatpush.msra.mxu2 %v4044_v35  ;;  %604 = vmatpush.msra.mxu3 %v4021_v27  ;;  %v469_v37 = vand.u32 4294901760, %v468_v49  ;;  %v480_v12 = vsub.f32 %v4140_v29, %v7108_v50  ;;  %v7114_v39 = vand.u32 4294901760, %v4172_v53  ;;  %v4210_v0 = vsub.f32 %v186_v36, %v4174_v55 }
  0x21   : > { %359 = vmatpush.msra.mxu0 %v4055_v40  ;;  %440 = vmatpush.msra.mxu1 %v439_v60  ;;  %v4184_v60 = vsub.f32 %v241_v6, %v4147_v32  ;;  %v375_v6 = vsub.f32 %v4143_v30, %v7116_v47  ;;  %7240 = vst [vmem:[#allocation4_spill] sm:$0xff] %v4199_v18  ;;  %v475_v49 = vand.u32 4294901760, %v474_v62  ;;  %v7119_v50 = vand.u32 4294901760, %v4192_v8 }
  0x22   : > { %544 = vmatpush.msra.mxu2 %v4060_v42  ;;  %606 = vmatpush.msra.mxu3 %v4055_v40  ;;  %v4216_v48 = vsub.f32 %v240_v44, %v4181_v57  ;;  %v4231_v34 = vsub.f32 %v239_v56, %v4199_v18  ;;  %v492_v62 = vsub.f32 %v4172_v53, %v7114_v39  ;;  %v4257_v47 = vand.u32 4294901760, %v194_v33 }
  0x23   : > { %361 = vmatpush.msra.mxu0 %v4069_v46  ;;  %446 = vmatpush.msra.mxu1 %v445_v7  ;;  %v7112_v7 = vand.u32 4294901760, %v4158_v43  ;;  %v7118_v54 = vand.u32 4294901760, %v4184_v60  ;;  %v376_v44 = vand.u32 4294901760, %v375_v6  ;;  %v236_v6 = vld [vmem:[%s7100_s1 + $0xd0] sm:$0xff]  ;;  %v498_v39 = vsub.f32 %v4192_v8, %v7119_v50 }
  0x24   : > { %547 = vmatpush.msra.mxu2 %v4089_v52  ;;  %608 = vmatpush.msra.mxu3 %v4069_v46 }
  0x25   : > { %363 = vmatpush.msra.mxu0 %v4086_v51  ;;  %452 = vmatpush.msra.mxu1 %v451_v31  ;;  %v238_v31 = vld [vmem:[%s7100_s1 + $0xe0] sm:$0xff]  ;;  %v486_v36 = vsub.f32 %v4158_v43, %v7112_v7  ;;  %v7121_v7 = vand.u32 4294901760, %v4210_v0  ;;  %v842_v56 = vsub.f32 %v4184_v60, %v7118_v54  ;;  %v4279_v54 = vand.u32 4294901760, %v235_v24 }
  0x26   : > { %550 = vmatpush.msra.mxu2 %v4105_v59  ;;  %610 = vmatpush.msra.mxu3 %v4086_v51  ;;  %v4226_v41 = vand.u32 4294901760, %v238_v31 }
  0x27   : > { %365 = vmatpush.msra.mxu0 %v4102_v58  ;;  %458 = vmatpush.msra.mxu1 %v457_v45  ;;  %v237_v45 = vld [vmem:[%s7100_s1 + $0xd8] sm:$0xff] }
  0x28   : > { %553 = vmatpush.msra.mxu2 %v4120_v1  ;;  %612 = vmatpush.msra.mxu3 %v4102_v58  ;;  %v4239_v26 = vand.u32 4294901760, %v237_v45  ;;  %v4255_v25 = vsub.f32 %v238_v31, %v4226_v41  ;;  %v383_v31 = vsub.f32 %v4210_v0, %v7121_v7  ;;  %v7243_v7 = vand.u32 4294901760, %v4231_v34 }
  0x29   : > { %367 = vmatpush.msra.mxu0 %v4116_v63  ;;  %464 = vmatpush.msra.mxu1 %v463_v61  ;;  %v481_v61 = vand.u32 4294901760, %v480_v12  ;;  %v487_v12 = vand.u32 4294901760, %v486_v36  ;;  %v493_v36 = vand.u32 4294901760, %v492_v62 }
  0x2a   : > { %556 = vmatpush.msra.mxu2 %v4140_v29  ;;  %614 = vmatpush.msra.mxu3 %v4116_v63  ;;  %v4272_v50 = vsub.f32 %v237_v45, %v4239_v26  ;;  %v499_v45 = vand.u32 4294901760, %v498_v39  ;;  %v7123_v62 = vand.u32 4294901760, %v4255_v25 }
  0x2b   : > { %369 = vmatpush.msra.mxu0 %v4136_v13  ;;  %470 = vmatpush.msra.mxu1 %v469_v37  ;;  %v7120_v37 = vand.u32 4294901760, %v4216_v48 }
  0x2c   : > { %559 = vmatpush.msra.mxu2 %v4158_v43  ;;  %616 = vmatpush.msra.mxu3 %v4136_v13 }
  0x2d   : > { %371 = vmatpush.msra.mxu0 %v4154_v38  ;;  %476 = vmatpush.msra.mxu1 %v475_v49  ;;  %v4264_v49 = vand.u32 4294901760, %v236_v6 }
  0x2e   : > { %377 = vmatmul.f32.vlgmr.msra.gmra.mxu0 %v376_v44  ;;  %562 = vmatpush.msra.mxu2 %v4172_v53  ;;  %v843_v44 = vand.u32 4294901760, %v842_v56  ;;  %v4288_v56 = vsub.f32 %v194_v33, %v4257_v47  ;;  %v384_v33 = vand.u32 4294901760, %v383_v31 }
  0x2f   : > { %482 = vmatpush.msra.mxu1 %v481_v61  ;;  %647 = vmatpush.msrb.mxu0 %v407_v23  ;;  %v848_v61 = vsub.f32 %v4216_v48, %v7120_v37  ;;  %v7241_v23 = vand.u32 4294901760, %v3990_v15  ;;  %v7242_v37 = vand.u32 4294901760, %v4143_v30  ;;  %v233_v15 = vld [vmem:[%s7100_s1 + $0xb8] sm:$0xff] }
  0x30   : > { %565 = vmatpush.msra.mxu2 %v4192_v8  ;;  %618 = vmatpush.msra.mxu3 %v4154_v38  ;;  %v854_v38 = vsub.f32 %v4231_v34, %v7243_v7  ;;  %v4317_v39 = vand.u32 4294901760, %v233_v15 }
  0x31   : > { %488 = vmatpush.msra.mxu1 %v487_v12  ;;  %651 = vmatpush.msrb.mxu0 %v7241_v23  ;;  %v4297_v12 = vsub.f32 %v236_v6, %v4264_v49  ;;  %v4304_v23 = vand.u32 4294901760, %v234_v14  ;;  %v849_v7 = vand.u32 4294901760, %v848_v61  ;;  %v4309_v6 = vsub.f32 %v235_v24, %v4279_v54 }
  0x32   : > { %568 = vmatmul.f32.vlgmr.msra.gmra.mxu2 %v4143_v30  ;;  %622 = vmatmul.f32.vlgmr.msra.gmra.mxu3 %v7242_v37  ;;  %v7244_v30 = vand.u32 4294901760, %v3994_v16  ;;  %v202_v37 = vld [vmem:[%s4074_s17 + $0xc0] sm:$0xff]  ;;  %v232_v16 = vld [vmem:[%s7100_s1 + $0xb0] sm:$0xff]  ;;  %v855_v24 = vand.u32 4294901760, %v854_v38  ;;  %v4349_v61 = vsub.f32 %v233_v15, %v4317_v39 }
  0x33   : > { %775 = vmatpush.msrb.mxu2 %v4147_v32  ;;  %494 = vmatpush.msra.mxu1 %v493_v36  ;;  %v860_v36 = vsub.f32 %v4255_v25, %v7123_v62  ;;  %v4331_v62 = vsub.f32 %v234_v14, %v4304_v23  ;;  %v4333_v31 = vand.u32 4294901760, %v202_v37 }
  0x34   : > { %655 = vmatpush.msrb.mxu0 %v7244_v30  ;;  %844 = vmatpush.msrb.mxu3 %v843_v44  ;;  %v7245_v44 = vand.u32 4294901760, %v4002_v19  ;;  %v231_v19 = vld [vmem:[%s7100_s1 + $0xa8] sm:$0xff] }
  0x35   : > { %777 = vmatpush.msrb.mxu2 %v4181_v57  ;;  %500 = vmatpush.msra.mxu1 %v499_v45  ;;  %v7246_v45 = vand.u32 4294901760, %v4272_v50  ;;  %v861_v14 = vand.u32 4294901760, %v860_v36  ;;  %v7253_v36 = vand.u32 4294901760, %v4210_v0 }
  0x36   : > { %659 = vmatpush.msrb.mxu0 %v7245_v44  ;;  %502 = vmatmul.f32.vlgmr.msra.gmra.mxu1 %v4122_v2  ;;  %v7248_v44 = vand.u32 4294901760, %v4288_v56 }
  0x37   : > { %385 = vmatmul.f32.gmra.mxu0 %v384_v33  ;;  %726 = vmatpush.msrb.mxu1 %v3958_v3  ;;  %v866_v30 = vsub.f32 %v4272_v50, %v7246_v45  ;;  %v4340_v33 = vand.u32 4294901760, %v232_v16  ;;  %v7247_v3 = vand.u32 4294901760, %v4005_v20  ;;  %v7250_v20 = vand.u32 4294901760, %v4010_v22  ;;  %v229_v22 = vld [vmem:[%s7100_s1 + $0x98] sm:$0xff] }
  0x38   : > { %779 = vmatpush.msrb.mxu2 %v4199_v18  ;;  %850 = vmatpush.msrb.mxu3 %v849_v7  ;;  %v391_v45 = vsub.f32 %v4288_v56, %v7248_v44  ;;  %v7249_v7 = vand.u32 4294901760, %v4297_v12  ;;  %v4355_v18 = vand.u32 4294901760, %v231_v19 }
  0x39   : > { %663 = vmatpush.msrb.mxu0 %v7247_v3  ;;  %728 = vmatpush.msrb.mxu1 %v3960_v4  ;;  %v230_v4 = vld [vmem:[%s7100_s1 + $0xa0] sm:$0xff]  ;;  %v867_v15 = vand.u32 4294901760, %v866_v30  ;;  %v7251_v3 = vand.u32 4294901760, %v4309_v6  ;;  %v7252_v30 = vand.u32 4294901760, %v4024_v28  ;;  %v7254_v28 = vand.u32 4294901760, %v4331_v62 }
  0x3a   : > { %781 = vmatpush.msrb.mxu2 %v4226_v41  ;;  %856 = vmatpush.msrb.mxu3 %v855_v24  ;;  %v872_v38 = vsub.f32 %v4297_v12, %v7249_v7  ;;  %v4365_v24 = vsub.f32 %v202_v37, %v4333_v31  ;;  %v4373_v7 = vsub.f32 %v232_v16, %v4340_v33  ;;  %v392_v37 = vand.u32 4294901760, %v391_v45 }
  0x3b   : > { %667 = vmatpush.msrb.mxu0 %v7250_v20  ;;  %573 = vmatmul.f32.gmra.mxu2 %v4210_v0  ;;  %v878_v44 = vsub.f32 %v4309_v6, %v7251_v3  ;;  %v4381_v20 = vand.u32 4294901760, %v230_v4  ;;  %v4387_v3 = vsub.f32 %v231_v19, %v4355_v18  ;;  %v228_v0 = vld [vmem:[%s7100_s1 + $0x90] sm:$0xff] }
  0x3c   : > { %730 = vmatpush.msrb.mxu1 %v3962_v5  ;;  %783 = vmatpush.msrb.mxu2 %v4239_v26  ;;  %v7126_v5 = vand.u32 4294901760, %v4349_v61  ;;  %v873_v16 = vand.u32 4294901760, %v872_v38  ;;  %v7128_v45 = vand.u32 4294901760, %v4365_v24  ;;  %v7127_v38 = vand.u32 4294901760, %v4373_v7 }
  0x3d   : > { %862 = vmatpush.msrb.mxu3 %v861_v14  ;;  %671 = vmatpush.msrb.mxu0 %v7252_v30  ;;  %v884_v14 = vsub.f32 %v4331_v62, %v7254_v28  ;;  %v4394_v30 = vand.u32 4294901760, %v229_v22  ;;  %v879_v19 = vand.u32 4294901760, %v878_v44  ;;  %v7129_v44 = vand.u32 4294901760, %v4387_v3 }
  0x3e   : > { %628 = vmatmul.f32.gmra.mxu3 %v7253_v36  ;;  %732 = vmatpush.msrb.mxu1 %v3973_v9  ;;  %v7255_v9 = vand.u32 4294901760, %v4044_v35  ;;  %v4408_v36 = vsub.f32 %v230_v4, %v4381_v20  ;;  %v227_v35 = vld [vmem:[%s7100_s1 + $0x88] sm:$0xff]  ;;  %v4415_v28 = vand.u32 4294901760, %v228_v0  ;;  %v399_v4 = vsub.f32 %v4365_v24, %v7128_v45 }
  0x3f   : > { %785 = vmatpush.msrb.mxu2 %v4264_v49  ;;  %868 = vmatpush.msrb.mxu3 %v867_v15  ;;  %v890_v15 = vsub.f32 %v4349_v61, %v7126_v5  ;;  %v179_v5 = vld [vmem:[%s4074_s17 + $0x8] sm:$0xff] }
  0x40   : > { %675 = vmatpush.msrb.mxu0 %v7255_v9  ;;  %506 = vmatmul.f32.gmra.mxu1 %v4174_v55  ;;  %v4424_v9 = vsub.f32 %v229_v22, %v4394_v30 }
  0x41   : > { %393 = vmatmul.f32.gmra.mxu0 %v392_v37  ;;  %734 = vmatpush.msrb.mxu1 %v3975_v10  ;;  %v7256_v10 = vand.u32 4294901760, %v4060_v42  ;;  %v885_v37 = vand.u32 4294901760, %v884_v14  ;;  %v4434_v42 = vand.u32 4294901760, %v227_v35  ;;  %v7257_v14 = vand.u32 4294901760, %v4089_v52 }
  0x42   : > { %787 = vmatpush.msrb.mxu2 %v4279_v54  ;;  %874 = vmatpush.msrb.mxu3 %v873_v16  ;;  %v226_v16 = vld [vmem:[%s7100_s1 + $0x80] sm:$0xff]  ;;  %v891_v22 = vand.u32 4294901760, %v890_v15  ;;  %v4450_v52 = vand.u32 4294901760, %v179_v5  ;;  %v7258_v15 = vand.u32 4294901760, %v4105_v59 }
  0x43   : > { %679 = vmatpush.msrb.mxu0 %v7256_v10  ;;  %736 = vmatpush.msrb.mxu1 %v3977_v11  ;;  %v896_v11 = vsub.f32 %v4373_v7, %v7127_v38  ;;  %v4446_v38 = vsub.f32 %v228_v0, %v4415_v28  ;;  %v4448_v45 = vand.u32 4294901760, %v226_v16  ;;  %v7259_v10 = vand.u32 4294901760, %v4288_v56 }
  0x44   : > { %789 = vmatpush.msrb.mxu2 %v4304_v23  ;;  %880 = vmatpush.msrb.mxu3 %v879_v19  ;;  %v902_v19 = vsub.f32 %v4387_v3, %v7129_v44  ;;  %v4459_v0 = vsub.f32 %v227_v35, %v4434_v42 }
  0x45   : > { %683 = vmatpush.msrb.mxu0 %v7257_v14  ;;  %578 = vmatmul.f32.gmra.mxu2 %v4288_v56  ;;  %v400_v14 = vand.u32 4294901760, %v399_v4  ;;  %v897_v44 = vand.u32 4294901760, %v896_v11  ;;  %v7261_v4 = vand.u32 4294901760, %v4120_v1  ;;  %v4470_v11 = vsub.f32 %v179_v5, %v4450_v52 }
  0x46   : > { %738 = vmatpush.msrb.mxu1 %v3996_v17  ;;  %791 = vmatpush.msrb.mxu2 %v4317_v39  ;;  %v913_v17 = vand.u32 4294901760, %v4424_v9  ;;  %v903_v56 = vand.u32 4294901760, %v902_v19  ;;  %v4473_v35 = vsub.f32 %v226_v16, %v4448_v45  ;;  %v925_v1 = vand.u32 4294901760, %v4459_v0 }
  0x47   : > { %886 = vmatpush.msrb.mxu3 %v885_v37  ;;  %687 = vmatpush.msrb.mxu0 %v7258_v15  ;;  %v7260_v37 = vand.u32 4294901760, %v4408_v36  ;;  %v7262_v19 = vand.u32 4294901760, %v4140_v29  ;;  %v808_v16 = vand.u32 4294901760, %v4470_v11  ;;  %v7263_v15 = vand.u32 4294901760, %v4158_v43 }
  0x48   : > { %634 = vmatmul.f32.gmra.mxu3 %v7259_v10  ;;  %740 = vmatpush.msrb.mxu1 %v4007_v21  ;;  %v919_v21 = vand.u32 4294901760, %v4446_v38  ;;  %v187_v10 = vld [vmem:[%s4074_s17 + $0x48] sm:$0xff]  ;;  %v7265_v43 = vand.u32 4294901760, %v4365_v24 }
  0x49   : > { %793 = vmatpush.msrb.mxu2 %v4340_v33  ;;  %892 = vmatpush.msrb.mxu3 %v891_v22  ;;  %v908_v59 = vsub.f32 %v4408_v36, %v7260_v37  ;;  %v914_v22 = vsub.f32 %v4424_v9, %v913_v17  ;;  %v7264_v37 = vand.u32 4294901760, %v4172_v53 }
  0x4a   : > { %691 = vmatpush.msrb.mxu0 %v7261_v4  ;;  %510 = vmatmul.f32.gmra.mxu1 %v4257_v47 }
  0x4b   : > { %401 = vmatmul.f32.gmra.mxu0 %v400_v14  ;;  %742 = vmatpush.msrb.mxu1 %v4021_v27  ;;  %v909_v5 = vand.u32 4294901760, %v908_v59  ;;  %v920_v27 = vsub.f32 %v4446_v38, %v919_v21  ;;  %v915_v29 = vand.u32 4294901760, %v914_v22  ;;  %v4494_v14 = vand.u32 4294901760, %v187_v10 }
  0x4c   : > { %795 = vmatpush.msrb.mxu2 %v4355_v18  ;;  %898 = vmatpush.msrb.mxu3 %v897_v44  ;;  %v931_v44 = vand.u32 4294901760, %v4473_v35 }
  0x4d   : > { %695 = vmatpush.msrb.mxu0 %v7262_v19  ;;  %744 = vmatpush.msrb.mxu1 %v4055_v40  ;;  %v926_v40 = vsub.f32 %v4459_v0, %v925_v1  ;;  %v921_v59 = vand.u32 4294901760, %v920_v27  ;;  %v4514_v53 = vsub.f32 %v187_v10, %v4494_v14  ;;  %v195_v19 = vld [vmem:[%s4074_s17 + $0x88] sm:$0xff]  ;;  %v7267_v10 = vand.u32 4294901760, %v4184_v60 }
  0x4e   : > { %797 = vmatpush.msrb.mxu2 %v4381_v20  ;;  %904 = vmatpush.msrb.mxu3 %v903_v56  ;;  %v932_v4 = vsub.f32 %v4473_v35, %v931_v44 }
  0x4f   : > { %699 = vmatpush.msrb.mxu0 %v7263_v15  ;;  %583 = vmatmul.f32.gmra.mxu2 %v4365_v24  ;;  %v7266_v24 = vand.u32 4294901760, %v4192_v8  ;;  %v816_v8 = vand.u32 4294901760, %v4514_v53  ;;  %v7270_v15 = vand.u32 4294901760, %v4231_v34 }
  0x50   : > { %746 = vmatpush.msrb.mxu1 %v4069_v46  ;;  %799 = vmatpush.msrb.mxu2 %v4394_v30  ;;  %v809_v46 = vsub.f32 %v4470_v11, %v808_v16  ;;  %v933_v22 = vand.u32 4294901760, %v932_v4 }
  0x51   : > { %910 = vmatpush.msrb.mxu3 %v909_v5  ;;  %703 = vmatpush.msrb.mxu0 %v7264_v37  ;;  %v7268_v5 = vld [vmem:[#allocation3_spill] sm:$0xff] }
  0x52   : > { %640 = vmatmul.f32.gmra.mxu3 %v7265_v43  ;;  %748 = vmatpush.msrb.mxu1 %v4086_v51  ;;  %v927_v51 = vand.u32 4294901760, %v926_v40  ;;  %v810_v56 = vand.u32 4294901760, %v809_v46  ;;  %v7271_v40 = vand.u32 4294901760, %v4255_v25  ;;  %v7275_v43 = vand.u32 4294901760, %v4309_v6 }
  0x53   : > { %801 = vmatpush.msrb.mxu2 %v4415_v28  ;;  %916 = vmatpush.msrb.mxu3 %v915_v29 }
  0x54   : > { %707 = vmatpush.msrb.mxu0 %v7266_v24  ;;  %514 = vmatmul.f32.gmra.mxu1 %v4333_v31 }
  0x55   : > { %709 = vmatmul.f32.vlgmr.msrb.gmra.mxu0 %v4122_v2  ;;  %750 = vmatpush.msrb.mxu1 %v4102_v58  ;;  %v4529_v58 = vand.u32 4294901760, %v195_v19 }
  0x56   : > { %803 = vmatpush.msrb.mxu2 %v4434_v42  ;;  %922 = vmatpush.msrb.mxu3 %v921_v59 }
  0x57   : > { %954 = vmatpush.msra.mxu0 %v4184_v60  ;;  %752 = vmatpush.msrb.mxu1 %v4116_v63  ;;  %v817_v63 = vsub.f32 %v4514_v53, %v816_v8  ;;  %v4543_v27 = vsub.f32 %v195_v19, %v4529_v58 }
  0x58   : > { %805 = vmatpush.msrb.mxu2 %v4448_v45  ;;  %928 = vmatpush.msrb.mxu3 %v927_v51 }
  0x59   : > { %957 = vmatpush.msra.mxu0 %v4216_v48  ;;  %754 = vmatpush.msrb.mxu1 %v4136_v13  ;;  %v7269_v13 = vand.u32 4294901760, %v4216_v48  ;;  %v818_v60 = vand.u32 4294901760, %v817_v63  ;;  %v203_v48 = vld [vmem:[%s4074_s17 + $0xc8] sm:$0xff]  ;;  %v824_v29 = vand.u32 4294901760, %v4543_v27 }
  0x5a   : > { %811 = vmatmul.f32.vlgmr.msrb.gmra.mxu2 %v810_v56  ;;  %934 = vmatpush.msrb.mxu3 %v933_v22 }
  0x5b   : > { %1081 = vmatpush.msra.mxu2 %v7267_v10  ;;  %960 = vmatpush.msra.mxu0 %v4231_v34  ;;  %v7273_v34 = vand.u32 4294901760, %v4272_v50  ;;  %v249_v10 = vld [vmem:[%s7100_s1 + $0x138] sm:$0xff] }
  0x5c   : > { %756 = vmatpush.msrb.mxu1 %v7268_v5  ;;  %936 = vmatmul.f32.vlgmr.msrb.gmra.mxu3 %v4450_v52 }
  0x5d   : > { %1085 = vmatpush.msra.mxu2 %v7269_v13  ;;  %1160 = vmatpush.msra.mxu3 %v4147_v32  ;;  %v248_v13 = vld [vmem:[%s7100_s1 + $0x130] sm:$0xff] }
  0x5e   : > { %963 = vmatpush.msra.mxu0 %v4255_v25  ;;  %758 = vmatmul.f32.vlgmr.msrb.gmra.mxu1 %v4122_v2  ;;  %v7272_v2 = vld [vmem:[#allocation4_spill] sm:$0xff]  ;;  %v825_v25 = vsub.f32 %v4543_v27, %v824_v29 }
  0x5f   : > { %713 = vmatmul.f32.gmra.mxu0 %v4174_v55  ;;  %1022 = vmatpush.msra.mxu1 %v4147_v32  ;;  %v4560_v32 = vand.u32 4294901760, %v203_v48 }
  0x60   : > { %1089 = vmatpush.msra.mxu2 %v7270_v15  ;;  %1162 = vmatpush.msra.mxu3 %v4181_v57  ;;  %v826_v37 = vand.u32 4294901760, %v825_v25 }
  0x61   : > { %966 = vmatpush.msra.mxu0 %v4272_v50  ;;  %1024 = vmatpush.msra.mxu1 %v4181_v57  ;;  %v7274_v57 = vand.u32 4294901760, %v4297_v12  ;;  %v4576_v50 = vsub.f32 %v203_v48, %v4560_v32 }
  0x62   : > { %1093 = vmatpush.msra.mxu2 %v7271_v40  ;;  %1164 = vmatpush.msra.mxu3 %v7272_v2  ;;  %v4750_v40 = vand.u32 4294901760, %v248_v13 }
  0x63   : > { %969 = vmatpush.msra.mxu0 %v4297_v12  ;;  %819 = vmatmul.f32.gmra.mxu2 %v818_v60  ;;  %v7276_v12 = vand.u32 4294901760, %v4331_v62  ;;  %v4738_v60 = vand.u32 4294901760, %v249_v10 }
  0x64   : > { %1026 = vmatpush.msra.mxu1 %v7272_v2  ;;  %1097 = vmatpush.msra.mxu2 %v7273_v34  ;;  %v247_v2 = vld [vmem:[%s7100_s1 + $0x128] sm:$0xff] }
  0x65   : > { %1166 = vmatpush.msra.mxu3 %v4226_v41  ;;  %972 = vmatpush.msra.mxu0 %v4309_v6 }
  0x66   : > { %940 = vmatmul.f32.gmra.mxu3 %v4494_v14  ;;  %1028 = vmatpush.msra.mxu1 %v4226_v41  ;;  %v832_v41 = vand.u32 4294901760, %v4576_v50 }
  0x67   : > { %1101 = vmatpush.msra.mxu2 %v7274_v57  ;;  %1168 = vmatpush.msra.mxu3 %v4239_v26 }
  0x68   : > { %975 = vmatpush.msra.mxu0 %v4331_v62  ;;  %762 = vmatmul.f32.gmra.mxu1 %v4174_v55  ;;  %v833_v55 = vsub.f32 %v4576_v50, %v832_v41  ;;  %v256_v62 = vld [vmem:[%s7100_s1 + $0x170] sm:$0xff] }
  0x69   : > { %717 = vmatmul.f32.gmra.mxu0 %v4257_v47  ;;  %1030 = vmatpush.msra.mxu1 %v4239_v26  ;;  %v7277_v26 = vand.u32 4294901760, %v4349_v61 }
  0x6a   : > { %1105 = vmatpush.msra.mxu2 %v7275_v43  ;;  %1170 = vmatpush.msra.mxu3 %v4264_v49  ;;  %v246_v43 = vld [vmem:[%s7100_s1 + $0x120] sm:$0xff] }
  0x6b   : > { %978 = vmatpush.msra.mxu0 %v4349_v61  ;;  %1032 = vmatpush.msra.mxu1 %v4264_v49  ;;  %v257_v49 = vld [vmem:[%s7100_s1 + $0x178] sm:$0xff]  ;;  %v7279_v61 = vand.u32 4294901760, %v4387_v3 }
  0x6c   : > { %1109 = vmatpush.msra.mxu2 %v7276_v12  ;;  %1172 = vmatpush.msra.mxu3 %v4279_v54  ;;  %v4615_v6 = vand.u32 4294901760, %v257_v49  ;;  %v4770_v12 = vand.u32 4294901760, %v247_v2 }
  0x6d   : > { %981 = vmatpush.msra.mxu0 %v4373_v7  ;;  %827 = vmatmul.f32.gmra.mxu2 %v826_v37  ;;  %v4764_v37 = vsub.f32 %v249_v10, %v4738_v60 }
  0x6e   : > { %1034 = vmatpush.msra.mxu1 %v4279_v54  ;;  %1113 = vmatpush.msra.mxu2 %v7277_v26  ;;  %v7278_v54 = vand.u32 4294901760, %v4373_v7  ;;  %v255_v7 = vld [vmem:[%s7100_s1 + $0x168] sm:$0xff] }
  0x6f   : > { %1174 = vmatpush.msra.mxu3 %v4304_v23  ;;  %984 = vmatpush.msra.mxu0 %v4387_v3  ;;  %v4632_v3 = vsub.f32 %v257_v49, %v4615_v6  ;;  %v4640_v59 = vand.u32 4294901760, %v255_v7  ;;  %v4776_v49 = vsub.f32 %v248_v13, %v4750_v40 }
  0x70   : > { %944 = vmatmul.f32.gmra.mxu3 %v4529_v58  ;;  %1036 = vmatpush.msra.mxu1 %v4304_v23  ;;  %v834_v23 = vand.u32 4294901760, %v833_v55 }
  0x71   : > { %1117 = vmatpush.msra.mxu2 %v7278_v54  ;;  %1176 = vmatpush.msra.mxu3 %v4317_v39  ;;  %v180_v54 = vld [vmem:[%s4074_s17 + $0x10] sm:$0xff] }
  0x72   : > { %987 = vmatpush.msra.mxu0 %v4408_v36  ;;  %766 = vmatmul.f32.gmra.mxu1 %v4257_v47  ;;  %v4622_v47 = vand.u32 4294901760, %v256_v62 }
  0x73   : > { %721 = vmatmul.f32.gmra.mxu0 %v4333_v31  ;;  %1038 = vmatpush.msra.mxu1 %v4317_v39  ;;  %v7280_v39 = vand.u32 4294901760, %v4408_v36 }
  0x74   : > { %1121 = vmatpush.msra.mxu2 %v7279_v61  ;;  %1178 = vmatpush.msra.mxu3 %v4340_v33  ;;  %v4645_v36 = vsub.f32 %v256_v62, %v4622_v47  ;;  %v245_v61 = vld [vmem:[%s7100_s1 + $0x118] sm:$0xff] }
  0x75   : > { %990 = vmatpush.msra.mxu0 %v4424_v9  ;;  %1040 = vmatpush.msra.mxu1 %v4340_v33  ;;  %v254_v33 = vld [vmem:[%s7100_s1 + $0x160] sm:$0xff]  ;;  %v1275_v9 = vand.u32 4294901760, %v4632_v3 }
  0x76   : > { %1125 = vmatpush.msra.mxu2 %v7280_v39  ;;  %1180 = vmatpush.msra.mxu3 %v4355_v18  ;;  %v4649_v46 = vand.u32 4294901760, %v254_v33  ;;  %v7133_v39 = vand.u32 4294901760, %v4764_v37 }
  0x77   : > { %993 = vmatpush.msra.mxu0 %v4446_v38  ;;  %835 = vmatmul.f32.gmra.mxu2 %v834_v23  ;;  %v4783_v23 = vand.u32 4294901760, %v246_v43 }
  0x78   : > { %1042 = vmatpush.msra.mxu1 %v4355_v18  ;;  %1129 = vmatpush.msra.mxu2 %v913_v17  ;;  %v253_v18 = vld [vmem:[%s7100_s1 + $0x158] sm:$0xff]  ;;  %v4661_v17 = vsub.f32 %v255_v7, %v4640_v59 }
  0x79   : > { %1182 = vmatpush.msra.mxu3 %v4381_v20  ;;  %996 = vmatpush.msra.mxu0 %v4459_v0  ;;  %v4668_v38 = vand.u32 4294901760, %v253_v18  ;;  %v251_v0 = vld [vmem:[%s7100_s1 + $0x148] sm:$0xff] }
  0x7a   : > { %948 = vmatmul.f32.gmra.mxu3 %v4560_v32  ;;  %1044 = vmatpush.msra.mxu1 %v4381_v20  ;;  %v252_v20 = vld [vmem:[%s7100_s1 + $0x150] sm:$0xff] }
  0x7b   : > { %1133 = vmatpush.msra.mxu2 %v919_v21  ;;  %1184 = vmatpush.msra.mxu3 %v4394_v30  ;;  %v7144_v21 = vand.u32 4294901760, %v4645_v36  ;;  %v4682_v4 = vand.u32 4294901760, %v252_v20  ;;  %v4697_v24 = vsub.f32 %v253_v18, %v4668_v38  ;;  %v244_v18 = vld [vmem:[%s7100_s1 + $0x110] sm:$0xff] }
  0x7c   : > { %999 = vmatpush.msra.mxu0 %v4473_v35  ;;  %770 = vmatmul.f32.gmra.mxu1 %v4333_v31  ;;  %v4675_v31 = vsub.f32 %v254_v33, %v4649_v46  ;;  %v250_v35 = vld [vmem:[%s7100_s1 + $0x140] sm:$0xff]  ;;  %v4798_v33 = vsub.f32 %v247_v2, %v4770_v12 }
  0x7d   : > { %1002 = vmatmul.f32.vlgmr.msra.gmra.mxu0 %v4470_v11  ;;  %1046 = vmatpush.msra.mxu1 %v4394_v30  ;;  %v1276_v30 = vsub.f32 %v4632_v3, %v1275_v9  ;;  %v4710_v56 = vsub.f32 %v252_v20, %v4682_v4  ;;  %v4717_v19 = vand.u32 4294901760, %v250_v35  ;;  %v7139_v5 = vand.u32 4294901760, %v4697_v24 }
  0x7e   : > { %1137 = vmatpush.msra.mxu2 %v925_v1  ;;  %1186 = vmatpush.msra.mxu3 %v4415_v28  ;;  %v7143_v1 = vand.u32 4294901760, %v4661_v17  ;;  %v7140_v51 = vand.u32 4294901760, %v4675_v31  ;;  %v4803_v20 = vand.u32 4294901760, %v180_v54  ;;  %v7131_v10 = vand.u32 4294901760, %v4798_v33 }
  0x7f   : > { %1209 = vmatpush.msrb.mxu0 %v4615_v6  ;;  %1048 = vmatpush.msra.mxu1 %v4415_v28  ;;  %v1282_v28 = vsub.f32 %v4645_v36, %v7144_v21  ;;  %v7137_v15 = vand.u32 4294901760, %v4710_v56  ;;  %v1300_v48 = vsub.f32 %v4697_v24, %v7139_v5  ;;  %v196_v5 = vld [vmem:[%s4074_s17 + $0x90] sm:$0xff] }
  0x80   : > { %1141 = vmatpush.msra.mxu2 %v931_v44  ;;  %1188 = vmatpush.msra.mxu3 %v4434_v42  ;;  %v4704_v44 = vand.u32 4294901760, %v251_v0  ;;  %v1288_v22 = vsub.f32 %v4661_v17, %v7143_v1  ;;  %v4959_v21 = vand.u32 4294901760, %v196_v5 }
  0x81   : > { %1211 = vmatpush.msrb.mxu0 %v4622_v47  ;;  %1050 = vmatpush.msra.mxu1 %v4434_v42  ;;  %v1277_v42 = vand.u32 4294901760, %v1276_v30  ;;  %v1283_v63 = vand.u32 4294901760, %v1282_v28  ;;  %v1306_v57 = vsub.f32 %v4710_v56, %v7137_v15  ;;  %v1301_v55 = vand.u32 4294901760, %v1300_v48  ;;  %v243_v28 = vld [vmem:[%s7100_s1 + $0x108] sm:$0xff]  ;;  %v242_v48 = vld [vmem:[%s7100_s1 + $0x100] sm:$0xff]  ;;  %v269_v15 = vld [vmem:[%s7100_s1 + $0x1d8] sm:$0xff] }
  0x82   : > { %1143 = vmatmul.f32.vlgmr.msra.gmra.mxu2 %v4450_v52  ;;  %1190 = vmatpush.msra.mxu3 %v4448_v45  ;;  %v1289_v11 = vand.u32 4294901760, %v1288_v22  ;;  %v4806_v30 = vand.u32 4294901760, %v245_v61 }
  0x83   : > { %1388 = vmatpush.msrb.mxu2 %v4632_v3  ;;  %1213 = vmatpush.msrb.mxu0 %v4640_v59  ;;  %v1307_v7 = vand.u32 4294901760, %v1306_v57  ;;  %v266_v3 = vld [vmem:[%s7100_s1 + $0x1c0] sm:$0xff] }
  0x84   : > { %1052 = vmatpush.msra.mxu1 %v4448_v45  ;;  %1192 = vmatmul.f32.vlgmr.msra.gmra.mxu3 %v4450_v52  ;;  %v1294_v45 = vsub.f32 %v4675_v31, %v7140_v51  ;;  %v4732_v52 = vsub.f32 %v251_v0, %v4704_v44  ;;  %v4812_v0 = vsub.f32 %v246_v43, %v4783_v23 }
  0x85   : > { %1391 = vmatpush.msrb.mxu2 %v4645_v36  ;;  %1456 = vmatpush.msrb.mxu3 %v4615_v6  ;;  %v4835_v13 = vsub.f32 %v245_v61, %v4806_v30  ;;  %v188_v61 = vld [vmem:[%s4074_s17 + $0x50] sm:$0xff] }
  0x86   : > { %1215 = vmatpush.msrb.mxu0 %v4649_v46  ;;  %1056 = vmatmul.f32.vlgmr.msra.gmra.mxu1 %v808_v16  ;;  %v4744_v16 = vsub.f32 %v250_v35, %v4717_v19  ;;  %v1295_v34 = vand.u32 4294901760, %v1294_v45  ;;  %v7136_v25 = vand.u32 4294901760, %v4732_v52  ;;  %v1324_v35 = vsub.f32 %v4764_v37, %v7133_v39 }
  0x87   : > { %1007 = vmatmul.f32.gmra.mxu0 %v4514_v53  ;;  %1278 = vmatpush.msrb.mxu1 %v1277_v42  ;;  %v7132_v53 = vand.u32 4294901760, %v4776_v49  ;;  %v4821_v42 = vand.u32 4294901760, %v244_v18  ;;  %v7130_v2 = vand.u32 4294901760, %v4812_v0 }
  0x88   : > { %1394 = vmatpush.msrb.mxu2 %v4661_v17  ;;  %1458 = vmatpush.msrb.mxu3 %v4622_v47  ;;  %v7135_v26 = vand.u32 4294901760, %v4744_v16  ;;  %v1312_v62 = vsub.f32 %v4732_v52, %v7136_v25  ;;  %v1325_v57 = vand.u32 4294901760, %v1324_v35 }
  0x89   : > { %1217 = vmatpush.msrb.mxu0 %v4668_v38  ;;  %1284 = vmatpush.msrb.mxu1 %v1283_v63  ;;  %v4827_v63 = vsub.f32 %v180_v54, %v4803_v20  ;;  %v1330_v45 = vsub.f32 %v4776_v49, %v7132_v53  ;;  %v4850_v43 = vsub.f32 %v244_v18, %v4821_v42  ;;  %v4856_v54 = vand.u32 4294901760, %v242_v48 }
  0x8a   : > { %1397 = vmatpush.msrb.mxu2 %v4675_v31  ;;  %1460 = vmatpush.msrb.mxu3 %v4640_v59  ;;  %v1342_v35 = vsub.f32 %v4812_v0, %v7130_v2 }
  0x8b   : > { %1219 = vmatpush.msrb.mxu0 %v4682_v4  ;;  %1147 = vmatmul.f32.gmra.mxu2 %v4494_v14  ;;  %7281 = vst [vmem:[#allocation3_spill] sm:$0xff] %v4856_v54  ;;  %v4890_v2 = vsub.f32 %v242_v48, %v4856_v54 }
  0x8c   : > { %1290 = vmatpush.msrb.mxu1 %v1289_v11  ;;  %1400 = vmatpush.msrb.mxu2 %v4697_v24  ;;  %v4837_v11 = vand.u32 4294901760, %v243_v28  ;;  %v1343_v48 = vand.u32 4294901760, %v1342_v35 }
  0x8d   : > { %1462 = vmatpush.msrb.mxu3 %v4649_v46  ;;  %1221 = vmatpush.msrb.mxu0 %v4704_v44 }
  0x8e   : > { %1196 = vmatmul.f32.gmra.mxu3 %v4494_v14  ;;  %1296 = vmatpush.msrb.mxu1 %v1295_v34  ;;  %v1318_v14 = vsub.f32 %v4744_v16, %v7135_v26  ;;  %v273_v34 = vld [vmem:[%s7100_s1 + $0x1f8] sm:$0xff]  ;;  %v4864_v18 = vsub.f32 %v243_v28, %v4837_v11  ;;  %v7138_v28 = vand.u32 4294901760, %v4850_v43  ;;  %v7146_v26 = vand.u32 4294901760, %v4890_v2 }
  0x8f   : > { %1403 = vmatpush.msrb.mxu2 %v4710_v56  ;;  %1464 = vmatpush.msrb.mxu3 %v4668_v38 }
  0x90   : > { %1223 = vmatpush.msrb.mxu0 %v4717_v19  ;;  %1062 = vmatmul.f32.gmra.mxu1 %v816_v8  ;;  %v1313_v8 = vand.u32 4294901760, %v1312_v62  ;;  %v1319_v22 = vand.u32 4294901760, %v1318_v14  ;;  %v7141_v62 = vand.u32 4294901760, %v4827_v63  ;;  %v7134_v14 = vand.u32 4294901760, %v4835_v13 }
  0x91   : > { %1012 = vmatmul.f32.gmra.mxu0 %v4543_v27  ;;  %1302 = vmatpush.msrb.mxu1 %v1301_v55  ;;  %v1336_v55 = vsub.f32 %v4798_v33, %v7131_v10  ;;  %v7142_v53 = vand.u32 4294901760, %v4864_v18 }
  0x92   : > { %1406 = vmatpush.msrb.mxu2 %v4732_v52  ;;  %1466 = vmatpush.msrb.mxu3 %v4682_v4  ;;  %v1348_v10 = vsub.f32 %v4835_v13, %v7134_v14 }
  0x93   : > { %1225 = vmatpush.msrb.mxu0 %v4738_v60  ;;  %1308 = vmatpush.msrb.mxu1 %v1307_v7  ;;  %v1331_v7 = vand.u32 4294901760, %v1330_v45  ;;  %v271_v45 = vld [vmem:[%s7100_s1 + $0x1e8] sm:$0xff]  ;;  %v1337_v27 = vand.u32 4294901760, %v1336_v55 }
  0x94   : > { %1409 = vmatpush.msrb.mxu2 %v4744_v16  ;;  %1468 = vmatpush.msrb.mxu3 %v4704_v44  ;;  %v4904_v39 = vand.u32 4294901760, %v271_v45 }
  0x95   : > { %1227 = vmatpush.msrb.mxu0 %v4750_v40  ;;  %1151 = vmatmul.f32.gmra.mxu2 %v4529_v58 }
  0x96   : > { %1314 = vmatpush.msrb.mxu1 %v1313_v8  ;;  %1412 = vmatpush.msrb.mxu2 %v4764_v37  ;;  %v272_v8 = vld [vmem:[%s7100_s1 + $0x1f0] sm:$0xff] }
  0x97   : > { %1470 = vmatpush.msrb.mxu3 %v4717_v19  ;;  %1229 = vmatpush.msrb.mxu0 %v4770_v12 }
  0x98   : > { %1200 = vmatmul.f32.gmra.mxu3 %v4529_v58  ;;  %1320 = vmatpush.msrb.mxu1 %v1319_v22  ;;  %v4866_v58 = vand.u32 4294901760, %v273_v34  ;;  %v4879_v22 = vand.u32 4294901760, %v188_v61 }
  0x99   : > { %1415 = vmatpush.msrb.mxu2 %v4776_v49  ;;  %1472 = vmatpush.msrb.mxu3 %v4738_v60 }
  0x9a   : > { %1231 = vmatpush.msrb.mxu0 %v4783_v23  ;;  %1068 = vmatmul.f32.gmra.mxu1 %v824_v29  ;;  %v1243_v29 = vsub.f32 %v4827_v63, %v7141_v62  ;;  %v4900_v55 = vsub.f32 %v273_v34, %v4866_v58  ;;  %v1354_v34 = vsub.f32 %v4850_v43, %v7138_v28  ;;  %v4941_v62 = vand.u32 4294901760, %v269_v15 }
  0x9b   : > { %1017 = vmatmul.f32.gmra.mxu0 %v4576_v50  ;;  %1326 = vmatpush.msrb.mxu1 %v1325_v57  ;;  %v4892_v57 = vand.u32 4294901760, %v272_v8  ;;  %v4915_v14 = vsub.f32 %v188_v61, %v4879_v22  ;;  %v1349_v61 = vand.u32 4294901760, %v1348_v10  ;;  %v267_v50 = vld [vmem:[%s7100_s1 + $0x1c8] sm:$0xff] }
  0x9c   : > { %1418 = vmatpush.msrb.mxu2 %v4798_v33  ;;  %1474 = vmatpush.msrb.mxu3 %v4750_v40  ;;  %v1244_v35 = vand.u32 4294901760, %v1243_v29  ;;  %v7145_v29 = vand.u32 4294901760, %v4900_v55  ;;  %v1355_v10 = vand.u32 4294901760, %v1354_v34  ;;  %7283 = vst [vmem:[#allocation5_spill] sm:$0xff] %v4941_v62 }
  0x9d   : > { %1233 = vmatpush.msrb.mxu0 %v4806_v30  ;;  %1332 = vmatpush.msrb.mxu1 %v1331_v7  ;;  %v270_v7 = vld [vmem:[%s7100_s1 + $0x1e0] sm:$0xff]  ;;  %v4920_v25 = vsub.f32 %v272_v8, %v4892_v57  ;;  %v4935_v8 = vsub.f32 %v271_v45, %v4904_v39  ;;  %v7147_v51 = vand.u32 4294901760, %v4915_v14 }
  0x9e   : > { %1421 = vmatpush.msrb.mxu2 %v4812_v0  ;;  %1476 = vmatpush.msrb.mxu3 %v4770_v12  ;;  %v4931_v28 = vand.u32 4294901760, %v270_v7  ;;  %v1710_v34 = vsub.f32 %v4900_v55, %v7145_v29 }
  0x9f   : > { %1235 = vmatpush.msrb.mxu0 %v4821_v42  ;;  %1155 = vmatmul.f32.gmra.mxu2 %v4560_v32  ;;  %7282 = vst [vmem:[#allocation4_spill] sm:$0xff] %v4935_v8  ;;  %v7148_v45 = vand.u32 4294901760, %v4920_v25 }
  0xa0   : > { %1338 = vmatpush.msrb.mxu1 %v1337_v27  ;;  %1424 = vmatpush.msrb.mxu2 %v4835_v13  ;;  %v1360_v27 = vsub.f32 %v4864_v18, %v7142_v53  ;;  %v268_v53 = vld [vmem:[%s7100_s1 + $0x1d0] sm:$0xff]  ;;  %v4957_v1 = vsub.f32 %v270_v7, %v4931_v28  ;;  %v1251_v7 = vsub.f32 %v4915_v14, %v7147_v51 }
  0xa1   : > { %1478 = vmatpush.msrb.mxu3 %v4783_v23  ;;  %1237 = vmatpush.msrb.mxu0 %v4837_v11  ;;  %v1716_v29 = vsub.f32 %v4920_v25, %v7148_v45  ;;  %v4991_v51 = vsub.f32 %v196_v5, %v4959_v21  ;;  %v7285_v5 = vand.u32 4294901760, %v4661_v17 }
  0xa2   : > { %1204 = vmatmul.f32.gmra.mxu3 %v4560_v32  ;;  %1344 = vmatpush.msrb.mxu1 %v1343_v48  ;;  %v1366_v32 = vsub.f32 %v4890_v2, %v7146_v26  ;;  %v1361_v48 = vand.u32 4294901760, %v1360_v27  ;;  %v4982_v26 = vand.u32 4294901760, %v267_v50  ;;  %v7289_v17 = vand.u32 4294901760, %v4957_v1 }
  0xa3   : > { %1427 = vmatpush.msrb.mxu2 %v4850_v43  ;;  %1480 = vmatpush.msrb.mxu3 %v4806_v30 }
  0xa4   : > { %1239 = vmatpush.msrb.mxu0 %v4856_v54  ;;  %1074 = vmatmul.f32.gmra.mxu1 %v832_v41  ;;  %v7149_v41 = vand.u32 4294901760, %v4935_v8  ;;  %v1367_v27 = vand.u32 4294901760, %v1366_v32 }
  0xa5   : > { %1245 = vmatmul.f32.vlgmr.msrb.gmra.mxu0 %v1244_v35  ;;  %1350 = vmatpush.msrb.mxu1 %v1349_v61  ;;  %v4967_v35 = vand.u32 4294901760, %v268_v53  ;;  %v4975_v61 = vsub.f32 %v269_v15, %v4941_v62  ;;  %v1711_v15 = vand.u32 4294901760, %v1710_v34 }
  0xa6   : > { %1430 = vmatpush.msrb.mxu2 %v4864_v18  ;;  %1482 = vmatpush.msrb.mxu3 %v4821_v42  ;;  %v1722_v32 = vsub.f32 %v4935_v8, %v7149_v41  ;;  %v1717_v41 = vand.u32 4294901760, %v1716_v29  ;;  %v204_v8 = vld [vmem:[%s4074_s17 + $0xd0] sm:$0xff]  ;;  %v7290_v29 = vand.u32 4294901760, %v4675_v31  ;;  %v263_v31 = vld [vmem:[%s7100_s1 + $0x1a8] sm:$0xff] }
  0xa7   : > { %1515 = vmatpush.msra.mxu0 %v1275_v9  ;;  %1356 = vmatpush.msrb.mxu1 %v1355_v10  ;;  %v7284_v9 = vand.u32 4294901760, %v4645_v36  ;;  %v4999_v45 = vsub.f32 %v268_v53, %v4967_v35  ;;  %v265_v36 = vld [vmem:[%s7100_s1 + $0x1b8] sm:$0xff]  ;;  %v7287_v53 = vand.u32 4294901760, %v4827_v63 }
  0xa8   : > { %1433 = vmatpush.msrb.mxu2 %v4890_v2  ;;  %1484 = vmatpush.msrb.mxu3 %v4837_v11  ;;  %v5023_v34 = vand.u32 4294901760, %v265_v36 }
  0xa9   : > { %1519 = vmatpush.msra.mxu0 %v7284_v9  ;;  %1362 = vmatpush.msrb.mxu1 %v1361_v48  ;;  %v1252_v48 = vand.u32 4294901760, %v1251_v7  ;;  %v5008_v9 = vand.u32 4294901760, %v266_v3  ;;  %v1728_v7 = vsub.f32 %v4957_v1, %v7289_v17 }
  0xaa   : > { %1436 = vmatmul.f32.vlgmr.msrb.gmra.mxu2 %v4827_v63  ;;  %1486 = vmatpush.msrb.mxu3 %v4856_v54  ;;  %v5015_v54 = vsub.f32 %v267_v50, %v4982_v26  ;;  %v264_v63 = vld [vmem:[%s7100_s1 + $0x1b0] sm:$0xff]  ;;  %v1723_v50 = vand.u32 4294901760, %v1722_v32 }
  0xab   : > { %1643 = vmatpush.msra.mxu2 %v4866_v58  ;;  %1523 = vmatpush.msra.mxu0 %v7285_v5  ;;  %v5010_v10 = vpop.f32.mrf.mxu0  ;;  %v5037_v17 = vsub.f32 %v266_v3, %v5008_v9  ;;  %v5039_v5 = vand.u32 4294901760, %v204_v8  ;;  %v1729_v3 = vand.u32 4294901760, %v1728_v7 }
  0xac   : > { %7286 = vst [vmem:[#allocation6_spill] sm:$0xff] %v5010_v10  ;;  %1368 = vmatpush.msrb.mxu1 %v1367_v27  ;;  %1490 = vmatmul.f32.vlgmr.msrb.gmra.mxu3 %v7287_v53  ;;  %v5055_v27 = vsub.f32 %v265_v36, %v5023_v34  ;;  %v5061_v10 = vand.u32 4294901760, %v263_v31 }
  0xad   : > { %7288 = vst [vmem:[#allocation7_spill] sm:$0xff] %v5015_v54  ;;  %1645 = vmatpush.msra.mxu2 %v4892_v57  ;;  %1712 = vmatpush.msra.mxu3 %v1711_v15  ;;  %v7291_v15 = vand.u32 4294901760, %v4975_v61 }
  0xae   : > { %1527 = vmatpush.msra.mxu0 %v7290_v29  ;;  %1370 = vmatmul.f32.vlgmr.msrb.gmra.mxu1 %v4803_v20  ;;  %v7293_v29 = vand.u32 4294901760, %v4991_v51  ;;  %v7157_v7 = vand.u32 4294901760, %v5055_v27 }
  0xaf   : > { %1253 = vmatmul.f32.gmra.mxu0 %v1252_v48  ;;  %1594 = vmatpush.msra.mxu1 %v4615_v6  ;;  %v1734_v53 = vsub.f32 %v4975_v61, %v7291_v15  ;;  %v5046_v48 = vand.u32 4294901760, %v264_v63  ;;  %v7292_v6 = vand.u32 4294901760, %v4697_v24  ;;  %v7295_v24 = vand.u32 4294901760, %v4710_v56 }
  0xb0   : > { %1647 = vmatpush.msra.mxu2 %v4904_v39  ;;  %1718 = vmatpush.msra.mxu3 %v1717_v41  ;;  %v1259_v15 = vsub.f32 %v4991_v51, %v7293_v29  ;;  %v7294_v41 = vand.u32 4294901760, %v4999_v45  ;;  %v7297_v29 = vand.u32 4294901760, %v5015_v54 }
  0xb1   : > { %1531 = vmatpush.msra.mxu0 %v7292_v6  ;;  %1596 = vmatpush.msra.mxu1 %v4622_v47  ;;  %v262_v47 = vld [vmem:[%s7100_s1 + $0x1a0] sm:$0xff]  ;;  %v1735_v36 = vand.u32 4294901760, %v1734_v53  ;;  %v5081_v56 = vsub.f32 %v264_v63, %v5046_v48  ;;  %v261_v53 = vld [vmem:[%s7100_s1 + $0x198] sm:$0xff]  ;;  %v7301_v63 = vand.u32 4294901760, %v4915_v14 }
  0xb2   : > { %1649 = vmatpush.msra.mxu2 %v4931_v28  ;;  %1724 = vmatpush.msra.mxu3 %v1723_v50  ;;  %v1740_v32 = vsub.f32 %v4999_v45, %v7294_v41  ;;  %v5071_v50 = vsub.f32 %v204_v8, %v5039_v5  ;;  %v1746_v41 = vsub.f32 %v5015_v54, %v7297_v29  ;;  %v7299_v8 = vand.u32 4294901760, %v4732_v52 }
  0xb3   : > { %1535 = vmatpush.msra.mxu0 %v7295_v24  ;;  %1441 = vmatmul.f32.gmra.mxu2 %v4915_v14  ;;  %v5073_v6 = vpop.f32.mrf.mxu1  ;;  %v5099_v54 = vsub.f32 %v263_v31, %v5061_v10  ;;  %v7302_v52 = vand.u32 4294901760, %v5037_v17  ;;  %v260_v14 = vld [vmem:[%s7100_s1 + $0x190] sm:$0xff] }
  0xb4   : > { %7296 = vst [vmem:[#allocation8_spill] sm:$0xff] %v5073_v6  ;;  %1598 = vmatpush.msra.mxu1 %v4640_v59  ;;  %1651 = vmatpush.msra.mxu2 %v4941_v62  ;;  %v5086_v24 = vpop.f32.mrf.mxu0  ;;  %v1260_v59 = vand.u32 4294901760, %v1259_v15  ;;  %v5091_v6 = vand.u32 4294901760, %v262_v47  ;;  %v1741_v29 = vand.u32 4294901760, %v1740_v32  ;;  %v7158_v15 = vand.u32 4294901760, %v5071_v50 }
  0xb5   : > { %7298 = vst [vmem:[#allocation9_spill] sm:$0xff] %v5086_v24  ;;  %1730 = vmatpush.msra.mxu3 %v1729_v3  ;;  %1539 = vmatpush.msra.mxu0 %v7299_v8  ;;  %v5093_v62 = vpop.f32.mrf.mxu2  ;;  %v1752_v3 = vsub.f32 %v5037_v17, %v7302_v52  ;;  %v5106_v8 = vand.u32 4294901760, %v261_v53  ;;  %v1747_v31 = vand.u32 4294901760, %v1746_v41  ;;  %v7159_v32 = vand.u32 4294901760, %v5081_v56  ;;  %v181_v41 = vld [vmem:[%s4074_s17 + $0x18] sm:$0xff] }
  0xb6   : > { %7300 = vst [vmem:[#allocation10_spill] sm:$0xff] %v5093_v62  ;;  %1496 = vmatmul.f32.gmra.mxu3 %v7301_v63  ;;  %1600 = vmatpush.msra.mxu1 %v4649_v46  ;;  %v7303_v46 = vand.u32 4294901760, %v4744_v16  ;;  %v1758_v63 = vsub.f32 %v5055_v27, %v7157_v7  ;;  %v5122_v52 = vsub.f32 %v262_v47, %v5091_v6  ;;  %v259_v16 = vld [vmem:[%s7100_s1 + $0x188] sm:$0xff] }
  0xb7   : > { %1653 = vmatpush.msra.mxu2 %v4967_v35  ;;  %1736 = vmatpush.msra.mxu3 %v1735_v36  ;;  %v5115_v36 = vpop.f32.mrf.mxu3  ;;  %v1267_v47 = vsub.f32 %v5071_v50, %v7158_v15  ;;  %v5138_v7 = vsub.f32 %v261_v53, %v5106_v8 }
  0xb8   : > { %1543 = vmatpush.msra.mxu0 %v7303_v46  ;;  %1374 = vmatmul.f32.gmra.mxu1 %v4879_v22  ;;  %7304 = vst [vmem:[#allocation11_spill] sm:$0xff] %v5115_v36  ;;  %v5129_v46 = vand.u32 4294901760, %v260_v14  ;;  %v1759_v53 = vand.u32 4294901760, %v1758_v63 }
  0xb9   : > { %1261 = vmatmul.f32.gmra.mxu0 %v1260_v59  ;;  %1602 = vmatpush.msra.mxu1 %v4668_v38  ;;  %v7305_v38 = vand.u32 4294901760, %v4764_v37  ;;  %v1753_v59 = vand.u32 4294901760, %v1752_v3  ;;  %v5148_v37 = vand.u32 4294901760, %v259_v16  ;;  %v7306_v3 = vand.u32 4294901760, %v4776_v49 }
  0xba   : > { %1655 = vmatpush.msra.mxu2 %v4982_v26  ;;  %1742 = vmatpush.msra.mxu3 %v1741_v29  ;;  %v258_v29 = vld [vmem:[%s7100_s1 + $0x180] sm:$0xff]  ;;  %v5162_v36 = vsub.f32 %v260_v14, %v5129_v46 }
  0xbb   : > { %1547 = vmatpush.msra.mxu0 %v7305_v38  ;;  %1604 = vmatpush.msra.mxu1 %v4682_v4  ;;  %v1764_v4 = vsub.f32 %v5081_v56, %v7159_v32  ;;  %v5164_v49 = vand.u32 4294901760, %v258_v29  ;;  %v7310_v38 = vand.u32 4294901760, %v4798_v33  ;;  %v5179_v62 = vsub.f32 %v259_v16, %v5148_v37 }
  0xbc   : > { %1657 = vmatpush.msra.mxu2 %v5008_v9  ;;  %1748 = vmatpush.msra.mxu3 %v1747_v31  ;;  %v7308_v31 = vand.u32 4294901760, %v5099_v54  ;;  %v7313_v33 = vand.u32 4294901760, %v5122_v52 }
  0xbd   : > { %1551 = vmatpush.msra.mxu0 %v7306_v3  ;;  %1446 = vmatmul.f32.gmra.mxu2 %v4991_v51  ;;  %v5154_v15 = vpop.f32.mrf.mxu1  ;;  %v5166_v3 = vand.u32 4294901760, %v181_v41  ;;  %v1765_v14 = vand.u32 4294901760, %v1764_v4  ;;  %v5193_v16 = vsub.f32 %v258_v29, %v5164_v49 }
  0xbe   : > { %7307 = vst [vmem:[#allocation12_spill] sm:$0xff] %v5154_v15  ;;  %1606 = vmatpush.msra.mxu1 %v4704_v44  ;;  %1659 = vmatpush.msra.mxu2 %v5023_v34  ;;  %v1770_v32 = vsub.f32 %v5099_v54, %v7308_v31  ;;  %v5168_v63 = vpop.f32.mrf.mxu0  ;;  %v1268_v44 = vand.u32 4294901760, %v1267_v47  ;;  %v1781_v15 = vand.u32 4294901760, %v5138_v7  ;;  %v5173_v24 = vpop.f32.mrf.mxu2  ;;  %v7312_v31 = vand.u32 4294901760, %v4991_v51 }
  0xbf   : > { %7309 = vst [vmem:[#allocation13_spill] sm:$0xff] %v5168_v63  ;;  %1754 = vmatpush.msra.mxu3 %v1753_v59  ;;  %1555 = vmatpush.msra.mxu0 %v7310_v38  ;;  %v1776_v59 = vsub.f32 %v5122_v52, %v7313_v33  ;;  %v7314_v47 = vand.u32 4294901760, %v4812_v0  ;;  %v5190_v4 = vsub.f32 %v181_v41, %v5166_v3  ;;  %v7316_v41 = vand.u32 4294901760, %v4835_v13 }
  0xc0   : > { %7311 = vst [vmem:[#allocation14_spill] sm:$0xff] %v5173_v24  ;;  %1502 = vmatmul.f32.gmra.mxu3 %v7312_v31  ;;  %1608 = vmatpush.msra.mxu1 %v4717_v19  ;;  %v1771_v51 = vand.u32 4294901760, %v1770_v32  ;;  %v1787_v19 = vand.u32 4294901760, %v5162_v36  ;;  %v1782_v0 = vsub.f32 %v5138_v7, %v1781_v15  ;;  %v1793_v32 = vand.u32 4294901760, %v5179_v62 }
  0xc1   : > { %1661 = vmatpush.msra.mxu2 %v5046_v48  ;;  %1760 = vmatpush.msra.mxu3 %v1759_v53  ;;  %v5195_v38 = vpop.f32.mrf.mxu3  ;;  %v189_v53 = vld [vmem:[%s4074_s17 + $0x58] sm:$0xff]  ;;  %v1777_v29 = vand.u32 4294901760, %v1776_v59  ;;  %v1799_v31 = vand.u32 4294901760, %v5193_v16 }
  0xc2   : > { %1559 = vmatpush.msra.mxu0 %v7314_v47  ;;  %1378 = vmatmul.f32.gmra.mxu1 %v4959_v21  ;;  %7315 = vst [vmem:[#allocation15_spill] sm:$0xff] %v5195_v38  ;;  %v1783_v13 = vand.u32 4294901760, %v1782_v0  ;;  %v5216_v33 = vand.u32 4294901760, %v189_v53  ;;  %v1794_v59 = vsub.f32 %v5179_v62, %v1793_v32  ;;  %v7322_v0 = vand.u32 4294901760, %v5071_v50 }
  0xc3   : > { %1269 = vmatmul.f32.gmra.mxu0 %v1268_v44  ;;  %1610 = vmatpush.msra.mxu1 %v4738_v60  ;;  %v1788_v60 = vsub.f32 %v5162_v36, %v1787_v19  ;;  %v1676_v44 = vand.u32 4294901760, %v5190_v4 }
  0xc4   : > { %1663 = vmatpush.msra.mxu2 %v5061_v10  ;;  %1766 = vmatpush.msra.mxu3 %v1765_v14  ;;  %v7317_v14 = vand.u32 4294901760, %v4850_v43  ;;  %v7320_v43 = vand.u32 4294901760, %v4864_v18  ;;  %v5242_v18 = vsub.f32 %v189_v53, %v5216_v33 }
  0xc5   : > { %1563 = vmatpush.msra.mxu0 %v7316_v41  ;;  %1612 = vmatpush.msra.mxu1 %v4750_v40  ;;  %v1677_v41 = vsub.f32 %v5190_v4, %v1676_v44 }
  0xc6   : > { %1665 = vmatpush.msra.mxu2 %v5091_v6  ;;  %1772 = vmatpush.msra.mxu3 %v1771_v51 }
  0xc7   : > { %1567 = vmatpush.msra.mxu0 %v7317_v14  ;;  %1451 = vmatmul.f32.gmra.mxu2 %v5071_v50  ;;  %v5218_v40 = vpop.f32.mrf.mxu1  ;;  %v7323_v50 = vand.u32 4294901760, %v4890_v2  ;;  %v1678_v14 = vand.u32 4294901760, %v1677_v41  ;;  %v7167_v2 = vand.u32 4294901760, %v5242_v18 }
  0xc8   : > { %7318 = vst [vmem:[#allocation16_spill] sm:$0xff] %v5218_v40  ;;  %1614 = vmatpush.msra.mxu1 %v4770_v12  ;;  %1667 = vmatpush.msra.mxu2 %v5106_v8  ;;  %v5225_v47 = vpop.f32.mrf.mxu0  ;;  %v5229_v51 = vpop.f32.mrf.mxu2  ;;  %v1789_v12 = vand.u32 4294901760, %v1788_v60 }
  0xc9   : > { %7319 = vst [vmem:[#allocation17_spill] sm:$0xff] %v5225_v47  ;;  %1778 = vmatpush.msra.mxu3 %v1777_v29  ;;  %1571 = vmatpush.msra.mxu0 %v7320_v43  ;;  %v1800_v29 = vsub.f32 %v5193_v16, %v1799_v31  ;;  %v197_v43 = vld [vmem:[%s4074_s17 + $0x98] sm:$0xff] }
  0xca   : > { %7321 = vst [vmem:[#allocation18_spill] sm:$0xff] %v5229_v51  ;;  %1508 = vmatmul.f32.gmra.mxu3 %v7322_v0  ;;  %1616 = vmatpush.msra.mxu1 %v4783_v23  ;;  %v1795_v23 = vand.u32 4294901760, %v1794_v59  ;;  %v7327_v0 = vand.u32 4294901760, %v4900_v55  ;;  %v300_v51 = vld [vmem:[%s7100_s1 + $0x2d0] sm:$0xff] }
  0xcb   : > { %1669 = vmatpush.msra.mxu2 %v5129_v46  ;;  %1784 = vmatpush.msra.mxu3 %v1783_v13  ;;  %v5247_v60 = vpop.f32.mrf.mxu3  ;;  %v1801_v13 = vand.u32 4294901760, %v1800_v29  ;;  %v7331_v29 = vand.u32 4294901760, %v4920_v25 }
  0xcc   : > { %1575 = vmatpush.msra.mxu0 %v7323_v50  ;;  %1382 = vmatmul.f32.gmra.mxu1 %v5039_v5  ;;  %7324 = vst [vmem:[#allocation19_spill] sm:$0xff] %v5247_v60  ;;  %v303_v60 = vld [vmem:[%s7100_s1 + $0x2e8] sm:$0xff] }
  0xcd   : > { %1577 = vmatmul.f32.vlgmr.msra.gmra.mxu0 %v4803_v20  ;;  %1618 = vmatpush.msra.mxu1 %v4806_v30  ;;  %v5259_v30 = vand.u32 4294901760, %v197_v43 }
  0xce   : > { %1671 = vmatpush.msra.mxu2 %v5148_v37  ;;  %1790 = vmatpush.msra.mxu3 %v1789_v12  ;;  %v1685_v12 = vsub.f32 %v5242_v18, %v7167_v2 }
  0xcf   : > { %1822 = vmatpush.msrb.mxu0 %v4900_v55  ;;  %1620 = vmatpush.msra.mxu1 %v4821_v42  ;;  %v7328_v42 = vld [vmem:[#allocation4_spill] sm:$0xff]  ;;  %v5279_v55 = vsub.f32 %v197_v43, %v5259_v30 }
  0xd0   : > { %1673 = vmatpush.msra.mxu2 %v5164_v49  ;;  %1796 = vmatpush.msra.mxu3 %v1795_v23  ;;  %v1686_v23 = vand.u32 4294901760, %v1685_v12 }
  0xd1   : > { %1825 = vmatpush.msrb.mxu0 %v4920_v25  ;;  %1622 = vmatpush.msra.mxu1 %v4837_v11  ;;  %v5261_v53 = vpop.f32.mrf.mxu1  ;;  %v7330_v11 = vld [vmem:[#allocation3_spill] sm:$0xff]  ;;  %v205_v25 = vld [vmem:[%s4074_s17 + $0xd8] sm:$0xff] }
  0xd2   : > { %7325 = vst [vmem:[#allocation20_spill] sm:$0xff] %v5261_v53  ;;  %1679 = vmatmul.f32.vlgmr.msra.gmra.mxu2 %v1678_v14  ;;  %1802 = vmatpush.msra.mxu3 %v1801_v13  ;;  %v5263_v59 = vpop.f32.mrf.mxu0  ;;  %v5271_v41 = vpop.f32.mrf.mxu2  ;;  %v7333_v14 = vand.u32 4294901760, %v7328_v42  ;;  %v7166_v13 = vand.u32 4294901760, %v5279_v55  ;;  %v198_v53 = vld [vmem:[%s4074_s17 + $0xa0] sm:$0xff] }
  0xd3   : > { %7326 = vst [vmem:[#allocation21_spill] sm:$0xff] %v5263_v59  ;;  %1949 = vmatpush.msrb.mxu2 %v7327_v0  ;;  %1828 = vmatpush.msrb.mxu0 %v7328_v42  ;;  %v7336_v0 = vand.u32 4294901760, %v4975_v61 }
  0xd4   : > { %7329 = vst [vmem:[#allocation4_spill] sm:$0xff] %v5271_v41  ;;  %1624 = vmatpush.msra.mxu1 %v7330_v11  ;;  %1804 = vmatmul.f32.vlgmr.msra.gmra.mxu3 %v5166_v3  ;;  %v1693_v42 = vsub.f32 %v5279_v55, %v7166_v13  ;;  %v278_v13 = vld [vmem:[%s7100_s1 + $0x220] sm:$0xff] }
  0xd5   : > { %1953 = vmatpush.msrb.mxu2 %v7331_v29  ;;  %2028 = vmatpush.msrb.mxu3 %v4866_v58  ;;  %v5283_v50 = vpop.f32.mrf.mxu3 }
  0xd6   : > { %1831 = vmatpush.msrb.mxu0 %v4957_v1  ;;  %1626 = vmatmul.f32.vlgmr.msra.gmra.mxu1 %v4803_v20  ;;  %7332 = vst [vmem:[#allocation3_spill] sm:$0xff] %v5283_v50  ;;  %v7334_v20 = vand.u32 4294901760, %v4957_v1  ;;  %v7338_v1 = vld [vmem:[#allocation7_spill] sm:$0xff] }
  0xd7   : > { %1581 = vmatmul.f32.gmra.mxu0 %v4879_v22  ;;  %1890 = vmatpush.msrb.mxu1 %v4866_v58  ;;  %v5298_v58 = vand.u32 4294901760, %v205_v25 }
  0xd8   : > { %1957 = vmatpush.msrb.mxu2 %v7333_v14  ;;  %2030 = vmatpush.msrb.mxu3 %v4892_v57 }
  0xd9   : > { %1834 = vmatpush.msrb.mxu0 %v4975_v61  ;;  %1892 = vmatpush.msrb.mxu1 %v4892_v57  ;;  %v7341_v61 = vld [vmem:[#allocation5_spill] sm:$0xff]  ;;  %v5320_v11 = vsub.f32 %v205_v25, %v5298_v58  ;;  %v7346_v25 = vand.u32 4294901760, %v5055_v27 }
  0xda   : > { %1961 = vmatpush.msrb.mxu2 %v7334_v20  ;;  %2032 = vmatpush.msrb.mxu3 %v4904_v39 }
  0xdb   : > { %1837 = vmatpush.msrb.mxu0 %v4999_v45  ;;  %1687 = vmatmul.f32.gmra.mxu2 %v1686_v23  ;;  %v5300_v43 = vpop.f32.mrf.mxu1  ;;  %v1694_v23 = vand.u32 4294901760, %v1693_v42 }
  0xdc   : > { %7335 = vst [vmem:[#allocation22_spill] sm:$0xff] %v5300_v43  ;;  %1894 = vmatpush.msrb.mxu1 %v4904_v39  ;;  %1965 = vmatpush.msrb.mxu2 %v7336_v0  ;;  %v5305_v57 = vpop.f32.mrf.mxu0  ;;  %v7340_v39 = vand.u32 4294901760, %v4999_v45  ;;  %v7164_v45 = vand.u32 4294901760, %v5320_v11  ;;  %v288_v0 = vld [vmem:[%s7100_s1 + $0x270] sm:$0xff] }
  0xdd   : > { %7337 = vst [vmem:[#allocation23_spill] sm:$0xff] %v5305_v57  ;;  %2034 = vmatpush.msrb.mxu3 %v4931_v28  ;;  %1840 = vmatpush.msrb.mxu0 %v7338_v1  ;;  %v5312_v12 = vpop.f32.mrf.mxu2 }
  0xde   : > { %7339 = vst [vmem:[#allocation7_spill] sm:$0xff] %v5312_v12  ;;  %1808 = vmatmul.f32.gmra.mxu3 %v5216_v33  ;;  %1896 = vmatpush.msrb.mxu1 %v4931_v28  ;;  %v7343_v28 = vand.u32 4294901760, %v7338_v1  ;;  %v301_v12 = vld [vmem:[%s7100_s1 + $0x2d8] sm:$0xff] }
  0xdf   : > { %1969 = vmatpush.msrb.mxu2 %v7340_v39  ;;  %2036 = vmatpush.msrb.mxu3 %v7341_v61  ;;  %v5324_v29 = vpop.f32.mrf.mxu3  ;;  %v287_v39 = vld [vmem:[%s7100_s1 + $0x268] sm:$0xff]  ;;  %v5733_v40 = vand.u32 4294901760, %v301_v12 }
  0xe0   : > { %1843 = vmatpush.msrb.mxu0 %v5037_v17  ;;  %1630 = vmatmul.f32.gmra.mxu1 %v4879_v22  ;;  %7342 = vst [vmem:[#allocation5_spill] sm:$0xff] %v5324_v29  ;;  %v7344_v22 = vand.u32 4294901760, %v5037_v17 }
  0xe1   : > { %1585 = vmatmul.f32.gmra.mxu0 %v4959_v21  ;;  %1898 = vmatpush.msrb.mxu1 %v7341_v61  ;;  %7386 = vst [vmem:[#allocation49_spill] sm:$0xff] %v5733_v40 }
  0xe2   : > { %1973 = vmatpush.msrb.mxu2 %v7343_v28  ;;  %2038 = vmatpush.msrb.mxu3 %v4967_v35 }
  0xe3   : > { %1846 = vmatpush.msrb.mxu0 %v5055_v27  ;;  %1900 = vmatpush.msrb.mxu1 %v4967_v35  ;;  %v1701_v35 = vsub.f32 %v5320_v11, %v7164_v45  ;;  %v7349_v27 = vand.u32 4294901760, %v5081_v56  ;;  %v279_v45 = vld [vmem:[%s7100_s1 + $0x228] sm:$0xff] }
  0xe4   : > { %1977 = vmatpush.msrb.mxu2 %v7344_v22  ;;  %2040 = vmatpush.msrb.mxu3 %v4982_v26 }
  0xe5   : > { %1849 = vmatpush.msrb.mxu0 %v5081_v56  ;;  %1695 = vmatmul.f32.gmra.mxu2 %v1694_v23  ;;  %v5338_v14 = vpop.f32.mrf.mxu1  ;;  %v7351_v56 = vand.u32 4294901760, %v5099_v54 }
  0xe6   : > { %7345 = vst [vmem:[#allocation24_spill] sm:$0xff] %v5338_v14  ;;  %1902 = vmatpush.msrb.mxu1 %v4982_v26  ;;  %1981 = vmatpush.msrb.mxu2 %v7346_v25  ;;  %v5343_v20 = vpop.f32.mrf.mxu0  ;;  %v5350_v17 = vpop.f32.mrf.mxu2  ;;  %v289_v26 = vld [vmem:[%s7100_s1 + $0x278] sm:$0xff] }
  0xe7   : > { %7347 = vst [vmem:[#allocation25_spill] sm:$0xff] %v5343_v20  ;;  %2042 = vmatpush.msrb.mxu3 %v5008_v9  ;;  %1852 = vmatpush.msrb.mxu0 %v5099_v54  ;;  %v5369_v42 = vand.u32 4294901760, %v289_v26 }
  0xe8   : > { %7348 = vst [vmem:[#allocation26_spill] sm:$0xff] %v5350_v17  ;;  %1812 = vmatmul.f32.gmra.mxu3 %v5259_v30  ;;  %1904 = vmatpush.msrb.mxu1 %v5008_v9  ;;  %v1702_v9 = vand.u32 4294901760, %v1701_v35 }
  0xe9   : > { %1985 = vmatpush.msrb.mxu2 %v7349_v27  ;;  %2044 = vmatpush.msrb.mxu3 %v5023_v34  ;;  %v5365_v1 = vpop.f32.mrf.mxu3  ;;  %v5386_v54 = vsub.f32 %v289_v26, %v5369_v42 }
  0xea   : > { %1855 = vmatpush.msrb.mxu0 %v5122_v52  ;;  %1634 = vmatmul.f32.gmra.mxu1 %v4959_v21  ;;  %7350 = vst [vmem:[#allocation27_spill] sm:$0xff] %v5365_v1  ;;  %v5376_v21 = vand.u32 4294901760, %v288_v0 }
  0xeb   : > { %1589 = vmatmul.f32.gmra.mxu0 %v5039_v5  ;;  %1906 = vmatpush.msrb.mxu1 %v5023_v34  ;;  %v7352_v34 = vand.u32 4294901760, %v5122_v52  ;;  %v5396_v52 = vand.u32 4294901760, %v287_v39 }
  0xec   : > { %1989 = vmatpush.msrb.mxu2 %v7351_v56  ;;  %2046 = vmatpush.msrb.mxu3 %v5046_v48  ;;  %v5403_v28 = vsub.f32 %v288_v0, %v5376_v21 }
  0xed   : > { %1858 = vmatpush.msrb.mxu0 %v5138_v7  ;;  %1908 = vmatpush.msrb.mxu1 %v5046_v48  ;;  %v286_v48 = vld [vmem:[%s7100_s1 + $0x260] sm:$0xff]  ;;  %v285_v7 = vld [vmem:[%s7100_s1 + $0x258] sm:$0xff]  ;;  %v5421_v25 = vsub.f32 %v287_v39, %v5396_v52 }
  0xee   : > { %1993 = vmatpush.msrb.mxu2 %v7352_v34  ;;  %2048 = vmatpush.msrb.mxu3 %v5061_v10 }
  0xef   : > { %1861 = vmatpush.msrb.mxu0 %v5162_v36  ;;  %1703 = vmatmul.f32.gmra.mxu2 %v1702_v9  ;;  %v5391_v61 = vpop.f32.mrf.mxu1  ;;  %v5430_v36 = vand.u32 4294901760, %v285_v7 }
  0xf0   : > { %7353 = vst [vmem:[#allocation28_spill] sm:$0xff] %v5391_v61  ;;  %1910 = vmatpush.msrb.mxu1 %v5061_v10  ;;  %1997 = vmatpush.msrb.mxu2 %v1781_v15  ;;  %v5398_v23 = vpop.f32.mrf.mxu0  ;;  %v5405_v22 = vpop.f32.mrf.mxu2  ;;  %v5409_v10 = vand.u32 4294901760, %v286_v48  ;;  %v7162_v15 = vand.u32 4294901760, %v5386_v54 }
  0xf1   : > { %7354 = vst [vmem:[#allocation29_spill] sm:$0xff] %v5398_v23  ;;  %2050 = vmatpush.msrb.mxu3 %v5091_v6  ;;  %1864 = vmatpush.msrb.mxu0 %v5179_v62  ;;  %v283_v62 = vld [vmem:[%s7100_s1 + $0x248] sm:$0xff]  ;;  %v5459_v27 = vsub.f32 %v285_v7, %v5430_v36 }
  0xf2   : > { %7355 = vst [vmem:[#allocation30_spill] sm:$0xff] %v5405_v22  ;;  %1816 = vmatmul.f32.gmra.mxu3 %v5298_v58  ;;  %1912 = vmatpush.msrb.mxu1 %v5091_v6  ;;  %v284_v6 = vld [vmem:[%s7100_s1 + $0x250] sm:$0xff]  ;;  %v5468_v0 = vand.u32 4294901760, %v283_v62  ;;  %v5559_v22 = vand.u32 4294901760, %v278_v13 }
  0xf3   : > { %2001 = vmatpush.msrb.mxu2 %v1787_v19  ;;  %2052 = vmatpush.msrb.mxu3 %v5106_v8  ;;  %v5426_v35 = vpop.f32.mrf.mxu3  ;;  %v7160_v19 = vand.u32 4294901760, %v5403_v28  ;;  %v5444_v26 = vand.u32 4294901760, %v284_v6 }
  0xf4   : > { %1867 = vmatpush.msrb.mxu0 %v5193_v16  ;;  %1638 = vmatmul.f32.gmra.mxu1 %v5039_v5  ;;  %7356 = vst [vmem:[#allocation31_spill] sm:$0xff] %v5426_v35  ;;  %v5437_v5 = vsub.f32 %v286_v48, %v5409_v10  ;;  %v282_v16 = vld [vmem:[%s7100_s1 + $0x240] sm:$0xff] }
  0xf5   : > { %1870 = vmatmul.f32.vlgmr.msrb.gmra.mxu0 %v5190_v4  ;;  %1914 = vmatpush.msrb.mxu1 %v5106_v8  ;;  %v2144_v8 = vsub.f32 %v5386_v54, %v7162_v15  ;;  %v5476_v39 = vsub.f32 %v284_v6, %v5444_v26  ;;  %v5485_v7 = vand.u32 4294901760, %v282_v16  ;;  %v182_v35 = vld [vmem:[%s4074_s17 + $0x20] sm:$0xff] }
  0xf6   : > { %2005 = vmatpush.msrb.mxu2 %v1793_v32  ;;  %2054 = vmatpush.msrb.mxu3 %v5129_v46  ;;  %v7161_v32 = vand.u32 4294901760, %v5421_v25 }
  0xf7   : > { %2077 = vmatpush.msra.mxu0 %v5369_v42  ;;  %1916 = vmatpush.msrb.mxu1 %v5129_v46  ;;  %v2150_v46 = vsub.f32 %v5403_v28, %v7160_v19  ;;  %v2145_v56 = vand.u32 4294901760, %v2144_v8  ;;  %v281_v19 = vld [vmem:[%s7100_s1 + $0x238] sm:$0xff]  ;;  %v7165_v8 = vand.u32 4294901760, %v5459_v27  ;;  %v7168_v4 = vand.u32 4294901760, %v5476_v39 }
  0xf8   : > { %2009 = vmatpush.msrb.mxu2 %v1799_v31  ;;  %2056 = vmatpush.msrb.mxu3 %v5148_v37  ;;  %v2156_v48 = vsub.f32 %v5421_v25, %v7161_v32  ;;  %v280_v32 = vld [vmem:[%s7100_s1 + $0x230] sm:$0xff] }
  0xf9   : > { %2079 = vmatpush.msra.mxu0 %v5376_v21  ;;  %1918 = vmatpush.msrb.mxu1 %v5148_v37  ;;  %v5464_v31 = vpop.f32.mrf.mxu1  ;;  %v7163_v37 = vand.u32 4294901760, %v5437_v5  ;;  %v2151_v6 = vand.u32 4294901760, %v2150_v46  ;;  %v5508_v46 = vand.u32 4294901760, %v281_v19 }
  0xfa   : > { %7357 = vst [vmem:[#allocation32_spill] sm:$0xff] %v5464_v31  ;;  %2011 = vmatmul.f32.vlgmr.msrb.gmra.mxu2 %v5166_v3  ;;  %2058 = vmatpush.msrb.mxu3 %v5164_v49  ;;  %v5471_v9 = vpop.f32.mrf.mxu0  ;;  %v5478_v34 = vpop.f32.mrf.mxu2  ;;  %v5579_v31 = vand.u32 4294901760, %v182_v35 }
  0xfb   : > { %7358 = vst [vmem:[#allocation33_spill] sm:$0xff] %v5471_v9  ;;  %2256 = vmatpush.msra.mxu2 %v5386_v54  ;;  %2081 = vmatpush.msra.mxu0 %v5396_v52  ;;  %v190_v9 = vld [vmem:[%s4074_s17 + $0x60] sm:$0xff] }
  0xfc   : > { %7359 = vst [vmem:[#allocation34_spill] sm:$0xff] %v5478_v34  ;;  %1920 = vmatpush.msrb.mxu1 %v5164_v49  ;;  %2060 = vmatmul.f32.vlgmr.msrb.gmra.mxu3 %v5166_v3  ;;  %v2162_v49 = vsub.f32 %v5437_v5, %v7163_v37  ;;  %v5500_v3 = vsub.f32 %v283_v62, %v5468_v0 }
  0xfd   : > { %2259 = vmatpush.msra.mxu2 %v5403_v28  ;;  %2324 = vmatpush.msra.mxu3 %v5369_v42  ;;  %v5505_v15 = vpop.f32.mrf.mxu3  ;;  %v5514_v62 = vsub.f32 %v282_v16, %v5485_v7  ;;  %v2168_v37 = vsub.f32 %v5459_v27, %v7165_v8  ;;  %v5534_v8 = vsub.f32 %v281_v19, %v5508_v46 }
  0xfe   : > { %2083 = vmatpush.msra.mxu0 %v5409_v10  ;;  %1924 = vmatmul.f32.vlgmr.msrb.gmra.mxu1 %v1676_v44  ;;  %7360 = vst [vmem:[#allocation35_spill] sm:$0xff] %v5505_v15  ;;  %v2157_v44 = vand.u32 4294901760, %v2156_v48  ;;  %v2163_v48 = vand.u32 4294901760, %v2162_v49  ;;  %v5542_v49 = vand.u32 4294901760, %v279_v45  ;;  %v5605_v61 = vsub.f32 %v182_v35, %v5579_v31 }
  0xff   : > { %1875 = vmatmul.f32.gmra.mxu0 %v5242_v18  ;;  %2146 = vmatpush.msra.mxu1 %v2145_v56  ;;  %v5520_v56 = vand.u32 4294901760, %v280_v32  ;;  %v2169_v19 = vand.u32 4294901760, %v2168_v37  ;;  %v275_v37 = vld [vmem:[%s7100_s1 + $0x208] sm:$0xff] }
 0x100   : > { %2262 = vmatpush.msra.mxu2 %v5421_v25  ;;  %2326 = vmatpush.msra.mxu3 %v5376_v21  ;;  %v5574_v1 = vsub.f32 %v279_v45, %v5542_v49  ;;  %v5615_v23 = vand.u32 4294901760, %v275_v37 }
 0x101   : > { %2085 = vmatpush.msra.mxu0 %v5430_v36  ;;  %2152 = vmatpush.msra.mxu1 %v2151_v6  ;;  %v2174_v6 = vsub.f32 %v5476_v39, %v7168_v4  ;;  %v5550_v4 = vsub.f32 %v280_v32, %v5520_v56 }
 0x102   : > { %2265 = vmatpush.msra.mxu2 %v5437_v5  ;;  %2328 = vmatpush.msra.mxu3 %v5396_v52 }
 0x103   : > { %2087 = vmatpush.msra.mxu0 %v5444_v26  ;;  %2015 = vmatmul.f32.gmra.mxu2 %v5216_v33  ;;  %v5539_v2 = vpop.f32.mrf.mxu1  ;;  %v2175_v32 = vand.u32 4294901760, %v2174_v6 }
 0x104   : > { %7361 = vst [vmem:[#allocation36_spill] sm:$0xff] %v5539_v2  ;;  %2158 = vmatpush.msra.mxu1 %v2157_v44  ;;  %2268 = vmatpush.msra.mxu2 %v5459_v27  ;;  %v5545_v15 = vpop.f32.mrf.mxu0  ;;  %v7364_v44 = vand.u32 4294901760, %v5500_v3 }
 0x105   : > { %7362 = vst [vmem:[#allocation37_spill] sm:$0xff] %v5545_v15  ;;  %2330 = vmatpush.msra.mxu3 %v5409_v10  ;;  %2089 = vmatpush.msra.mxu0 %v5468_v0  ;;  %v5553_v34 = vpop.f32.mrf.mxu2  ;;  %v277_v15 = vld [vmem:[%s7100_s1 + $0x218] sm:$0xff] }
 0x106   : > { %7363 = vst [vmem:[#allocation38_spill] sm:$0xff] %v5553_v34  ;;  %2064 = vmatmul.f32.gmra.mxu3 %v5216_v33  ;;  %2164 = vmatpush.msra.mxu1 %v2163_v48  ;;  %v2180_v16 = vsub.f32 %v5500_v3, %v7364_v44  ;;  %v7365_v33 = vand.u32 4294901760, %v5242_v18  ;;  %v7366_v48 = vand.u32 4294901760, %v5514_v62  ;;  %v276_v34 = vld [vmem:[%s7100_s1 + $0x210] sm:$0xff]  ;;  %v5584_v18 = vand.u32 4294901760, %v277_v15 }
 0x107   : > { %2271 = vmatpush.msra.mxu2 %v5476_v39  ;;  %2332 = vmatpush.msra.mxu3 %v5430_v36  ;;  %v5581_v6 = vpop.f32.mrf.mxu3 }
 0x108   : > { %2091 = vmatpush.msra.mxu0 %v5485_v7  ;;  %1930 = vmatmul.f32.gmra.mxu1 %v7365_v33  ;;  %v2186_v44 = vsub.f32 %v5514_v62, %v7366_v48  ;;  %7367 = vst [vmem:[#allocation39_spill] sm:$0xff] %v5581_v6  ;;  %v2181_v45 = vand.u32 4294901760, %v2180_v16  ;;  %v5590_v48 = vsub.f32 %v278_v13, %v5559_v22  ;;  %v5599_v33 = vand.u32 4294901760, %v276_v34 }
 0x109   : > { %1880 = vmatmul.f32.gmra.mxu0 %v5279_v55  ;;  %2170 = vmatpush.msra.mxu1 %v2169_v19  ;;  %v7368_v19 = vand.u32 4294901760, %v5534_v8  ;;  %v5613_v17 = vsub.f32 %v277_v15, %v5584_v18 }
 0x10a   : > { %2274 = vmatpush.msra.mxu2 %v5500_v3  ;;  %2334 = vmatpush.msra.mxu3 %v5444_v26  ;;  %v2187_v16 = vand.u32 4294901760, %v2186_v44  ;;  %v274_v44 = vld [vmem:[%s7100_s1 + $0x200] sm:$0xff]  ;;  %v5632_v2 = vsub.f32 %v276_v34, %v5599_v33 }
 0x10b   : > { %2093 = vmatpush.msra.mxu0 %v5508_v46  ;;  %2176 = vmatpush.msra.mxu1 %v2175_v32  ;;  %v2192_v6 = vsub.f32 %v5534_v8, %v7368_v19  ;;  %v7369_v32 = vand.u32 4294901760, %v5550_v4  ;;  %v5640_v50 = vand.u32 4294901760, %v274_v44 }
 0x10c   : > { %2277 = vmatpush.msra.mxu2 %v5514_v62  ;;  %2336 = vmatpush.msra.mxu3 %v5468_v0 }
 0x10d   : > { %2095 = vmatpush.msra.mxu0 %v5520_v56  ;;  %2019 = vmatmul.f32.gmra.mxu2 %v5259_v30  ;;  %v2198_v19 = vsub.f32 %v5550_v4, %v7369_v32  ;;  %v5620_v13 = vpop.f32.mrf.mxu1  ;;  %v305_v32 = vld [vmem:[%s7100_s1 + $0x2f8] sm:$0xff]  ;;  %v2193_v20 = vand.u32 4294901760, %v2192_v6  ;;  %7374 = vst [vmem:[#allocation43_spill] sm:$0xff] %v5640_v50  ;;  %v5665_v6 = vand.u32 4294901760, %v190_v9 }
 0x10e   : > { %7370 = vst [vmem:[#allocation40_spill] sm:$0xff] %v5620_v13  ;;  %2182 = vmatpush.msra.mxu1 %v2181_v45  ;;  %2280 = vmatpush.msra.mxu2 %v5534_v8  ;;  %v5627_v15 = vpop.f32.mrf.mxu0  ;;  %v5634_v13 = vpop.f32.mrf.mxu2  ;;  %v7373_v45 = vand.u32 4294901760, %v5574_v1 }
 0x10f   : > { %7371 = vst [vmem:[#allocation41_spill] sm:$0xff] %v5627_v15  ;;  %2338 = vmatpush.msra.mxu3 %v5485_v7  ;;  %2097 = vmatpush.msra.mxu0 %v5542_v49  ;;  %v2199_v34 = vand.u32 4294901760, %v2198_v19  ;;  %v7376_v15 = vand.u32 4294901760, %v5590_v48  ;;  %v5701_v57 = vsub.f32 %v190_v9, %v5665_v6 }
 0x110   : > { %7372 = vst [vmem:[#allocation42_spill] sm:$0xff] %v5634_v13  ;;  %2068 = vmatmul.f32.gmra.mxu3 %v5259_v30  ;;  %2188 = vmatpush.msra.mxu1 %v2187_v16  ;;  %v2204_v35 = vsub.f32 %v5574_v1, %v7373_v45  ;;  %v5648_v13 = vsub.f32 %v275_v37, %v5615_v23  ;;  %v5650_v30 = vand.u32 4294901760, %v305_v32  ;;  %v304_v16 = vld [vmem:[%s7100_s1 + $0x2f0] sm:$0xff]  ;;  %v7375_v45 = vand.u32 4294901760, %v5279_v55 }
 0x111   : > { %2283 = vmatpush.msra.mxu2 %v5550_v4  ;;  %2340 = vmatpush.msra.mxu3 %v5508_v46  ;;  %v2210_v19 = vsub.f32 %v5590_v48, %v7376_v15  ;;  %v5661_v14 = vpop.f32.mrf.mxu3  ;;  %v7378_v15 = vand.u32 4294901760, %v5605_v61  ;;  %v7379_v37 = vand.u32 4294901760, %v5613_v17 }
 0x112   : > { %2099 = vmatpush.msra.mxu0 %v5559_v22  ;;  %1936 = vmatmul.f32.gmra.mxu1 %v7375_v45  ;;  %7377 = vst [vmem:[#allocation44_spill] sm:$0xff] %v5661_v14  ;;  %v2205_v55 = vand.u32 4294901760, %v2204_v35  ;;  %v5676_v14 = vsub.f32 %v274_v44, %v5640_v50  ;;  %v5686_v35 = vsub.f32 %v305_v32, %v5650_v30 }
 0x113   : > { %1885 = vmatmul.f32.gmra.mxu0 %v5320_v11  ;;  %2194 = vmatpush.msra.mxu1 %v2193_v20  ;;  %v2111_v45 = vsub.f32 %v5605_v61, %v7378_v15  ;;  %v5678_v20 = vand.u32 4294901760, %v304_v16  ;;  %v2216_v29 = vsub.f32 %v5613_v17, %v7379_v37  ;;  %v2211_v44 = vand.u32 4294901760, %v2210_v19 }
 0x114   : > { %2286 = vmatpush.msra.mxu2 %v5574_v1  ;;  %2342 = vmatpush.msra.mxu3 %v5520_v56  ;;  %v5690_v15 = vand.u32 4294901760, %v303_v60  ;;  %v7380_v37 = vand.u32 4294901760, %v5632_v2  ;;  %v7390_v24 = vand.u32 4294901760, %v5686_v35 }
 0x115   : > { %2101 = vmatpush.msra.mxu0 %v5584_v18  ;;  %2200 = vmatpush.msra.mxu1 %v2199_v34  ;;  %v302_v34 = vld [vmem:[%s7100_s1 + $0x2e0] sm:$0xff]  ;;  %v2112_v19 = vand.u32 4294901760, %v2111_v45  ;;  %v5708_v38 = vsub.f32 %v304_v16, %v5678_v20  ;;  %v2217_v9 = vand.u32 4294901760, %v2216_v29 }
 0x116   : > { %2289 = vmatpush.msra.mxu2 %v5590_v48  ;;  %2344 = vmatpush.msra.mxu3 %v5542_v49  ;;  %v2222_v32 = vsub.f32 %v5632_v2, %v7380_v37  ;;  %v2578_v43 = vsub.f32 %v5686_v35, %v7390_v24  ;;  %v7392_v24 = vand.u32 4294901760, %v5701_v57 }
 0x117   : > { %2103 = vmatpush.msra.mxu0 %v5599_v33  ;;  %2023 = vmatmul.f32.gmra.mxu2 %v5298_v58  ;;  %v5703_v41 = vpop.f32.mrf.mxu1 }
 0x118   : > { %7381 = vst [vmem:[#allocation45_spill] sm:$0xff] %v5703_v41  ;;  %2206 = vmatpush.msra.mxu1 %v2205_v55  ;;  %2292 = vmatpush.msra.mxu2 %v5613_v17  ;;  %v5713_v37 = vpop.f32.mrf.mxu0  ;;  %v7383_v55 = vand.u32 4294901760, %v5648_v13  ;;  %v5721_v41 = vand.u32 4294901760, %v302_v34  ;;  %v5723_v16 = vpop.f32.mrf.mxu2  ;;  %v2223_v29 = vand.u32 4294901760, %v2222_v32 }
 0x119   : > { %7382 = vst [vmem:[#allocation46_spill] sm:$0xff] %v5713_v37  ;;  %2346 = vmatpush.msra.mxu3 %v5559_v22  ;;  %2105 = vmatpush.msra.mxu0 %v5615_v23  ;;  %v5727_v37 = vsub.f32 %v303_v60, %v5690_v15  ;;  %v7388_v60 = vand.u32 4294901760, %v5676_v14 }
 0x11a   : > { %v2228_v45 = vsub.f32 %v5648_v13, %v7383_v55  ;;  %7384 = vst [vmem:[#allocation47_spill] sm:$0xff] %v5723_v16  ;;  %2072 = vmatmul.f32.gmra.mxu3 %v5298_v58  ;;  %2212 = vmatpush.msra.mxu1 %v2211_v44  ;;  %v7387_v58 = vand.u32 4294901760, %v5320_v11  ;;  %v5751_v47 = vsub.f32 %v302_v34, %v5721_v41  ;;  %v5753_v11 = vand.u32 4294901760, %v198_v53 }
 0x11b   : > { %7385 = vst [vmem:[#allocation48_spill] sm:$0xff] %v5727_v37  ;;  %2295 = vmatpush.msra.mxu2 %v5632_v2  ;;  %2348 = vmatpush.msra.mxu3 %v5584_v18  ;;  %v2234_v44 = vsub.f32 %v5676_v14, %v7388_v60  ;;  %v5745_v32 = vpop.f32.mrf.mxu3  ;;  %v2119_v34 = vsub.f32 %v5701_v57, %v7392_v24 }
 0x11c   : > { %2107 = vmatpush.msra.mxu0 %v5640_v50  ;;  %1942 = vmatmul.f32.gmra.mxu1 %v7387_v58  ;;  %7389 = vst [vmem:[#allocation50_spill] sm:$0xff] %v5745_v32  ;;  %v2229_v55 = vand.u32 4294901760, %v2228_v45  ;;  %v299_v58 = vld [vmem:[%s7100_s1 + $0x2c8] sm:$0xff]  ;;  %v7391_v45 = vand.u32 4294901760, %v5386_v54  ;;  %v5769_v60 = vsub.f32 %v301_v12, %v5733_v40  ;;  %v298_v54 = vld [vmem:[%s7100_s1 + $0x2c0] sm:$0xff]  ;;  %v2579_v12 = vand.u32 4294901760, %v2578_v43 }
 0x11d   : > { %2113 = vmatmul.f32.vlgmr.msra.gmra.mxu0 %v2112_v19  ;;  %2218 = vmatpush.msra.mxu1 %v2217_v9  ;;  %v5761_v9 = vand.u32 4294901760, %v300_v51  ;;  %v2235_v16 = vand.u32 4294901760, %v2234_v44  ;;  %v7393_v19 = vand.u32 4294901760, %v5708_v38  ;;  %v5776_v59 = vand.u32 4294901760, %v299_v58  ;;  %v297_v43 = vld [vmem:[%s7100_s1 + $0x2b8] sm:$0xff] }
 0x11e   : > { %2298 = vmatpush.msra.mxu2 %v5648_v13  ;;  %2350 = vmatpush.msra.mxu3 %v5599_v33  ;;  %v5785_v24 = vsub.f32 %v198_v53, %v5753_v11 }
 0x11f   : > { %2383 = vmatpush.msrb.mxu0 %v7391_v45  ;;  %2224 = vmatpush.msra.mxu1 %v2223_v29  ;;  %v2584_v32 = vsub.f32 %v5708_v38, %v7393_v19  ;;  %v7394_v29 = vand.u32 4294901760, %v5403_v28  ;;  %v7396_v19 = vand.u32 4294901760, %v5727_v37  ;;  %v5795_v28 = vsub.f32 %v300_v51, %v5761_v9 }
 0x120   : > { %2301 = vmatpush.msra.mxu2 %v5676_v14  ;;  %2352 = vmatpush.msra.mxu3 %v5615_v23  ;;  %v7400_v51 = vand.u32 4294901760, %v5605_v61  ;;  %v5821_v45 = vand.u32 4294901760, %v297_v43 }
 0x121   : > { %2387 = vmatpush.msrb.mxu0 %v7394_v29  ;;  %2230 = vmatpush.msra.mxu1 %v2229_v55  ;;  %v5787_v44 = vpop.f32.mrf.mxu1  ;;  %v2590_v63 = vsub.f32 %v5727_v37, %v7396_v19  ;;  %v7398_v55 = vand.u32 4294901760, %v5421_v25  ;;  %v2120_v29 = vand.u32 4294901760, %v2119_v34  ;;  %v5813_v37 = vsub.f32 %v299_v58, %v5776_v59 }
 0x122   : > { %7395 = vst [vmem:[#allocation51_spill] sm:$0xff] %v5787_v44  ;;  %2304 = vmatmul.f32.vlgmr.msra.gmra.mxu2 %v5605_v61  ;;  %2354 = vmatpush.msra.mxu3 %v5640_v50  ;;  %v5800_v53 = vpop.f32.mrf.mxu0  ;;  %v5806_v44 = vand.u32 4294901760, %v298_v54  ;;  %v5808_v19 = vpop.f32.mrf.mxu2  ;;  %v2585_v50 = vand.u32 4294901760, %v2584_v32  ;;  %v7402_v25 = vand.u32 4294901760, %v5751_v47  ;;  %v296_v61 = vld [vmem:[%s7100_s1 + $0x2b0] sm:$0xff]  ;;  %v5855_v58 = vsub.f32 %v297_v43, %v5821_v45 }
 0x123   : > { %7397 = vst [vmem:[#allocation52_spill] sm:$0xff] %v5800_v53  ;;  %2511 = vmatpush.msrb.mxu2 %v5650_v30  ;;  %2391 = vmatpush.msrb.mxu0 %v7398_v55  ;;  %v206_v53 = vld [vmem:[%s4074_s17 + $0xe0] sm:$0xff]  ;;  %v2591_v32 = vand.u32 4294901760, %v2590_v63  ;;  %v295_v63 = vld [vmem:[%s7100_s1 + $0x2a8] sm:$0xff] }
 0x124   : > { %7399 = vst [vmem:[#allocation53_spill] sm:$0xff] %v5808_v19  ;;  %2236 = vmatpush.msra.mxu1 %v2235_v16  ;;  %2358 = vmatmul.f32.vlgmr.msra.gmra.mxu3 %v7400_v51  ;;  %v2596_v34 = vsub.f32 %v5751_v47, %v7402_v25  ;;  %v7403_v16 = vand.u32 4294901760, %v5437_v5  ;;  %v7405_v51 = vand.u32 4294901760, %v5769_v60  ;;  %v5837_v55 = vsub.f32 %v298_v54, %v5806_v44 }
 0x125   : > { %7401 = vst [vmem:[#allocation54_spill] sm:$0xff] %v5813_v37  ;;  %2513 = vmatpush.msrb.mxu2 %v5678_v20  ;;  %2580 = vmatpush.msrb.mxu3 %v2579_v12  ;;  %v5830_v12 = vpop.f32.mrf.mxu3  ;;  %v5839_v19 = vand.u32 4294901760, %v206_v53 }
 0x126   : > { %2395 = vmatpush.msrb.mxu0 %v7403_v16  ;;  %2238 = vmatmul.f32.vlgmr.msra.gmra.mxu1 %v5579_v31  ;;  %7404 = vst [vmem:[#allocation55_spill] sm:$0xff] %v5830_v12  ;;  %v2602_v25 = vsub.f32 %v5769_v60, %v7405_v51  ;;  %v2597_v54 = vand.u32 4294901760, %v2596_v34  ;;  %v7407_v16 = vand.u32 4294901760, %v5785_v24  ;;  %v5861_v12 = vand.u32 4294901760, %v295_v63 }
 0x127   : > { %2121 = vmatmul.f32.gmra.mxu0 %v2120_v29  ;;  %2462 = vmatpush.msrb.mxu1 %v5369_v42  ;;  %v5846_v29 = vand.u32 4294901760, %v296_v61  ;;  %v7406_v42 = vand.u32 4294901760, %v5459_v27  ;;  %v7409_v27 = vand.u32 4294901760, %v5476_v39  ;;  %v7176_v34 = vand.u32 4294901760, %v5855_v58 }
 0x128   : > { %2515 = vmatpush.msrb.mxu2 %v5690_v15  ;;  %2586 = vmatpush.msrb.mxu3 %v2585_v50  ;;  %v2127_v51 = vsub.f32 %v5785_v24, %v7407_v16  ;;  %v7408_v50 = vand.u32 4294901760, %v5795_v28  ;;  %v2603_v43 = vand.u32 4294901760, %v2602_v25  ;;  %v7411_v16 = vand.u32 4294901760, %v5813_v37  ;;  %v293_v25 = vld [vmem:[%s7100_s1 + $0x298] sm:$0xff] }
 0x129   : > { %2399 = vmatpush.msrb.mxu0 %v7406_v42  ;;  %2464 = vmatpush.msrb.mxu1 %v5376_v21  ;;  %v294_v21 = vld [vmem:[%s7100_s1 + $0x2a0] sm:$0xff]  ;;  %v5881_v39 = vsub.f32 %v296_v61, %v5846_v29  ;;  %v7415_v61 = vand.u32 4294901760, %v5701_v57 }
 0x12a   : > { %2517 = vmatpush.msrb.mxu2 %v5721_v41  ;;  %2592 = vmatpush.msrb.mxu3 %v2591_v32  ;;  %v2608_v5 = vsub.f32 %v5795_v28, %v7408_v50  ;;  %v5871_v32 = vsub.f32 %v206_v53, %v5839_v19  ;;  %v2614_v50 = vsub.f32 %v5813_v37, %v7411_v16  ;;  %v7413_v53 = vand.u32 4294901760, %v5500_v3 }
 0x12b   : > { %2403 = vmatpush.msrb.mxu0 %v7409_v27  ;;  %2309 = vmatmul.f32.gmra.mxu2 %v5701_v57  ;;  %v5873_v42 = vpop.f32.mrf.mxu1  ;;  %v5899_v37 = vsub.f32 %v295_v63, %v5861_v12  ;;  %v7416_v3 = vand.u32 4294901760, %v5837_v55  ;;  %v292_v57 = vld [vmem:[%s7100_s1 + $0x290] sm:$0xff] }
 0x12c   : > { %7410 = vst [vmem:[#allocation56_spill] sm:$0xff] %v5873_v42  ;;  %2466 = vmatpush.msrb.mxu1 %v5396_v52  ;;  %2519 = vmatpush.msrb.mxu2 %v5733_v40  ;;  %v5886_v27 = vpop.f32.mrf.mxu0  ;;  %v2128_v52 = vand.u32 4294901760, %v2127_v51  ;;  %v5891_v42 = vand.u32 4294901760, %v294_v21  ;;  %v2609_v16 = vand.u32 4294901760, %v2608_v5  ;;  %v7177_v51 = vand.u32 4294901760, %v5871_v32 }
 0x12d   : > { %7412 = vst [vmem:[#allocation57_spill] sm:$0xff] %v5886_v27  ;;  %2598 = vmatpush.msrb.mxu3 %v2597_v54  ;;  %2407 = vmatpush.msrb.mxu0 %v7413_v53  ;;  %v5893_v40 = vpop.f32.mrf.mxu2  ;;  %v2620_v54 = vsub.f32 %v5837_v55, %v7416_v3  ;;  %v5906_v53 = vand.u32 4294901760, %v293_v25  ;;  %v2615_v63 = vand.u32 4294901760, %v2614_v50  ;;  %v7178_v5 = vand.u32 4294901760, %v5881_v39  ;;  %v183_v50 = vld [vmem:[%s4074_s17 + $0x28] sm:$0xff] }
 0x12e   : > { %7414 = vst [vmem:[#allocation58_spill] sm:$0xff] %v5893_v40  ;;  %2364 = vmatmul.f32.gmra.mxu3 %v7415_v61  ;;  %2468 = vmatpush.msrb.mxu1 %v5409_v10  ;;  %v7417_v10 = vand.u32 4294901760, %v5514_v62  ;;  %v2626_v61 = vsub.f32 %v5855_v58, %v7176_v34  ;;  %v5922_v3 = vsub.f32 %v294_v21, %v5891_v42  ;;  %v291_v62 = vld [vmem:[%s7100_s1 + $0x288] sm:$0xff] }
 0x12f   : > { %2521 = vmatpush.msrb.mxu2 %v5761_v9  ;;  %2604 = vmatpush.msrb.mxu3 %v2603_v43  ;;  %v5915_v43 = vpop.f32.mrf.mxu3  ;;  %v2135_v21 = vsub.f32 %v5871_v32, %v7177_v51  ;;  %v5938_v34 = vsub.f32 %v293_v25, %v5906_v53 }
 0x130   : > { %2411 = vmatpush.msrb.mxu0 %v7417_v10  ;;  %2242 = vmatmul.f32.gmra.mxu1 %v5665_v6  ;;  %7418 = vst [vmem:[#allocation59_spill] sm:$0xff] %v5915_v43  ;;  %v5929_v10 = vand.u32 4294901760, %v292_v57  ;;  %v2627_v25 = vand.u32 4294901760, %v2626_v61 }
 0x131   : > { %2129 = vmatmul.f32.gmra.mxu0 %v2128_v52  ;;  %2470 = vmatpush.msrb.mxu1 %v5430_v36  ;;  %v7419_v36 = vand.u32 4294901760, %v5534_v8  ;;  %v2621_v52 = vand.u32 4294901760, %v2620_v54  ;;  %v5948_v8 = vand.u32 4294901760, %v291_v62  ;;  %v7420_v54 = vand.u32 4294901760, %v5550_v4 }
 0x132   : > { %2523 = vmatpush.msrb.mxu2 %v5776_v59  ;;  %2610 = vmatpush.msrb.mxu3 %v2609_v16  ;;  %v290_v16 = vld [vmem:[%s7100_s1 + $0x280] sm:$0xff]  ;;  %v5962_v27 = vsub.f32 %v292_v57, %v5929_v10 }
 0x133   : > { %2415 = vmatpush.msrb.mxu0 %v7419_v36  ;;  %2472 = vmatpush.msrb.mxu1 %v5444_v26  ;;  %v2632_v26 = vsub.f32 %v5881_v39, %v7178_v5  ;;  %v5964_v4 = vand.u32 4294901760, %v290_v16  ;;  %v7423_v36 = vand.u32 4294901760, %v5574_v1  ;;  %v5979_v40 = vsub.f32 %v291_v62, %v5948_v8 }
 0x134   : > { %2525 = vmatpush.msrb.mxu2 %v5806_v44  ;;  %2616 = vmatpush.msrb.mxu3 %v2615_v63  ;;  %v7422_v63 = vand.u32 4294901760, %v5899_v37  ;;  %v7425_v1 = vand.u32 4294901760, %v5922_v3 }
 0x135   : > { %2419 = vmatpush.msrb.mxu0 %v7420_v54  ;;  %2314 = vmatmul.f32.gmra.mxu2 %v5785_v24  ;;  %v5954_v51 = vpop.f32.mrf.mxu1  ;;  %v5966_v54 = vand.u32 4294901760, %v183_v50  ;;  %v2633_v57 = vand.u32 4294901760, %v2632_v26  ;;  %v5993_v62 = vsub.f32 %v290_v16, %v5964_v4 }
 0x136   : > { %7421 = vst [vmem:[#allocation60_spill] sm:$0xff] %v5954_v51  ;;  %2474 = vmatpush.msrb.mxu1 %v5468_v0  ;;  %2527 = vmatpush.msrb.mxu2 %v5821_v45  ;;  %v2638_v5 = vsub.f32 %v5899_v37, %v7422_v63  ;;  %v5968_v61 = vpop.f32.mrf.mxu0  ;;  %v2136_v0 = vand.u32 4294901760, %v2135_v21  ;;  %v2649_v51 = vand.u32 4294901760, %v5938_v34  ;;  %v5973_v43 = vpop.f32.mrf.mxu2  ;;  %v7424_v63 = vand.u32 4294901760, %v5785_v24 }
 0x137   : > { %2622 = vmatpush.msrb.mxu3 %v2621_v52  ;;  %2423 = vmatpush.msrb.mxu0 %v7423_v36  ;;  %v2644_v52 = vsub.f32 %v5922_v3, %v7425_v1  ;;  %v7426_v21 = vand.u32 4294901760, %v5590_v48  ;;  %v5990_v26 = vsub.f32 %v183_v50, %v5966_v54  ;;  %v7427_v50 = vand.u32 4294901760, %v5613_v17 }
 0x138   : > { %2370 = vmatmul.f32.gmra.mxu3 %v7424_v63  ;;  %2476 = vmatpush.msrb.mxu1 %v5485_v7  ;;  %v2639_v24 = vand.u32 4294901760, %v2638_v5  ;;  %v2655_v7 = vand.u32 4294901760, %v5962_v27  ;;  %v2650_v48 = vsub.f32 %v5938_v34, %v2649_v51  ;;  %v2661_v5 = vand.u32 4294901760, %v5979_v40 }
 0x139   : > { %2529 = vmatpush.msrb.mxu2 %v5846_v29  ;;  %2628 = vmatpush.msrb.mxu3 %v2627_v25  ;;  %v5995_v36 = vpop.f32.mrf.mxu3  ;;  %v191_v25 = vld [vmem:[%s4074_s17 + $0x68] sm:$0xff]  ;;  %v2645_v16 = vand.u32 4294901760, %v2644_v52  ;;  %v2667_v63 = vand.u32 4294901760, %v5993_v62 }
 0x13a   : > { %2427 = vmatpush.msrb.mxu0 %v7426_v21  ;;  %2246 = vmatmul.f32.gmra.mxu1 %v5753_v11  ;;  %v2651_v17 = vand.u32 4294901760, %v2650_v48  ;;  %v6016_v1 = vand.u32 4294901760, %v191_v25  ;;  %v2662_v52 = vsub.f32 %v5979_v40, %v2661_v5  ;;  %v7430_v48 = vand.u32 4294901760, %v5871_v32 }
 0x13b   : > { %2137 = vmatmul.f32.gmra.mxu0 %v2136_v0  ;;  %2478 = vmatpush.msrb.mxu1 %v5508_v46  ;;  %v2656_v46 = vsub.f32 %v5962_v27, %v2655_v7  ;;  %v7184_v0 = vand.u32 4294901760, %v5990_v26 }
 0x13c   : > { %2531 = vmatpush.msrb.mxu2 %v5861_v12  ;;  %2634 = vmatpush.msrb.mxu3 %v2633_v57  ;;  %v7428_v57 = vand.u32 4294901760, %v5632_v2  ;;  %v7429_v2 = vand.u32 4294901760, %v5648_v13  ;;  %v6042_v13 = vsub.f32 %v191_v25, %v6016_v1 }
 0x13d   : > { %2431 = vmatpush.msrb.mxu0 %v7427_v50  ;;  %2480 = vmatpush.msrb.mxu1 %v5520_v56  ;;  %v2545_v50 = vsub.f32 %v5990_v26, %v7184_v0 }
 0x13e   : > { %2533 = vmatpush.msrb.mxu2 %v5891_v42  ;;  %2640 = vmatpush.msrb.mxu3 %v2639_v24 }
 0x13f   : > { %2435 = vmatpush.msrb.mxu0 %v7428_v57  ;;  %2319 = vmatmul.f32.gmra.mxu2 %v5871_v32  ;;  %v6018_v56 = vpop.f32.mrf.mxu1  ;;  %v7431_v32 = vand.u32 4294901760, %v5676_v14  ;;  %v2546_v57 = vand.u32 4294901760, %v2545_v50  ;;  %v7181_v14 = vand.u32 4294901760, %v6042_v13  ;;  %v7434_v50 = vld [vmem:[#allocation43_spill] sm:$0xff] }
 0x140   : > { %2482 = vmatpush.msrb.mxu1 %v5542_v49  ;;  %2535 = vmatpush.msrb.mxu2 %v5906_v53  ;;  %v6025_v21 = vpop.f32.mrf.mxu0  ;;  %v6029_v24 = vpop.f32.mrf.mxu2  ;;  %v2657_v49 = vand.u32 4294901760, %v2656_v46 }
 0x141   : > { %2646 = vmatpush.msrb.mxu3 %v2645_v16  ;;  %2439 = vmatpush.msrb.mxu0 %v7429_v2  ;;  %v2668_v16 = vsub.f32 %v5993_v62, %v2667_v63  ;;  %v199_v2 = vld [vmem:[%s4074_s17 + $0xa8] sm:$0xff] }
 0x142   : > { %2376 = vmatmul.f32.gmra.mxu3 %v7430_v48  ;;  %2484 = vmatpush.msrb.mxu1 %v5559_v22  ;;  %v2663_v22 = vand.u32 4294901760, %v2662_v52  ;;  %v7433_v48 = vld [vmem:[#allocation48_spill] sm:$0xff] }
 0x143   : > { %2537 = vmatpush.msrb.mxu2 %v5929_v10  ;;  %2652 = vmatpush.msrb.mxu3 %v2651_v17  ;;  %v6047_v46 = vpop.f32.mrf.mxu3  ;;  %v2669_v17 = vand.u32 4294901760, %v2668_v16  ;;  %v7435_v16 = vand.u32 4294901760, %v5708_v38 }
 0x144   : > { %2443 = vmatpush.msrb.mxu0 %v7431_v32  ;;  %2250 = vmatmul.f32.gmra.mxu1 %v5839_v19 }
 0x145   : > { %2445 = vmatmul.f32.vlgmr.msrb.gmra.mxu0 %v5579_v31  ;;  %2486 = vmatpush.msrb.mxu1 %v5584_v18  ;;  %v6059_v18 = vand.u32 4294901760, %v199_v2 }
 0x146   : > { %2539 = vmatpush.msrb.mxu2 %v5948_v8  ;;  %2658 = vmatpush.msrb.mxu3 %v2657_v49  ;;  %v2553_v49 = vsub.f32 %v6042_v13, %v7181_v14 }
 0x147   : > { %2690 = vmatpush.msra.mxu0 %v5686_v35  ;;  %2488 = vmatpush.msrb.mxu1 %v5599_v33  ;;  %v7432_v33 = vand.u32 4294901760, %v5686_v35  ;;  %v6079_v35 = vsub.f32 %v199_v2, %v6059_v18  ;;  %v6097_v2 = vstv %s338_s9 }
 0x148   : > { %2541 = vmatpush.msrb.mxu2 %v5964_v4  ;;  %2664 = vmatpush.msrb.mxu3 %v2663_v22  ;;  %v2554_v22 = vand.u32 4294901760, %v2553_v49 }
 0x149   : > { %2693 = vmatpush.msra.mxu0 %v5708_v38  ;;  %2490 = vmatpush.msrb.mxu1 %v5615_v23  ;;  %v6061_v25 = vpop.f32.mrf.mxu1  ;;  %v207_v38 = vld [vmem:[%s4074_s17 + $0xe8] sm:$0xff] }
 0x14a   : > { %2547 = vmatmul.f32.vlgmr.msrb.gmra.mxu2 %v2546_v57  ;;  %2670 = vmatpush.msrb.mxu3 %v2669_v17  ;;  %v6063_v52 = vpop.f32.mrf.mxu0  ;;  %v6071_v23 = vpop.f32.mrf.mxu2  ;;  %v7436_v57 = vand.u32 4294901760, %v7433_v48  ;;  %v7180_v17 = vand.u32 4294901760, %v6079_v35 }
 0x14b   : > { %2817 = vmatpush.msra.mxu2 %v7432_v33  ;;  %2696 = vmatpush.msra.mxu0 %v7433_v48 }
 0x14c   : > { %2492 = vmatpush.msrb.mxu1 %v7434_v50  ;;  %2672 = vmatmul.f32.vlgmr.msrb.gmra.mxu3 %v5966_v54  ;;  %v2561_v49 = vsub.f32 %v6079_v35, %v7180_v17  ;;  %v7457_v17 = vld [vmem:[#allocation17_spill] sm:$0xff] }
 0x14d   : > { %2821 = vmatpush.msra.mxu2 %v7435_v16  ;;  %2896 = vmatpush.msra.mxu3 %v5650_v30  ;;  %v6083_v32 = vpop.f32.mrf.mxu3  ;;  %v7440_v16 = vld [vmem:[#allocation6_spill] sm:$0xff]  ;;  %v403_v14 = vadd.f32 %v7457_v17, %v6097_v2 }
 0x14e   : > { %2699 = vmatpush.msra.mxu0 %v5751_v47  ;;  %2494 = vmatmul.f32.vlgmr.msrb.gmra.mxu1 %v5579_v31  ;;  %v7437_v31 = vand.u32 4294901760, %v5751_v47  ;;  %v7439_v47 = vld [vmem:[#allocation54_spill] sm:$0xff] }
 0x14f   : > { %2449 = vmatmul.f32.gmra.mxu0 %v5665_v6  ;;  %2758 = vmatpush.msra.mxu1 %v5650_v30  ;;  %v6100_v30 = vand.u32 4294901760, %v207_v38 }
 0x150   : > { %2825 = vmatpush.msra.mxu2 %v7436_v57  ;;  %2898 = vmatpush.msra.mxu3 %v5678_v20 }
 0x151   : > { %2702 = vmatpush.msra.mxu0 %v5769_v60  ;;  %2760 = vmatpush.msra.mxu1 %v5678_v20  ;;  %v7438_v20 = vand.u32 4294901760, %v5769_v60  ;;  %v7442_v60 = vld [vmem:[#allocation49_spill] sm:$0xff]  ;;  %v6124_v57 = vsub.f32 %v207_v38, %v6100_v30  ;;  %v7445_v38 = vand.u32 4294901760, %v5837_v55 }
 0x152   : > { %2829 = vmatpush.msra.mxu2 %v7437_v31  ;;  %2900 = vmatpush.msra.mxu3 %v5690_v15 }
 0x153   : > { %2705 = vmatpush.msra.mxu0 %v5795_v28  ;;  %2555 = vmatmul.f32.gmra.mxu2 %v2554_v22  ;;  %v6102_v33 = vpop.f32.mrf.mxu1  ;;  %v379_v22 = vadd.f32 %v7440_v16, %v6097_v2 }
 0x154   : > { %2762 = vmatpush.msra.mxu1 %v5690_v15  ;;  %2833 = vmatpush.msra.mxu2 %v7438_v20  ;;  %v6107_v48 = vpop.f32.mrf.mxu0  ;;  %v7441_v15 = vand.u32 4294901760, %v5795_v28  ;;  %v2562_v20 = vand.u32 4294901760, %v2561_v49  ;;  %v7444_v28 = vand.u32 4294901760, %v7439_v47 }
 0x155   : > { %2902 = vmatpush.msra.mxu3 %v5721_v41  ;;  %2708 = vmatpush.msra.mxu0 %v7439_v47  ;;  %v6114_v50 = vpop.f32.mrf.mxu2  ;;  %v7446_v47 = vld [vmem:[#allocation10_spill] sm:$0xff] }
 0x156   : > { %2676 = vmatmul.f32.gmra.mxu3 %v6016_v1  ;;  %2764 = vmatpush.msra.mxu1 %v5721_v41  ;;  %v7443_v41 = vld [vmem:[#allocation8_spill] sm:$0xff] }
 0x157   : > { %2837 = vmatpush.msra.mxu2 %v7441_v15  ;;  %2904 = vmatpush.msra.mxu3 %v7442_v60  ;;  %v6128_v31 = vpop.f32.mrf.mxu3  ;;  %v504_v16 = vadd.f32 %v7443_v41, %v379_v22  ;;  %v7447_v15 = vand.u32 4294901760, %v5855_v58 }
 0x158   : > { %2711 = vmatpush.msra.mxu0 %v5837_v55  ;;  %2498 = vmatmul.f32.gmra.mxu1 %v5665_v6  ;;  %v7179_v6 = vand.u32 4294901760, %v6124_v57 }
 0x159   : > { %2453 = vmatmul.f32.gmra.mxu0 %v5753_v11  ;;  %2766 = vmatpush.msra.mxu1 %v7442_v60  ;;  %v570_v22 = vadd.f32 %v7446_v47, %v504_v16  ;;  %v7450_v16 = vld [vmem:[#allocation11_spill] sm:$0xff] }
 0x15a   : > { %2841 = vmatpush.msra.mxu2 %v7444_v28  ;;  %2906 = vmatpush.msra.mxu3 %v5761_v9  ;;  %v2569_v55 = vsub.f32 %v6124_v57, %v7179_v6  ;;  %v7456_v6 = vand.u32 4294901760, %v5899_v37 }
 0x15b   : > { %2714 = vmatpush.msra.mxu0 %v5855_v58  ;;  %2768 = vmatpush.msra.mxu1 %v5761_v9  ;;  %v7449_v58 = vand.u32 4294901760, %v5881_v39  ;;  %v624_v28 = vadd.f32 %v7450_v16, %v570_v22  ;;  %v7455_v16 = vld [vmem:[#allocation21_spill] sm:$0xff] }
 0x15c   : > { %2845 = vmatpush.msra.mxu2 %v7445_v38  ;;  %2908 = vmatpush.msra.mxu3 %v5776_v59  ;;  %v320_v38 = vld [vmem:[%s7100_s1 + $0x370] sm:$0xff] }
 0x15d   : > { %2717 = vmatpush.msra.mxu0 %v5881_v39  ;;  %2563 = vmatmul.f32.gmra.mxu2 %v2562_v20  ;;  %v6143_v49 = vpop.f32.mrf.mxu1  ;;  %v7448_v20 = vld [vmem:[#allocation9_spill] sm:$0xff]  ;;  %v2570_v39 = vand.u32 4294901760, %v2569_v55  ;;  %v319_v55 = vld [vmem:[%s7100_s1 + $0x368] sm:$0xff] }
 0x15e   : > { %2770 = vmatpush.msra.mxu1 %v5776_v59  ;;  %2849 = vmatpush.msra.mxu2 %v7447_v15  ;;  %v6149_v9 = vpop.f32.mrf.mxu0  ;;  %v6156_v60 = vpop.f32.mrf.mxu2  ;;  %v387_v41 = vadd.f32 %v7448_v20, %v6097_v2  ;;  %v321_v59 = vld [vmem:[%s7100_s1 + $0x378] sm:$0xff]  ;;  %v7453_v15 = vld [vmem:[#allocation13_spill] sm:$0xff]  ;;  %v7454_v20 = vld [vmem:[#allocation12_spill] sm:$0xff] }
 0x15f   : > { %2910 = vmatpush.msra.mxu3 %v5806_v44  ;;  %2720 = vmatpush.msra.mxu0 %v5899_v37  ;;  %v6178_v47 = vand.u32 4294901760, %v321_v59  ;;  %v395_v22 = vadd.f32 %v7453_v15, %v6097_v2  ;;  %v7460_v37 = vand.u32 4294901760, %v5922_v3 }
 0x160   : > { %2680 = vmatmul.f32.gmra.mxu3 %v6059_v18  ;;  %2772 = vmatpush.msra.mxu1 %v5806_v44 }
 0x161   : > { %2853 = vmatpush.msra.mxu2 %v7449_v58  ;;  %2912 = vmatpush.msra.mxu3 %v5821_v45  ;;  %v6174_v44 = vpop.f32.mrf.mxu3  ;;  %7452 = vst [vmem:[#allocation43_spill] sm:$0xff] %v6178_v47  ;;  %v508_v58 = vadd.f32 %v7454_v20, %v387_v41  ;;  %v7459_v41 = vld [vmem:[#allocation22_spill] sm:$0xff]  ;;  %v6202_v17 = vsub.f32 %v321_v59, %v6178_v47  ;;  %v7463_v20 = vld [vmem:[#allocation16_spill] sm:$0xff] }
 0x162   : > { %2723 = vmatpush.msra.mxu0 %v5922_v3  ;;  %2502 = vmatmul.f32.gmra.mxu1 %v5753_v11  ;;  %7451 = vst [vmem:[#allocation48_spill] sm:$0xff] %v6174_v44  ;;  %v711_v11 = vadd.f32 %v7455_v16, %v624_v28  ;;  %v512_v16 = vadd.f32 %v7463_v20, %v395_v22  ;;  %v6214_v3 = vand.u32 4294901760, %v319_v55  ;;  %v7466_v59 = vld [vmem:[#allocation20_spill] sm:$0xff]  ;;  %v7468_v22 = vld [vmem:[#allocation7_spill] sm:$0xff] }
 0x163   : > { %2457 = vmatmul.f32.gmra.mxu0 %v5839_v19  ;;  %2774 = vmatpush.msra.mxu1 %v5821_v45  ;;  %v6191_v45 = vand.u32 4294901760, %v320_v38  ;;  %v7473_v20 = vld [vmem:[#allocation4_spill] sm:$0xff] }
 0x164   : > { %2857 = vmatpush.msra.mxu2 %v7456_v6  ;;  %2914 = vmatpush.msra.mxu3 %v5846_v29  ;;  %v760_v28 = vadd.f32 %v7459_v41, %v711_v11  ;;  %v7462_v6 = vld [vmem:[#allocation14_spill] sm:$0xff]  ;;  %7464 = vst [vmem:[#allocation49_spill] sm:$0xff] %v6214_v3  ;;  %v516_v11 = vadd.f32 %v7466_v59, %v403_v14  ;;  %v7182_v14 = vand.u32 4294901760, %v6202_v17 }
 0x165   : > { %2726 = vmatpush.msra.mxu0 %v5938_v34  ;;  %2776 = vmatpush.msra.mxu1 %v5846_v29  ;;  %7458 = vst [vmem:[#allocation54_spill] sm:$0xff] %v6191_v45  ;;  %v318_v29 = vld [vmem:[%s7100_s1 + $0x360] sm:$0xff]  ;;  %v575_v15 = vadd.f32 %v7462_v6, %v508_v58  ;;  %v6222_v41 = vsub.f32 %v320_v38, %v6191_v45 }
 0x166   : > { %2861 = vmatpush.msra.mxu2 %v7460_v37  ;;  %2916 = vmatpush.msra.mxu3 %v5861_v12  ;;  %v6229_v34 = vand.u32 4294901760, %v318_v29  ;;  %v7470_v38 = vld [vmem:[#allocation15_spill] sm:$0xff]  ;;  %v585_v59 = vadd.f32 %v7473_v20, %v516_v11 }
 0x167   : > { %2729 = vmatpush.msra.mxu0 %v5962_v27  ;;  %2571 = vmatmul.f32.gmra.mxu2 %v2570_v39  ;;  %v6207_v2 = vpop.f32.mrf.mxu1  ;;  %v630_v37 = vadd.f32 %v7470_v38, %v575_v15  ;;  %v316_v27 = vld [vmem:[%s7100_s1 + $0x350] sm:$0xff] }
 0x168   : > { %7461 = vst [vmem:[#allocation6_spill] sm:$0xff] %v6207_v2  ;;  %2778 = vmatpush.msra.mxu1 %v5861_v12  ;;  %2865 = vmatpush.msra.mxu2 %v2649_v51  ;;  %v6216_v39 = vpop.f32.mrf.mxu0  ;;  %v6224_v58 = vpop.f32.mrf.mxu2  ;;  %v813_v12 = vadd.f32 %v7468_v22, %v760_v28  ;;  %v317_v51 = vld [vmem:[%s7100_s1 + $0x358] sm:$0xff]  ;;  %v6269_v11 = vand.u32 4294901760, %v316_v27  ;;  %v7516_v2 = vld [vmem:[#allocation56_spill] sm:$0xff] }
 0x169   : > { %7465 = vst [vmem:[#allocation8_spill] sm:$0xff] %v6216_v39  ;;  %2918 = vmatpush.msra.mxu3 %v5891_v42  ;;  %2732 = vmatpush.msra.mxu0 %v5979_v40  ;;  %v7471_v28 = vld [vmem:[#allocation18_spill] sm:$0xff]  ;;  %v6253_v15 = vand.u32 4294901760, %v317_v51  ;;  %v315_v40 = vld [vmem:[%s7100_s1 + $0x348] sm:$0xff] }
 0x16a   : > { %7467 = vst [vmem:[#allocation10_spill] sm:$0xff] %v6224_v58  ;;  %2684 = vmatmul.f32.gmra.mxu3 %v6100_v30  ;;  %2780 = vmatpush.msra.mxu1 %v5891_v42  ;;  %v580_v6 = vadd.f32 %v7471_v28, %v512_v16  ;;  %v6243_v42 = vsub.f32 %v319_v55, %v6214_v3  ;;  %v7183_v16 = vand.u32 4294901760, %v6222_v41  ;;  %v7476_v55 = vld [vmem:[#allocation5_spill] sm:$0xff]  ;;  %v7507_v39 = vld [vmem:[#allocation34_spill] sm:$0xff]  ;;  %v7508_v58 = vld [vmem:[#allocation39_spill] sm:$0xff] }
 0x16b   : > { %7469 = vst [vmem:[#allocation9_spill] sm:$0xff] %v6229_v34  ;;  %2869 = vmatpush.msra.mxu2 %v2655_v7  ;;  %2920 = vmatpush.msra.mxu3 %v5906_v53  ;;  %v6248_v7 = vpop.f32.mrf.mxu3  ;;  %v938_v38 = vadd.f32 %v7476_v55, %v813_v12  ;;  %v6262_v28 = vsub.f32 %v318_v29, %v6229_v34  ;;  %v7481_v29 = vld [vmem:[#allocation33_spill] sm:$0xff]  ;;  %v7482_v55 = vld [vmem:[#allocation3_spill] sm:$0xff] }
 0x16c   : > { %2735 = vmatpush.msra.mxu0 %v5993_v62  ;;  %2506 = vmatmul.f32.gmra.mxu1 %v5839_v19  ;;  %7472 = vst [vmem:[#allocation11_spill] sm:$0xff] %v6248_v7  ;;  %v7475_v19 = vld [vmem:[#allocation23_spill] sm:$0xff] }
 0x16d   : > { %2738 = vmatmul.f32.vlgmr.msra.gmra.mxu0 %v5990_v26  ;;  %2782 = vmatpush.msra.mxu1 %v5906_v53  ;;  %7474 = vst [vmem:[#allocation13_spill] sm:$0xff] %v6253_v15  ;;  %v715_v22 = vadd.f32 %v7475_v19, %v630_v37  ;;  %v3012_v53 = vsub.f32 %v6202_v17, %v7182_v14  ;;  %v7480_v37 = vld [vmem:[#allocation24_spill] sm:$0xff]  ;;  %v314_v62 = vld [vmem:[%s7100_s1 + $0x340] sm:$0xff]  ;;  %v7498_v7 = vand.u32 4294901760, %v6262_v28 }
 0x16e   : > { %2873 = vmatpush.msra.mxu2 %v2661_v5  ;;  %2922 = vmatpush.msra.mxu3 %v5929_v10  ;;  %7477 = vst [vmem:[#allocation12_spill] sm:$0xff] %v6262_v28  ;;  %v7479_v5 = vld [vmem:[#allocation19_spill] sm:$0xff]  ;;  %v1004_v19 = vadd.f32 %v7481_v29, %v938_v38  ;;  %v642_v14 = vadd.f32 %v7482_v55, %v585_v59  ;;  %v7485_v38 = vld [vmem:[#allocation36_spill] sm:$0xff]  ;;  %v7488_v55 = vld [vmem:[#allocation29_spill] sm:$0xff] }
 0x16f   : > { %2945 = vmatpush.msrb.mxu0 %v6178_v47  ;;  %2784 = vmatpush.msra.mxu1 %v5929_v10  ;;  %7478 = vst [vmem:[#allocation21_spill] sm:$0xff] %v6269_v11  ;;  %v636_v12 = vadd.f32 %v7479_v5, %v580_v6  ;;  %v764_v20 = vadd.f32 %v7480_v37, %v715_v22  ;;  %v3013_v0 = vand.u32 4294901760, %v3012_v53  ;;  %v7491_v10 = vld [vmem:[#allocation26_spill] sm:$0xff]  ;;  %v7495_v59 = vld [vmem:[#allocation32_spill] sm:$0xff] }
 0x170   : > { %2877 = vmatpush.msra.mxu2 %v2667_v63  ;;  %2924 = vmatpush.msra.mxu3 %v5948_v8  ;;  %v3018_v6 = vsub.f32 %v6222_v41, %v7183_v16  ;;  %v6288_v22 = vsub.f32 %v317_v51, %v6253_v15  ;;  %v1058_v5 = vadd.f32 %v7485_v38, %v1004_v19  ;;  %v7487_v51 = vld [vmem:[#allocation25_spill] sm:$0xff]  ;;  %v313_v53 = vld [vmem:[%s7100_s1 + $0x338] sm:$0xff] }
 0x171   : > { %2947 = vmatpush.msrb.mxu0 %v6191_v45  ;;  %2786 = vmatpush.msra.mxu1 %v5948_v8  ;;  %v6293_v63 = vpop.f32.mrf.mxu1  ;;  %v6298_v8 = vand.u32 4294901760, %v315_v40  ;;  %v719_v29 = vadd.f32 %v7487_v51, %v636_v12  ;;  %v723_v16 = vadd.f32 %v7488_v55, %v642_v14  ;;  %v6308_v19 = vsub.f32 %v316_v27, %v6269_v11  ;;  %v7494_v27 = vld [vmem:[#allocation28_spill] sm:$0xff] }
 0x172   : > { %7483 = vst [vmem:[#allocation17_spill] sm:$0xff] %v6288_v22  ;;  %2879 = vmatmul.f32.vlgmr.msra.gmra.mxu2 %v5966_v54  ;;  %2926 = vmatpush.msra.mxu3 %v5964_v4  ;;  %v6301_v37 = vpop.f32.mrf.mxu0  ;;  %v6310_v38 = vpop.f32.mrf.mxu2  ;;  %v7492_v12 = vand.u32 4294901760, %v6243_v42  ;;  %v6318_v51 = vand.u32 4294901760, %v314_v62 }
 0x173   : > { %7484 = vst [vmem:[#allocation22_spill] sm:$0xff] %v6293_v63  ;;  %3124 = vmatpush.msrb.mxu2 %v6202_v17  ;;  %2949 = vmatpush.msrb.mxu0 %v6214_v3  ;;  %v821_v63 = vadd.f32 %v7491_v10, %v764_v20  ;;  %v768_v55 = vadd.f32 %v7494_v27, %v719_v29  ;;  %v7496_v20 = vld [vmem:[#allocation38_spill] sm:$0xff]  ;;  %v7503_v27 = vld [vmem:[#allocation27_spill] sm:$0xff] }
 0x174   : > { %7486 = vst [vmem:[#allocation14_spill] sm:$0xff] %v6298_v8  ;;  %2788 = vmatpush.msra.mxu1 %v5964_v4  ;;  %2928 = vmatmul.f32.vlgmr.msra.gmra.mxu3 %v5966_v54  ;;  %v3024_v14 = vsub.f32 %v6243_v42, %v7492_v12  ;;  %v3019_v4 = vand.u32 4294901760, %v3018_v6  ;;  %v1145_v10 = vadd.f32 %v7496_v20, %v1058_v5  ;;  %v7497_v12 = vand.u32 4294901760, %v5990_v26  ;;  %v312_v6 = vld [vmem:[%s7100_s1 + $0x330] sm:$0xff] }
 0x175   : > { %7489 = vst [vmem:[#allocation16_spill] sm:$0xff] %v6308_v19  ;;  %3127 = vmatpush.msrb.mxu2 %v6222_v41  ;;  %3192 = vmatpush.msrb.mxu3 %v6178_v47  ;;  %v3030_v29 = vsub.f32 %v6262_v28, %v7498_v7  ;;  %v6344_v5 = vand.u32 4294901760, %v313_v53  ;;  %v942_v20 = vadd.f32 %v7503_v27, %v821_v63  ;;  %v6358_v26 = vand.u32 4294901760, %v312_v6 }
 0x176   : > { %7490 = vst [vmem:[#allocation20_spill] sm:$0xff] %v6310_v38  ;;  %v772_v38 = vadd.f32 %v7495_v59, %v723_v16  ;;  %2951 = vmatpush.msrb.mxu0 %v6229_v34  ;;  %2792 = vmatmul.f32.vlgmr.msra.gmra.mxu1 %v7497_v12  ;;  %v6336_v16 = vsub.f32 %v315_v40, %v6298_v8  ;;  %v6341_v59 = vpop.f32.mrf.mxu3  ;;  %v3025_v7 = vand.u32 4294901760, %v3024_v14  ;;  %v7504_v12 = vld [vmem:[#allocation30_spill] sm:$0xff]  ;;  %v311_v14 = vld [vmem:[%s7100_s1 + $0x328] sm:$0xff] }
 0x177   : > { %7493 = vst [vmem:[#allocation7_spill] sm:$0xff] %v6318_v51  ;;  %2743 = vmatmul.f32.gmra.mxu0 %v6042_v13  ;;  %3014 = vmatpush.msrb.mxu1 %v3013_v0  ;;  %v6350_v40 = vsub.f32 %v314_v62, %v6318_v51  ;;  %v829_v54 = vadd.f32 %v7504_v12, %v768_v55  ;;  %v7505_v0 = vand.u32 4294901760, %v6288_v22  ;;  %v3031_v63 = vand.u32 4294901760, %v3030_v29  ;;  %v7511_v29 = vld [vmem:[#allocation52_spill] sm:$0xff] }
 0x178   : > { %7499 = vst [vmem:[#allocation15_spill] sm:$0xff] %v6336_v16  ;;  %3130 = vmatpush.msrb.mxu2 %v6243_v42  ;;  %3194 = vmatpush.msrb.mxu3 %v6191_v45  ;;  %v837_v62 = vadd.f32 %v7507_v39, %v772_v38  ;;  %v1194_v45 = vadd.f32 %v7508_v58, %v1145_v10  ;;  %v7510_v12 = vand.u32 4294901760, %v6308_v19  ;;  %v310_v38 = vld [vmem:[%s7100_s1 + $0x320] sm:$0xff] }
 0x179   : > { %7500 = vst [vmem:[#allocation18_spill] sm:$0xff] %v6341_v59  ;;  %2953 = vmatpush.msrb.mxu0 %v6253_v15  ;;  %3020 = vmatpush.msrb.mxu1 %v3019_v4  ;;  %v3036_v59 = vsub.f32 %v6288_v22, %v7505_v0  ;;  %v7509_v4 = vld [vmem:[#allocation37_spill] sm:$0xff]  ;;  %v6375_v58 = vsub.f32 %v313_v53, %v6344_v5  ;;  %v6384_v0 = vand.u32 4294901760, %v311_v14 }
 0x17a   : > { %7501 = vst [vmem:[#allocation4_spill] sm:$0xff] %v6344_v5  ;;  %3133 = vmatpush.msrb.mxu2 %v6262_v28  ;;  %3196 = vmatpush.msrb.mxu3 %v6214_v3  ;;  %v1009_v27 = vadd.f32 %v7509_v4, %v942_v20  ;;  %v3042_v39 = vsub.f32 %v6308_v19, %v7510_v12  ;;  %v7514_v12 = vld [vmem:[#allocation40_spill] sm:$0xff]  ;;  %v6404_v4 = vand.u32 4294901760, %v310_v38 }
 0x17b   : > { %7502 = vst [vmem:[#allocation23_spill] sm:$0xff] %v6350_v40  ;;  %2955 = vmatpush.msrb.mxu0 %v6269_v11  ;;  %2883 = vmatmul.f32.gmra.mxu2 %v6016_v1  ;;  %v6380_v10 = vpop.f32.mrf.mxu1  ;;  %v1247_v20 = vadd.f32 %v7511_v29, %v1194_v45  ;;  %v3037_v3 = vand.u32 4294901760, %v3036_v59  ;;  %v6393_v47 = vsub.f32 %v312_v6, %v6358_v26  ;;  %v184_v45 = vld [vmem:[%s4074_s17 + $0x30] sm:$0xff]  ;;  %v7515_v29 = vld [vmem:[#allocation31_spill] sm:$0xff]  ;;  %v309_v6 = vld [vmem:[%s7100_s1 + $0x318] sm:$0xff] }
 0x17c   : > { %7506 = vst [vmem:[#allocation5_spill] sm:$0xff] %v6358_v26  ;;  %3026 = vmatpush.msrb.mxu1 %v3025_v7  ;;  %3136 = vmatpush.msrb.mxu2 %v6288_v22  ;;  %v6387_v55 = vpop.f32.mrf.mxu0  ;;  %v1064_v53 = vadd.f32 %v7514_v12, %v1009_v27  ;;  %v946_v22 = vadd.f32 %v7515_v29, %v829_v54  ;;  %v7517_v27 = vand.u32 4294901760, %v6336_v16  ;;  %v7519_v59 = vld [vmem:[#allocation35_spill] sm:$0xff]  ;;  %v7520_v54 = vld [vmem:[#allocation41_spill] sm:$0xff]  ;;  %v7522_v29 = vand.u32 4294901760, %v6350_v40 }
 0x17d   : > { %7512 = vst [vmem:[#allocation19_spill] sm:$0xff] %v6384_v0  ;;  %3198 = vmatpush.msrb.mxu3 %v6229_v34  ;;  %2957 = vmatpush.msrb.mxu0 %v6298_v8  ;;  %v6396_v7 = vpop.f32.mrf.mxu2  ;;  %v1372_v28 = vadd.f32 %v7516_v2, %v1247_v20  ;;  %v950_v34 = vadd.f32 %v7519_v59, %v837_v62  ;;  %v3043_v2 = vand.u32 4294901760, %v3042_v39  ;;  %v7521_v20 = vand.u32 4294901760, %v6042_v13  ;;  %v308_v39 = vld [vmem:[%s7100_s1 + $0x310] sm:$0xff] }
 0x17e   : > { %7513 = vst [vmem:[#allocation24_spill] sm:$0xff] %v6387_v55  ;;  %2932 = vmatmul.f32.gmra.mxu3 %v6016_v1  ;;  %3032 = vmatpush.msrb.mxu1 %v3031_v63  ;;  %v3048_v12 = vsub.f32 %v6336_v16, %v7517_v27  ;;  %v1014_v63 = vadd.f32 %v7520_v54, %v946_v22  ;;  %v6426_v59 = vand.u32 4294901760, %v184_v45  ;;  %v7526_v22 = vld [vmem:[#allocation42_spill] sm:$0xff] }
 0x17f   : > { %7518 = vst [vmem:[#allocation33_spill] sm:$0xff] %v6404_v4  ;;  %3139 = vmatpush.msrb.mxu2 %v6308_v19  ;;  %3200 = vmatpush.msrb.mxu3 %v6253_v15  ;;  %v3054_v27 = vsub.f32 %v6350_v40, %v7522_v29  ;;  %v6421_v62 = vsub.f32 %v311_v14, %v6384_v0  ;;  %v6428_v1 = vpop.f32.mrf.mxu3  ;;  %v7527_v15 = vld [vmem:[#allocation46_spill] sm:$0xff]  ;;  %v7194_v14 = vand.u32 4294901760, %v6393_v47  ;;  %v7528_v29 = vld [vmem:[#allocation45_spill] sm:$0xff] }
 0x180   : > { %2959 = vmatpush.msrb.mxu0 %v6318_v51  ;;  %2798 = vmatmul.f32.gmra.mxu1 %v7521_v20  ;;  %7524 = vst [vmem:[#allocation36_spill] sm:$0xff] %v6426_v59  ;;  %v1149_v54 = vadd.f32 %v7526_v22, %v1064_v53  ;;  %v1019_v13 = vadd.f32 %v7527_v15, %v950_v34  ;;  %v6433_v20 = vand.u32 4294901760, %v309_v6  ;;  %v7529_v55 = vld [vmem:[#allocation58_spill] sm:$0xff]  ;;  %v7530_v34 = vld [vmem:[#allocation51_spill] sm:$0xff] }
 0x181   : > { %7523 = vst [vmem:[#allocation3_spill] sm:$0xff] %v6421_v62  ;;  %2748 = vmatmul.f32.gmra.mxu0 %v6079_v35  ;;  %3038 = vmatpush.msrb.mxu1 %v3037_v3  ;;  %v1070_v19 = vadd.f32 %v7528_v29, %v1014_v63  ;;  %v1438_v44 = vadd.f32 %v7529_v55, %v1372_v28  ;;  %v307_v3 = vld [vmem:[%s7100_s1 + $0x308] sm:$0xff]  ;;  %v7531_v63 = vand.u32 4294901760, %v6375_v58  ;;  %v6451_v55 = vand.u32 4294901760, %v308_v39 }
 0x182   : > { %7525 = vst [vmem:[#allocation25_spill] sm:$0xff] %v6428_v1  ;;  %3142 = vmatpush.msrb.mxu2 %v6336_v16  ;;  %3202 = vmatpush.msrb.mxu3 %v6269_v11  ;;  %v3049_v1 = vand.u32 4294901760, %v3048_v12  ;;  %v6441_v53 = vsub.f32 %v310_v38, %v6404_v4  ;;  %v1076_v15 = vadd.f32 %v7530_v34, %v1019_v13  ;;  %v3055_v38 = vand.u32 4294901760, %v3054_v27  ;;  %v7532_v13 = vld [vmem:[#allocation44_spill] sm:$0xff]  ;;  %v7536_v12 = vld [vmem:[#allocation59_spill] sm:$0xff] }
 0x183   : > { %2961 = vmatpush.msrb.mxu0 %v6344_v5  ;;  %3044 = vmatpush.msrb.mxu1 %v3043_v2  ;;  %v3060_v28 = vsub.f32 %v6375_v58, %v7531_v63  ;;  %v6457_v22 = vsub.f32 %v184_v45, %v6426_v59  ;;  %v1198_v29 = vadd.f32 %v7532_v13, %v1149_v54  ;;  %v6468_v63 = vand.u32 4294901760, %v307_v3  ;;  %v306_v45 = vld [vmem:[%s7100_s1 + $0x300] sm:$0xff]  ;;  %v7538_v59 = vld [vmem:[#allocation57_spill] sm:$0xff] }
 0x184   : > { %3145 = vmatpush.msrb.mxu2 %v6350_v40  ;;  %3204 = vmatpush.msrb.mxu3 %v6298_v8  ;;  %v3066_v2 = vsub.f32 %v6393_v47, %v7194_v14  ;;  %v6466_v34 = vsub.f32 %v309_v6, %v6433_v20  ;;  %v7535_v54 = vld [vmem:[#allocation47_spill] sm:$0xff]  ;;  %v1492_v8 = vadd.f32 %v7536_v12, %v1438_v44  ;;  %v7202_v14 = vand.u32 4294901760, %v6441_v53  ;;  %v337_v6 = vld [vmem:[%s7100_s1 + $0x3f8] sm:$0xff]  ;;  %v7537_v40 = vld [vmem:[#allocation53_spill] sm:$0xff] }
 0x185   : > { %2963 = vmatpush.msrb.mxu0 %v6358_v26  ;;  %2887 = vmatmul.f32.gmra.mxu2 %v6059_v18  ;;  %v6473_v27 = vpop.f32.mrf.mxu1  ;;  %v1153_v13 = vadd.f32 %v7535_v54, %v1070_v19  ;;  %v1157_v16 = vadd.f32 %v7537_v40, %v1076_v15  ;;  %v3061_v44 = vand.u32 4294901760, %v3060_v28  ;;  %v6489_v19 = vsub.f32 %v308_v39, %v6451_v55 }
 0x186   : > { %7533 = vst [vmem:[#allocation29_spill] sm:$0xff] %v6466_v34  ;;  %3050 = vmatpush.msrb.mxu1 %v3049_v1  ;;  %3148 = vmatpush.msrb.mxu2 %v6375_v58  ;;  %v6482_v11 = vpop.f32.mrf.mxu0  ;;  %v6491_v1 = vpop.f32.mrf.mxu2  ;;  %v1579_v12 = vadd.f32 %v6063_v52, %v1492_v8  ;;  %v7539_v54 = vand.u32 4294901760, %v6421_v62  ;;  %v3067_v39 = vand.u32 4294901760, %v3066_v2  ;;  %v6506_v52 = vsub.f32 %v307_v3, %v6468_v63  ;;  %v336_v8 = vld [vmem:[%s7100_s1 + $0x3f0] sm:$0xff]  ;;  %v7543_v3 = vld [vmem:[#allocation50_spill] sm:$0xff] }
 0x187   : > { %7534 = vst [vmem:[#allocation26_spill] sm:$0xff] %v6473_v27  ;;  %v1255_v27 = vadd.f32 %v7538_v59, %v1198_v29  ;;  %3206 = vmatpush.msrb.mxu3 %v6318_v51  ;;  %2965 = vmatpush.msrb.mxu0 %v6384_v0  ;;  %v6498_v59 = vand.u32 4294901760, %v306_v45  ;;  %v192_v29 = vld [vmem:[%s4074_s17 + $0x70] sm:$0xff]  ;;  %v7542_v15 = vand.u32 4294901760, %v6079_v35  ;;  %v3078_v2 = vsub.f32 %v6441_v53, %v7202_v14  ;;  %v335_v35 = vld [vmem:[%s7100_s1 + $0x3e8] sm:$0xff] }
 0x188   : > { %2936 = vmatmul.f32.gmra.mxu3 %v6059_v18  ;;  %3056 = vmatpush.msrb.mxu1 %v3055_v38  ;;  %v3072_v40 = vsub.f32 %v6421_v62, %v7539_v54  ;;  %v6508_v18 = vand.u32 4294901760, %v337_v6  ;;  %v7541_v38 = vld [vmem:[#allocation60_spill] sm:$0xff]  ;;  %v1628_v51 = vadd.f32 %v6102_v33, %v1579_v12 }
 0x189   : > { %3151 = vmatpush.msrb.mxu2 %v6393_v47  ;;  %3208 = vmatpush.msrb.mxu3 %v6344_v5  ;;  %v1376_v54 = vadd.f32 %v7541_v38, %v1255_v27  ;;  %v6520_v28 = vpop.f32.mrf.mxu3  ;;  %v1202_v5 = vadd.f32 %v7543_v3, %v1153_v13  ;;  %v6526_v38 = vand.u32 4294901760, %v192_v29  ;;  %v7544_v13 = vand.u32 4294901760, %v6457_v22  ;;  %v7546_v3 = vld [vmem:[#allocation55_spill] sm:$0xff] }
 0x18a   : > { %7540 = vst [vmem:[#allocation28_spill] sm:$0xff] %v6508_v18  ;;  %2967 = vmatpush.msrb.mxu0 %v6404_v4  ;;  %2804 = vmatmul.f32.gmra.mxu1 %v7542_v15  ;;  %v3073_v15 = vand.u32 4294901760, %v3072_v40  ;;  %v6537_v12 = vsub.f32 %v306_v45, %v6498_v59  ;;  %v1206_v14 = vadd.f32 %v7546_v3, %v1157_v16  ;;  %v7547_v27 = vand.u32 4294901760, %v6466_v34 }
 0x18b   : > { %2753 = vmatmul.f32.gmra.mxu0 %v6124_v57  ;;  %3062 = vmatpush.msrb.mxu1 %v3061_v44  ;;  %v2979_v33 = vsub.f32 %v6457_v22, %v7544_v13  ;;  %v6539_v44 = vand.u32 4294901760, %v336_v8  ;;  %v7208_v40 = vand.u32 4294901760, %v6506_v52  ;;  %v1263_v13 = vadd.f32 %v5968_v61, %v1202_v5 }
 0x18c   : > { %3154 = vmatpush.msrb.mxu2 %v6421_v62  ;;  %3210 = vmatpush.msrb.mxu3 %v6358_v26  ;;  %v3084_v62 = vsub.f32 %v6466_v34, %v7547_v27  ;;  %v6548_v26 = vsub.f32 %v337_v6, %v6508_v18  ;;  %v1443_v45 = vadd.f32 %v5973_v43, %v1376_v54  ;;  %v3079_v16 = vand.u32 4294901760, %v3078_v2 }
 0x18d   : > { %7545 = vst [vmem:[#allocation32_spill] sm:$0xff] %v6539_v44  ;;  %2969 = vmatpush.msrb.mxu0 %v6433_v20  ;;  %3068 = vmatpush.msrb.mxu1 %v3067_v39  ;;  %v6554_v3 = vand.u32 4294901760, %v335_v35  ;;  %v334_v39 = vld [vmem:[%s7100_s1 + $0x3e0] sm:$0xff]  ;;  %v1271_v27 = vadd.f32 %v6025_v21, %v1206_v14  ;;  %v7549_v61 = vand.u32 4294901760, %v6489_v19  ;;  %v6566_v5 = vsub.f32 %v192_v29, %v6526_v38 }
 0x18e   : > { %3157 = vmatpush.msrb.mxu2 %v6441_v53  ;;  %3212 = vmatpush.msrb.mxu3 %v6384_v0  ;;  %v1681_v54 = vadd.f32 %v6114_v50, %v1628_v51  ;;  %v2980_v2 = vand.u32 4294901760, %v2979_v33  ;;  %v6574_v14 = vsub.f32 %v336_v8, %v6539_v44  ;;  %v3085_v50 = vand.u32 4294901760, %v3084_v62  ;;  %v200_v62 = vld [vmem:[%s4074_s17 + $0xb0] sm:$0xff] }
 0x18f   : > { %7548 = vst [vmem:[#allocation38_spill] sm:$0xff] %v6554_v3  ;;  %2971 = vmatpush.msrb.mxu0 %v6451_v55  ;;  %2891 = vmatmul.f32.gmra.mxu2 %v6100_v30  ;;  %v3090_v43 = vsub.f32 %v6489_v19, %v7549_v61  ;;  %v6568_v6 = vpop.f32.mrf.mxu1  ;;  %v333_v61 = vld [vmem:[%s7100_s1 + $0x3d8] sm:$0xff]  ;;  %v3096_v51 = vsub.f32 %v6506_v52, %v7208_v40  ;;  %v6587_v33 = vand.u32 4294901760, %v334_v39 }
 0x190   : > { %3074 = vmatpush.msrb.mxu1 %v3073_v15  ;;  %3160 = vmatpush.msrb.mxu2 %v6466_v34  ;;  %v6579_v29 = vpop.f32.mrf.mxu0  ;;  %v6589_v8 = vpop.f32.mrf.mxu2  ;;  %v1498_v21 = vadd.f32 %v5995_v36, %v1443_v45  ;;  %v1380_v0 = vadd.f32 %v6018_v56, %v1263_v13  ;;  %v1384_v34 = vadd.f32 %v6061_v25, %v1271_v27  ;;  %v7212_v15 = vand.u32 4294901760, %v6566_v5  ;;  %v332_v36 = vld [vmem:[%s7100_s1 + $0x3d0] sm:$0xff] }
 0x191   : > { %7550 = vst [vmem:[#allocation27_spill] sm:$0xff] %v6579_v29  ;;  %3214 = vmatpush.msrb.mxu3 %v6404_v4  ;;  %2973 = vmatpush.msrb.mxu0 %v6468_v63  ;;  %v6595_v4 = vsub.f32 %v335_v35, %v6554_v3  ;;  %v3091_v40 = vand.u32 4294901760, %v3090_v43  ;;  %v6602_v29 = vand.u32 4294901760, %v333_v61  ;;  %v7553_v25 = vand.u32 4294901760, %v6124_v57 }
 0x192   : > { %7551 = vst [vmem:[#allocation30_spill] sm:$0xff] %v6587_v33  ;;  %2940 = vmatmul.f32.gmra.mxu3 %v6100_v30  ;;  %3080 = vmatpush.msrb.mxu1 %v3079_v16  ;;  %v1583_v56 = vadd.f32 %v6107_v48, %v1498_v21  ;;  %v1806_v30 = vadd.f32 %v6128_v31, %v1681_v54  ;;  %v7554_v35 = vand.u32 4294901760, %v6537_v12  ;;  %v7210_v45 = vand.u32 4294901760, %v6574_v14  ;;  %v331_v54 = vld [vmem:[%s7100_s1 + $0x3c8] sm:$0xff] }
 0x193   : > { %3163 = vmatpush.msrb.mxu2 %v6489_v19  ;;  %3216 = vmatpush.msrb.mxu3 %v6433_v20  ;;  %7552 = vst [vmem:[#allocation34_spill] sm:$0xff] %v6602_v29  ;;  %v6616_v16 = vpop.f32.mrf.mxu3  ;;  %v3097_v27 = vand.u32 4294901760, %v3096_v51  ;;  %v7555_v48 = vand.u32 4294901760, %v6548_v26  ;;  %v6622_v43 = vsub.f32 %v334_v39, %v6587_v33  ;;  %v6624_v57 = vand.u32 4294901760, %v200_v62 }
 0x194   : > { %2975 = vmatpush.msrb.mxu0 %v6498_v59  ;;  %2810 = vmatmul.f32.gmra.mxu1 %v7553_v25  ;;  %v3102_v13 = vsub.f32 %v6537_v12, %v7554_v35  ;;  %v1632_v21 = vadd.f32 %v6143_v49, %v1583_v56  ;;  %v1872_v25 = vadd.f32 %v6301_v37, %v1806_v30  ;;  %v7557_v51 = vand.u32 4294901760, %v6202_v17 }
 0x195   : > { %2981 = vmatmul.f32.vlgmr.msrb.gmra.mxu0 %v2980_v2  ;;  %3086 = vmatpush.msrb.mxu1 %v3085_v50  ;;  %v3446_v31 = vsub.f32 %v6548_v26, %v7555_v48  ;;  %7556 = vst [vmem:[#allocation39_spill] sm:$0xff] %v6622_v43  ;;  %v7209_v2 = vand.u32 4294901760, %v6595_v4  ;;  %v6634_v50 = vand.u32 4294901760, %v332_v36  ;;  %v1448_v39 = vadd.f32 %v6029_v24, %v1380_v0  ;;  %v330_v0 = vld [vmem:[%s7100_s1 + $0x3c0] sm:$0xff] }
 0x196   : > { %3166 = vmatpush.msrb.mxu2 %v6506_v52  ;;  %3218 = vmatpush.msrb.mxu3 %v6451_v55  ;;  %v2987_v49 = vsub.f32 %v6566_v5, %v7212_v15  ;;  %v6643_v37 = vsub.f32 %v333_v61, %v6602_v29  ;;  %v1926_v56 = vadd.f32 %v6380_v10, %v1872_v25  ;;  %v3103_v30 = vand.u32 4294901760, %v3102_v13 }
 0x197   : > { %3251 = vmatpush.msra.mxu0 %v7557_v51  ;;  %3092 = vmatpush.msrb.mxu1 %v3091_v40  ;;  %v3452_v24 = vsub.f32 %v6574_v14, %v7210_v45  ;;  %v6651_v17 = vand.u32 4294901760, %v331_v54  ;;  %v1453_v40 = vadd.f32 %v6071_v23, %v1384_v34  ;;  %v7559_v61 = vand.u32 4294901760, %v6222_v41  ;;  %v329_v34 = vld [vmem:[%s7100_s1 + $0x3b8] sm:$0xff] }
 0x198   : > { %7558 = vst [vmem:[#allocation37_spill] sm:$0xff] %v6643_v37  ;;  %3169 = vmatpush.msrb.mxu2 %v6537_v12  ;;  %3220 = vmatpush.msrb.mxu3 %v6468_v63  ;;  %v3447_v35 = vand.u32 4294901760, %v3446_v31  ;;  %v7211_v10 = vand.u32 4294901760, %v6622_v43  ;;  %v6661_v13 = vsub.f32 %v200_v62, %v6624_v57  ;;  %v1689_v25 = vadd.f32 %v6156_v60, %v1632_v21 }
 0x199   : > { %3255 = vmatpush.msra.mxu0 %v7559_v61  ;;  %3098 = vmatpush.msrb.mxu1 %v3097_v27  ;;  %v6663_v48 = vpop.f32.mrf.mxu1  ;;  %v3458_v23 = vsub.f32 %v6595_v4, %v7209_v2  ;;  %v6672_v41 = vsub.f32 %v332_v36, %v6634_v50  ;;  %v1504_v27 = vadd.f32 %v6047_v46, %v1448_v39  ;;  %v7561_v60 = vand.u32 4294901760, %v6243_v42  ;;  %v208_v39 = vld [vmem:[%s4074_s17 + $0xf0] sm:$0xff] }
 0x19a   : > { %3172 = vmatmul.f32.vlgmr.msrb.gmra.mxu2 %v6457_v22  ;;  %3222 = vmatpush.msrb.mxu3 %v6498_v59  ;;  %v2114_v62 = vpop.f32.mrf.mxu0  ;;  %v2988_v31 = vand.u32 4294901760, %v2987_v49  ;;  %v6682_v51 = vand.u32 4294901760, %v330_v0  ;;  %v6684_v61 = vpop.f32.mrf.mxu2  ;;  %v7562_v36 = vand.u32 4294901760, %v6457_v22  ;;  %v2013_v2 = vadd.f32 %v6396_v7, %v1926_v56  ;;  %v328_v7 = vld [vmem:[%s7100_s1 + $0x3b0] sm:$0xff]  ;;  %v7565_v56 = vld [vmem:[#allocation48_spill] sm:$0xff] }
 0x19b   : > { %7560 = vst [vmem:[#allocation52_spill] sm:$0xff] %v6672_v41  ;;  %3379 = vmatpush.msra.mxu2 %v6508_v18  ;;  %3259 = vmatpush.msra.mxu0 %v7561_v60  ;;  %v3453_v45 = vand.u32 4294901760, %v3452_v24  ;;  %v6690_v46 = vsub.f32 %v331_v54, %v6651_v17  ;;  %v1587_v42 = vadd.f32 %v6149_v9, %v1504_v27  ;;  %v6699_v22 = vand.u32 4294901760, %v329_v34  ;;  %v7566_v9 = vld [vmem:[#allocation12_spill] sm:$0xff]  ;;  %v7590_v18 = vld [vmem:[#allocation9_spill] sm:$0xff] }
 0x19c   : > { %3104 = vmatpush.msrb.mxu1 %v3103_v30  ;;  %3226 = vmatmul.f32.vlgmr.msrb.gmra.mxu3 %v7562_v36  ;;  %v3464_v49 = vsub.f32 %v6622_v43, %v7211_v10  ;;  %v1510_v54 = vadd.f32 %v6083_v32, %v1453_v40  ;;  %v1810_v24 = vadd.f32 %v7565_v56, %v1689_v25  ;;  %v7567_v27 = vand.u32 4294901760, %v7566_v9  ;;  %v327_v10 = vld [vmem:[%s7100_s1 + $0x3a8] sm:$0xff]  ;;  %v7569_v30 = vld [vmem:[#allocation6_spill] sm:$0xff]  ;;  %v7570_v32 = vld [vmem:[#allocation43_spill] sm:$0xff] }
 0x19d   : > { %7563 = vst [vmem:[#allocation40_spill] sm:$0xff] %v6690_v46  ;;  %3381 = vmatpush.msra.mxu2 %v6539_v44  ;;  %3448 = vmatpush.msra.mxu3 %v3447_v35  ;;  %v7568_v35 = vld [vmem:[#allocation36_spill] sm:$0xff]  ;;  %v3459_v60 = vand.u32 4294901760, %v3458_v23  ;;  %v6713_v15 = vpop.f32.mrf.mxu3  ;;  %v1636_v21 = vadd.f32 %v7569_v30, %v1587_v42  ;;  %v7571_v40 = vand.u32 4294901760, %v6643_v37  ;;  %v6721_v56 = vsub.f32 %v330_v0, %v6682_v51  ;;  %v7573_v36 = vld [vmem:[#allocation25_spill] sm:$0xff] }
 0x19e   : > { %7564 = vst [vmem:[#allocation31_spill] sm:$0xff] %v6699_v22  ;;  %3263 = vmatpush.msra.mxu0 %v7567_v27  ;;  %3106 = vmatmul.f32.vlgmr.msrb.gmra.mxu1 %v7568_v35  ;;  %v6723_v23 = vand.u32 4294901760, %v208_v39  ;;  %v7572_v9 = vld [vmem:[#allocation24_spill] sm:$0xff]  ;;  %v2062_v44 = vadd.f32 %v7573_v36, %v2013_v2  ;;  %v6729_v42 = vand.u32 4294901760, %v328_v7  ;;  %v7574_v30 = vld [vmem:[#allocation17_spill] sm:$0xff]  ;;  %v3465_v0 = vand.u32 4294901760, %v3464_v49 }
 0x19f   : > { %2989 = vmatmul.f32.gmra.mxu0 %v2988_v31  ;;  %3330 = vmatpush.msra.mxu1 %v7570_v32  ;;  %v3470_v25 = vsub.f32 %v6643_v37, %v7571_v40  ;;  %v1877_v27 = vadd.f32 %v7572_v9, %v1810_v24  ;;  %v7575_v32 = vand.u32 4294901760, %v7574_v30  ;;  %v7576_v40 = vld [vmem:[#allocation54_spill] sm:$0xff]  ;;  %v7577_v37 = vand.u32 4294901760, %v6661_v13  ;;  %v326_v49 = vld [vmem:[%s7100_s1 + $0x3a0] sm:$0xff] }
 0x1a0   : > { %3383 = vmatpush.msra.mxu2 %v6554_v3  ;;  %3454 = vmatpush.msra.mxu3 %v3453_v45  ;;  %v6738_v24 = vsub.f32 %v329_v34, %v6699_v22  ;;  %v6740_v45 = vand.u32 4294901760, %v327_v10  ;;  %v7578_v2 = vld [vmem:[#allocation26_spill] sm:$0xff]  ;;  %v7579_v9 = vand.u32 4294901760, %v6672_v41  ;;  %v7581_v34 = vld [vmem:[#allocation16_spill] sm:$0xff]  ;;  %v7589_v3 = vand.u32 4294901760, %v6566_v5 }
 0x1a1   : > { %3267 = vmatpush.msra.mxu0 %v7575_v32  ;;  %3332 = vmatpush.msra.mxu1 %v7576_v40  ;;  %v2995_v43 = vsub.f32 %v6661_v13, %v7577_v37  ;;  %v1932_v36 = vadd.f32 %v7578_v2, %v1877_v27  ;;  %v2115_v32 = vadd.f32 %v2114_v62, %v2062_v44  ;;  %v7580_v37 = vld [vmem:[#allocation10_spill] sm:$0xff]  ;;  %v7582_v31 = vand.u32 4294901760, %v7581_v34 }
 0x1a2   : > { %3385 = vmatpush.msra.mxu2 %v6587_v33  ;;  %3460 = vmatpush.msra.mxu3 %v3459_v60  ;;  %v3476_v30 = vsub.f32 %v6672_v41, %v7579_v9  ;;  %v1697_v40 = vadd.f32 %v7580_v37, %v1636_v21  ;;  %v3471_v33 = vand.u32 4294901760, %v3470_v25  ;;  %v6756_v27 = vsub.f32 %v208_v39, %v6723_v23  ;;  %v7583_v9 = vld [vmem:[#allocation49_spill] sm:$0xff]  ;;  %v325_v25 = vld [vmem:[%s7100_s1 + $0x398] sm:$0xff]  ;;  %v7585_v39 = vld [vmem:[#allocation15_spill] sm:$0xff] }
 0x1a3   : > { %3271 = vmatpush.msra.mxu0 %v7582_v31  ;;  %3177 = vmatmul.f32.gmra.mxu2 %v6566_v5  ;;  %v2239_v2 = vpop.f32.mrf.mxu1  ;;  %v7584_v44 = vand.u32 4294901760, %v6690_v46  ;;  %v6764_v21 = vsub.f32 %v328_v7, %v6729_v42  ;;  %v7586_v34 = vand.u32 4294901760, %v7585_v39  ;;  %v7231_v60 = vand.u32 4294901760, %v6738_v24 }
 0x1a4   : > { %3334 = vmatpush.msra.mxu1 %v7583_v9  ;;  %3387 = vmatpush.msra.mxu2 %v6602_v29  ;;  %v2122_v31 = vpop.f32.mrf.mxu0  ;;  %v2240_v37 = vadd.f32 %v2239_v2, %v2115_v32  ;;  %v2996_v9 = vand.u32 4294901760, %v2995_v43  ;;  %v6772_v29 = vand.u32 4294901760, %v326_v49  ;;  %v3477_v32 = vand.u32 4294901760, %v3476_v30 }
 0x1a5   : > { %v3482_v62 = vsub.f32 %v6690_v46, %v7584_v44  ;;  %3466 = vmatpush.msra.mxu3 %v3465_v0  ;;  %3275 = vmatpush.msra.mxu0 %v7586_v34  ;;  %v6775_v44 = vsub.f32 %v327_v10, %v6740_v45  ;;  %v2305_v7 = vpop.f32.mrf.mxu2  ;;  %v7588_v46 = vld [vmem:[#allocation8_spill] sm:$0xff]  ;;  %v2017_v0 = vadd.f32 %v6491_v1, %v1932_v36  ;;  %v7591_v43 = vand.u32 4294901760, %v6721_v56  ;;  %v7593_v1 = vld [vmem:[#allocation22_spill] sm:$0xff] }
 0x1a6   : > { %v1591_v41 = vadd.f32 %v7588_v46, %v1510_v54  ;;  %3232 = vmatmul.f32.gmra.mxu3 %v7589_v3  ;;  %3336 = vmatpush.msra.mxu1 %v7590_v18  ;;  %v2306_v2 = vadd.f32 %v2305_v7, %v2240_v37  ;;  %v7234_v39 = vand.u32 4294901760, %v6756_v27  ;;  %v6787_v34 = vand.u32 4294901760, %v325_v25  ;;  %v324_v3 = vld [vmem:[%s7100_s1 + $0x390] sm:$0xff]  ;;  %v7592_v18 = vld [vmem:[#allocation11_spill] sm:$0xff] }
 0x1a7   : > { %7587 = vst [vmem:[#allocation56_spill] sm:$0xff] %v6775_v44  ;;  %3389 = vmatpush.msra.mxu2 %v6634_v50  ;;  %3472 = vmatpush.msra.mxu3 %v3471_v33  ;;  %v3488_v10 = vsub.f32 %v6721_v56, %v7591_v43  ;;  %v1814_v5 = vadd.f32 %v7592_v18, %v1697_v40  ;;  %v7594_v54 = vld [vmem:[#allocation23_spill] sm:$0xff]  ;;  %v3483_v33 = vand.u32 4294901760, %v3482_v62  ;;  %v7233_v30 = vand.u32 4294901760, %v6764_v21  ;;  %v2359_v37 = vpop.f32.mrf.mxu3  ;;  %v7596_v7 = vld [vmem:[#allocation13_spill] sm:$0xff]  ;;  %v323_v62 = vld [vmem:[%s7100_s1 + $0x388] sm:$0xff] }
 0x1a8   : > { %v1640_v46 = vadd.f32 %v7593_v1, %v1591_v41  ;;  %v7595_v36 = vand.u32 4294901760, %v7594_v54  ;;  %3110 = vmatmul.f32.gmra.mxu1 %v6526_v38  ;;  %2997 = vmatmul.f32.gmra.mxu0 %v2996_v9  ;;  %v3494_v43 = vsub.f32 %v6738_v24, %v7231_v60  ;;  %v7232_v40 = vand.u32 4294901760, %v6775_v44  ;;  %v7601_v60 = vld [vmem:[#allocation14_spill] sm:$0xff] }
 0x1a9   : > { %3338 = vmatpush.msra.mxu1 %v7596_v7  ;;  %v6804_v41 = vsub.f32 %v326_v49, %v6772_v29  ;;  %v6809_v18 = vadd.f32 %v2359_v37, %v2306_v2  ;;  %v1882_v9 = vadd.f32 %v6482_v11, %v1814_v5  ;;  %3391 = vmatpush.msra.mxu2 %v6651_v17  ;;  %v6814_v54 = vand.u32 4294901760, %v324_v3  ;;  %v7598_v49 = vld [vmem:[#allocation21_spill] sm:$0xff]  ;;  %v322_v11 = vld [vmem:[%s7100_s1 + $0x380] sm:$0xff]  ;;  %v7599_v5 = vld [vmem:[#allocation20_spill] sm:$0xff] }
 0x1aa   : > { %3279 = vmatpush.msra.mxu0 %v7595_v36  ;;  %3478 = vmatpush.msra.mxu3 %v3477_v32  ;;  %v2066_v1 = vadd.f32 %v6520_v28, %v2017_v0  ;;  %v7597_v36 = vand.u32 4294901760, %v6375_v58  ;;  %v3489_v7 = vand.u32 4294901760, %v3488_v10  ;;  %v3003_v2 = vsub.f32 %v6756_v27, %v7234_v39  ;;  %v185_v28 = vld [vmem:[%s4074_s17 + $0x38] sm:$0xff] }
 0x1ab   : > { %3340 = vmatpush.msra.mxu1 %v7598_v49  ;;  %v6823_v37 = vsub.f32 %v325_v25, %v6787_v34  ;;  %3393 = vmatpush.msra.mxu2 %v6682_v51  ;;  %v1938_v58 = vadd.f32 %v6568_v6, %v1882_v9  ;;  %v3500_v0 = vsub.f32 %v6764_v21, %v7233_v30  ;;  %v6834_v32 = vand.u32 4294901760, %v323_v62  ;;  %v7605_v6 = vld [vmem:[#allocation7_spill] sm:$0xff] }
 0x1ac   : > { %3283 = vmatpush.msra.mxu0 %v7597_v36  ;;  %3484 = vmatpush.msra.mxu3 %v3483_v33  ;;  %v2123_v10 = vadd.f32 %v2122_v31, %v2066_v1  ;;  %v1705_v25 = vadd.f32 %v7599_v5, %v1640_v46  ;;  %v7600_v36 = vand.u32 4294901760, %v6393_v47  ;;  %v3495_v49 = vand.u32 4294901760, %v3494_v43  ;;  %v7602_v5 = vld [vmem:[#allocation3_spill] sm:$0xff] }
 0x1ad   : > { %3182 = vmatmul.f32.gmra.mxu2 %v6661_v13  ;;  %v3506_v33 = vsub.f32 %v6775_v44, %v7232_v40  ;;  %v2243_v9 = vpop.f32.mrf.mxu1  ;;  %3342 = vmatpush.msra.mxu1 %v7601_v60  ;;  %v6847_v31 = vsub.f32 %v324_v3, %v6814_v54  ;;  %v6849_v46 = vand.u32 4294901760, %v322_v11  ;;  %v6851_v47 = vand.u32 4294901760, %v185_v28 }
 0x1ae   : > { %3287 = vmatpush.msra.mxu0 %v7600_v36  ;;  %3395 = vmatpush.msra.mxu2 %v6699_v22  ;;  %v2130_v1 = vpop.f32.mrf.mxu0  ;;  %v2244_v43 = vadd.f32 %v2243_v9, %v2123_v10  ;;  %v7603_v36 = vand.u32 4294901760, %v7602_v5  ;;  %v3004_v40 = vand.u32 4294901760, %v3003_v2  ;;  %v3517_v30 = vand.u32 4294901760, %v6823_v37  ;;  %v2310_v39 = vpop.f32.mrf.mxu2 }
 0x1af   : > { %3490 = vmatpush.msra.mxu3 %v3489_v7  ;;  %v7604_v60 = vand.u32 4294901760, %v6661_v13  ;;  %3344 = vmatpush.msra.mxu1 %v7605_v6  ;;  %v2021_v3 = vadd.f32 %v6589_v8, %v1938_v58  ;;  %v3501_v22 = vand.u32 4294901760, %v3500_v0  ;;  %v6861_v44 = vsub.f32 %v323_v62, %v6834_v32  ;;  %v7606_v7 = vld [vmem:[#allocation18_spill] sm:$0xff]  ;;  %v7610_v6 = vld [vmem:[#allocation4_spill] sm:$0xff] }
 0x1b0   : > { %3291 = vmatpush.msra.mxu0 %v7603_v36  ;;  %v2311_v10 = vadd.f32 %v2310_v39, %v2244_v43  ;;  %v1818_v9 = vadd.f32 %v7606_v7, %v1705_v25  ;;  %3397 = vmatpush.msra.mxu2 %v6729_v42  ;;  %v7607_v2 = vand.u32 4294901760, %v6804_v41  ;;  %v7608_v13 = vand.u32 4294901760, %v6441_v53  ;;  %v7609_v25 = vld [vmem:[#allocation27_spill] sm:$0xff]  ;;  %v7611_v36 = vld [vmem:[#allocation29_spill] sm:$0xff] }
 0x1b1   : > { %3238 = vmatmul.f32.gmra.mxu3 %v7604_v60  ;;  %3114 = vmatmul.f32.gmra.mxu1 %v6624_v57  ;;  %v3507_v8 = vand.u32 4294901760, %v3506_v33  ;;  %v3523_v62 = vand.u32 4294901760, %v6847_v31  ;;  %v6873_v39 = vsub.f32 %v185_v28, %v6851_v47  ;;  %v6876_v58 = vsub.f32 %v322_v11, %v6849_v46  ;;  %v2365_v0 = vpop.f32.mrf.mxu3  ;;  %v193_v33 = vld [vmem:[%s4074_s17 + $0x78] sm:$0xff] }
 0x1b2   : > { %3496 = vmatpush.msra.mxu3 %v3495_v49  ;;  %v3512_v5 = vsub.f32 %v6804_v41, %v7607_v2  ;;  %3295 = vmatpush.msra.mxu0 %v7608_v13  ;;  %v1887_v49 = vadd.f32 %v7609_v25, %v1818_v9  ;;  %v3518_v53 = vsub.f32 %v6823_v37, %v3517_v30  ;;  %v3529_v11 = vand.u32 4294901760, %v6861_v44 }
 0x1b3   : > { %3005 = vmatmul.f32.gmra.mxu0 %v3004_v40  ;;  %3346 = vmatpush.msra.mxu1 %v7610_v6  ;;  %v6883_v43 = vadd.f32 %v2365_v0, %v2311_v10  ;;  %v2070_v28 = vadd.f32 %v6616_v16, %v2021_v3  ;;  %v7612_v60 = vand.u32 4294901760, %v7611_v36  ;;  %v7613_v40 = vld [vmem:[#allocation5_spill] sm:$0xff]  ;;  %v3412_v16 = vand.u32 4294901760, %v6873_v39  ;;  %v7615_v0 = vld [vmem:[#allocation19_spill] sm:$0xff] }
 0x1b4   : > { %3399 = vmatpush.msra.mxu2 %v6740_v45  ;;  %3502 = vmatpush.msra.mxu3 %v3501_v22  ;;  %v3513_v7 = vand.u32 4294901760, %v3512_v5  ;;  %v1944_v9 = vadd.f32 %v6663_v48, %v1887_v49  ;;  %v3524_v22 = vsub.f32 %v6847_v31, %v3523_v62  ;;  %v3535_v3 = vand.u32 4294901760, %v6876_v58 }
 0x1b5   : > { %3299 = vmatpush.msra.mxu0 %v7612_v60  ;;  %3348 = vmatpush.msra.mxu1 %v7613_v40  ;;  %v2131_v10 = vadd.f32 %v2130_v1, %v2070_v28  ;;  %v7614_v2 = vand.u32 4294901760, %v6489_v19  ;;  %v3519_v5 = vand.u32 4294901760, %v3518_v53  ;;  %v6902_v13 = vand.u32 4294901760, %v193_v33  ;;  %v7618_v28 = vld [vmem:[#allocation33_spill] sm:$0xff] }
 0x1b6   : > { %3401 = vmatpush.msra.mxu2 %v6772_v29  ;;  %3508 = vmatpush.msra.mxu3 %v3507_v8  ;;  %v3530_v8 = vsub.f32 %v6861_v44, %v3529_v11  ;;  %v7616_v19 = vand.u32 4294901760, %v6506_v52  ;;  %v2025_v1 = vadd.f32 %v6684_v61, %v1944_v9  ;;  %v7617_v53 = vand.u32 4294901760, %v6756_v27 }
 0x1b7   : > { %3303 = vmatpush.msra.mxu0 %v7614_v2  ;;  %3187 = vmatmul.f32.gmra.mxu2 %v6756_v27  ;;  %v2247_v48 = vpop.f32.mrf.mxu1  ;;  %v3525_v36 = vand.u32 4294901760, %v3524_v22  ;;  %v3413_v60 = vsub.f32 %v6873_v39, %v3412_v16  ;;  %v3536_v40 = vsub.f32 %v6876_v58, %v3535_v3  ;;  %v6923_v52 = vsub.f32 %v193_v33, %v6902_v13 }
 0x1b8   : > { %3350 = vmatpush.msra.mxu1 %v7615_v0  ;;  %3403 = vmatpush.msra.mxu2 %v6787_v34  ;;  %v2138_v25 = vpop.f32.mrf.mxu0  ;;  %v2248_v49 = vadd.f32 %v2247_v48, %v2131_v10  ;;  %v2315_v6 = vpop.f32.mrf.mxu2  ;;  %v7619_v61 = vand.u32 4294901760, %v6537_v12  ;;  %v3531_v27 = vand.u32 4294901760, %v3530_v8  ;;  %v2074_v10 = vadd.f32 %v6713_v15, %v2025_v1 }
 0x1b9   : > { %3514 = vmatpush.msra.mxu3 %v3513_v7  ;;  %3307 = vmatpush.msra.mxu0 %v7616_v19  ;;  %v3414_v33 = vand.u32 4294901760, %v3413_v60  ;;  %v3537_v2 = vand.u32 4294901760, %v3536_v40  ;;  %v3420_v12 = vand.u32 4294901760, %v6923_v52  ;;  %v7621_v1 = vand.u32 4294901760, %v6574_v14  ;;  %v209_v60 = vld [vmem:[%s4074_s17 + $0xf8] sm:$0xff]  ;;  %v7626_v40 = vld [vmem:[#allocation37_spill] sm:$0xff] }
 0x1ba   : > { %3244 = vmatmul.f32.gmra.mxu3 %v7617_v53  ;;  %3352 = vmatpush.msra.mxu1 %v7618_v28  ;;  %v2316_v7 = vadd.f32 %v2315_v6, %v2248_v49  ;;  %v7620_v49 = vand.u32 4294901760, %v6548_v26  ;;  %v7623_v53 = vld [vmem:[#allocation39_spill] sm:$0xff] }
 0x1bb   : > { %3405 = vmatpush.msra.mxu2 %v6814_v54  ;;  %3520 = vmatpush.msra.mxu3 %v3519_v5  ;;  %v2371_v9 = vpop.f32.mrf.mxu3  ;;  %v201_v5 = vld [vmem:[%s4074_s17 + $0xb8] sm:$0xff]  ;;  %s3890_s17 = sshll.u32 %s7644_s21, 3 }
 0x1bc   : > { %3311 = vmatpush.msra.mxu0 %v7619_v61  ;;  %3118 = vmatmul.f32.gmra.mxu1 %v6723_v23  ;;  %v6930_v22 = vadd.f32 %v2371_v9, %v2316_v7  ;;  %v6941_v48 = vand.u32 4294901760, %v201_v5  ;;  %v7627_v7 = vand.u32 4294901760, %v7623_v53  ;;  %v7628_v61 = vld [vmem:[#allocation38_spill] sm:$0xff]  ;;  %v6975_v9 = vand.u32 4294901760, %v209_v60  ;;  %s7086_s28 = scalar_lea.vmem %s7102_s3, %s3890_s17 }
 0x1bd   : > { %3313 = vmatmul.f32.vlgmr.msra.gmra.mxu0 %v7568_v35  ;;  %3354 = vmatpush.msra.mxu1 %v6433_v20  ;;  %v2139_v20 = vadd.f32 %v2138_v25, %v2074_v10  ;;  %v7630_v10 = vand.u32 4294901760, %v7626_v40 }
 0x1be   : > { %3407 = vmatpush.msra.mxu2 %v6834_v32  ;;  %3526 = vmatpush.msra.mxu3 %v3525_v36  ;;  %v6956_v6 = vsub.f32 %v201_v5, %v6941_v48  ;;  %v7625_v36 = vld [vmem:[#allocation32_spill] sm:$0xff]  ;;  %v7631_v5 = vld [vmem:[#allocation30_spill] sm:$0xff] }
 0x1bf   : > { %3558 = vmatpush.msrb.mxu0 %v6548_v26  ;;  %3356 = vmatpush.msra.mxu1 %v6451_v55  ;;  %v3421_v55 = vsub.f32 %v6923_v52, %v3420_v12  ;;  %v7622_v26 = vld [vmem:[#allocation28_spill] sm:$0xff] }
 0x1c0   : > { %3409 = vmatpush.msra.mxu2 %v6849_v46  ;;  %3532 = vmatpush.msra.mxu3 %v3531_v27  ;;  %v7629_v27 = vld [vmem:[#allocation52_spill] sm:$0xff] }
 0x1c1   : > { %3561 = vmatpush.msrb.mxu0 %v6574_v14  ;;  %3358 = vmatpush.msra.mxu1 %v6468_v63  ;;  %v2251_v15 = vpop.f32.mrf.mxu1  ;;  %v7624_v14 = vand.u32 4294901760, %v6595_v4 }
 0x1c2   : > { %3415 = vmatmul.f32.vlgmr.msra.gmra.mxu2 %v3414_v33  ;;  %3538 = vmatpush.msra.mxu3 %v3537_v2  ;;  %v2252_v0 = vadd.f32 %v2251_v15, %v2139_v20  ;;  %v2446_v8 = vpop.f32.mrf.mxu0  ;;  %v2320_v19 = vpop.f32.mrf.mxu2  ;;  %v7632_v20 = vld [vmem:[#allocation40_spill] sm:$0xff] }
 0x1c3   : > { %3685 = vmatpush.msrb.mxu2 %v7620_v49  ;;  %3564 = vmatpush.msrb.mxu0 %v6595_v4  ;;  %v2447_v25 = vadd.f32 %v2446_v8, %v6809_v18 }
 0x1c4   : > { %3360 = vmatpush.msra.mxu1 %v6498_v59  ;;  %3540 = vmatmul.f32.vlgmr.msra.gmra.mxu3 %v6851_v47  ;;  %v2321_v63 = vadd.f32 %v2320_v19, %v2252_v0  ;;  %v3422_v59 = vand.u32 4294901760, %v3421_v55  ;;  %v7633_v55 = vand.u32 4294901760, %v7629_v27  ;;  %v6992_v19 = vsub.f32 %v209_v60, %v6975_v9 }
 0x1c5   : > { %3689 = vmatpush.msrb.mxu2 %v7621_v1  ;;  %3764 = vmatpush.msrb.mxu3 %v7622_v26  ;;  %v2377_v18 = vpop.f32.mrf.mxu3 }
 0x1c6   : > { %3567 = vmatpush.msrb.mxu0 %v7623_v53  ;;  %3362 = vmatmul.f32.vlgmr.msra.gmra.mxu1 %v7568_v35  ;;  %v6962_v28 = vadd.f32 %v2377_v18, %v2321_v63  ;;  %v3428_v35 = vand.u32 4294901760, %v6956_v6  ;;  %v3436_v53 = vand.u32 4294901760, %v6992_v19 }
 0x1c7   : > { %3317 = vmatmul.f32.gmra.mxu0 %v6526_v38  ;;  %3626 = vmatpush.msrb.mxu1 %v7622_v26  ;;  %v7635_v26 = vand.u32 4294901760, %v7632_v20 }
 0x1c8   : > { %3693 = vmatpush.msrb.mxu2 %v7624_v14  ;;  %3766 = vmatpush.msrb.mxu3 %v7625_v36  ;;  %v3429_v15 = vsub.f32 %v6956_v6, %v3428_v35 }
 0x1c9   : > { %3570 = vmatpush.msrb.mxu0 %v7626_v40  ;;  %3628 = vmatpush.msrb.mxu1 %v7625_v36 }
 0x1ca   : > { %3697 = vmatpush.msrb.mxu2 %v7627_v7  ;;  %3768 = vmatpush.msrb.mxu3 %v7628_v61  ;;  %v3430_v1 = vand.u32 4294901760, %v3429_v15  ;;  %v7640_v7 = vld [vmem:[#allocation31_spill] sm:$0xff] }
 0x1cb   : > { %3573 = vmatpush.msrb.mxu0 %v7629_v27  ;;  %3423 = vmatmul.f32.gmra.mxu2 %v3422_v59  ;;  %v2495_v4 = vpop.f32.mrf.mxu1  ;;  %v7637_v59 = vand.u32 4294901760, %v6738_v24 }
 0x1cc   : > { %3630 = vmatpush.msrb.mxu1 %v7628_v61  ;;  %3701 = vmatpush.msrb.mxu2 %v7630_v10  ;;  %v2450_v33 = vpop.f32.mrf.mxu0  ;;  %v2496_v2 = vadd.f32 %v2495_v4, %v2447_v25  ;;  %v7634_v25 = vld [vmem:[#allocation34_spill] sm:$0xff] }
 0x1cd   : > { %3770 = vmatpush.msrb.mxu3 %v7631_v5  ;;  %3576 = vmatpush.msrb.mxu0 %v7632_v20  ;;  %v2451_v0 = vadd.f32 %v2450_v33, %v6883_v43  ;;  %v2548_v8 = vpop.f32.mrf.mxu2 }
 0x1ce   : > { %3544 = vmatmul.f32.gmra.mxu3 %v6902_v13  ;;  %3632 = vmatpush.msrb.mxu1 %v7631_v5  ;;  %v2549_v49 = vadd.f32 %v2548_v8, %v2496_v2 }
 0x1cf   : > { %3705 = vmatpush.msrb.mxu2 %v7633_v55  ;;  %3772 = vmatpush.msrb.mxu3 %v7634_v25  ;;  %v2673_v63 = vpop.f32.mrf.mxu3 }
 0x1d0   : > { %3579 = vmatpush.msrb.mxu0 %v6721_v56  ;;  %3366 = vmatmul.f32.gmra.mxu1 %v6526_v38  ;;  %v6996_v43 = vadd.f32 %v2673_v63, %v2549_v49  ;;  %v7636_v38 = vand.u32 4294901760, %v6721_v56  ;;  %v3437_v56 = vsub.f32 %v6992_v19, %v3436_v53 }
 0x1d1   : > { %3321 = vmatmul.f32.gmra.mxu0 %v6624_v57  ;;  %3634 = vmatpush.msrb.mxu1 %v7634_v25 }
 0x1d2   : > { %3709 = vmatpush.msrb.mxu2 %v7635_v26  ;;  %3774 = vmatpush.msrb.mxu3 %v6634_v50 }
 0x1d3   : > { %3582 = vmatpush.msrb.mxu0 %v6738_v24  ;;  %3636 = vmatpush.msrb.mxu1 %v6634_v50  ;;  %v7638_v50 = vld [vmem:[#allocation56_spill] sm:$0xff]  ;;  %v7639_v24 = vand.u32 4294901760, %v6764_v21 }
 0x1d4   : > { %3713 = vmatpush.msrb.mxu2 %v7636_v38  ;;  %3776 = vmatpush.msrb.mxu3 %v6651_v17  ;;  %v7641_v4 = vand.u32 4294901760, %v7638_v50 }
 0x1d5   : > { %3585 = vmatpush.msrb.mxu0 %v6764_v21  ;;  %3431 = vmatmul.f32.gmra.mxu2 %v3430_v1  ;;  %v2499_v18 = vpop.f32.mrf.mxu1 }
 0x1d6   : > { %3638 = vmatpush.msrb.mxu1 %v6651_v17  ;;  %3717 = vmatpush.msrb.mxu2 %v7637_v59  ;;  %v2454_v14 = vpop.f32.mrf.mxu0  ;;  %v2500_v36 = vadd.f32 %v2499_v18, %v2451_v0  ;;  %v2556_v60 = vpop.f32.mrf.mxu2 }
 0x1d7   : > { %3778 = vmatpush.msrb.mxu3 %v6682_v51  ;;  %3588 = vmatpush.msrb.mxu0 %v7638_v50  ;;  %v2455_v40 = vadd.f32 %v2454_v14, %v6930_v22  ;;  %v3438_v22 = vand.u32 4294901760, %v3437_v56 }
 0x1d8   : > { %3548 = vmatmul.f32.gmra.mxu3 %v6941_v48  ;;  %3640 = vmatpush.msrb.mxu1 %v6682_v51  ;;  %v2557_v17 = vadd.f32 %v2556_v60, %v2500_v36  ;;  %v7642_v51 = vand.u32 4294901760, %v6804_v41 }
 0x1d9   : > { %3721 = vmatpush.msrb.mxu2 %v7639_v24  ;;  %3780 = vmatpush.msrb.mxu3 %v7640_v7  ;;  %v2677_v61 = vpop.f32.mrf.mxu3 }
 0x1da   : > { %3591 = vmatpush.msrb.mxu0 %v6804_v41  ;;  %3370 = vmatmul.f32.gmra.mxu1 %v6624_v57  ;;  %v2678_v27 = vadd.f32 %v2677_v61, %v2557_v17 }
 0x1db   : > { %3325 = vmatmul.f32.gmra.mxu0 %v6723_v23  ;;  %3642 = vmatpush.msrb.mxu1 %v7640_v7 }
 0x1dc   : > { %3725 = vmatpush.msrb.mxu2 %v7641_v4  ;;  %3782 = vmatpush.msrb.mxu3 %v6729_v42 }
 0x1dd   : > { %3594 = vmatpush.msrb.mxu0 %v6823_v37  ;;  %3644 = vmatpush.msrb.mxu1 %v6729_v42 }
 0x1de   : > { %3729 = vmatpush.msrb.mxu2 %v7642_v51  ;;  %3784 = vmatpush.msrb.mxu3 %v6740_v45 }
 0x1df   : > { %3597 = vmatpush.msrb.mxu0 %v6847_v31  ;;  %3439 = vmatmul.f32.gmra.mxu2 %v3438_v22  ;;  %v2503_v57 = vpop.f32.mrf.mxu1 }
 0x1e0   : > { %3646 = vmatpush.msrb.mxu1 %v6740_v45  ;;  %3733 = vmatpush.msrb.mxu2 %v3517_v30  ;;  %v2458_v21 = vpop.f32.mrf.mxu0  ;;  %v2504_v10 = vadd.f32 %v2503_v57, %v2455_v40  ;;  %v2564_v33 = vpop.f32.mrf.mxu2 }
 0x1e1   : > { %3786 = vmatpush.msrb.mxu3 %v6772_v29  ;;  %3600 = vmatpush.msrb.mxu0 %v6861_v44  ;;  %v2459_v42 = vadd.f32 %v2458_v21, %v6962_v28 }
 0x1e2   : > { %3552 = vmatmul.f32.gmra.mxu3 %v6975_v9  ;;  %3648 = vmatpush.msrb.mxu1 %v6772_v29  ;;  %v2565_v41 = vadd.f32 %v2564_v33, %v2504_v10 }
 0x1e3   : > { %3737 = vmatpush.msrb.mxu2 %v3523_v62  ;;  %3788 = vmatpush.msrb.mxu3 %v6787_v34  ;;  %v2681_v45 = vpop.f32.mrf.mxu3 }
 0x1e4   : > { %3603 = vmatpush.msrb.mxu0 %v6876_v58  ;;  %3374 = vmatmul.f32.gmra.mxu1 %v6723_v23  ;;  %v2682_v30 = vadd.f32 %v2681_v45, %v2565_v41 }
 0x1e5   : > { %3606 = vmatmul.f32.vlgmr.msrb.gmra.mxu0 %v6873_v39  ;;  %3650 = vmatpush.msrb.mxu1 %v6787_v34 }
 0x1e6   : > { %3741 = vmatpush.msrb.mxu2 %v3529_v11  ;;  %3790 = vmatpush.msrb.mxu3 %v6814_v54 }
 0x1e7   : > { %3652 = vmatpush.msrb.mxu1 %v6814_v54 }
 0x1e8   : > { %3745 = vmatpush.msrb.mxu2 %v3535_v3  ;;  %3792 = vmatpush.msrb.mxu3 %v6834_v32 }
 0x1e9   : > { %3654 = vmatpush.msrb.mxu1 %v6834_v32  ;;  %3747 = vmatmul.f32.vlgmr.msrb.gmra.mxu2 %v6851_v47  ;;  %v2507_v29 = vpop.f32.mrf.mxu1 }
 0x1ea   : > { %3794 = vmatpush.msrb.mxu3 %v6849_v46  ;;  %v2508_v23 = vadd.f32 %v2507_v29, %v2459_v42  ;;  %v2739_v34 = vpop.f32.mrf.mxu0  ;;  %v2572_v44 = vpop.f32.mrf.mxu2 }
 0x1eb   : > { %3656 = vmatpush.msrb.mxu1 %v6849_v46  ;;  %3796 = vmatmul.f32.vlgmr.msrb.gmra.mxu3 %v6851_v47  ;;  %v2740_v54 = vadd.f32 %v2739_v34, %v6996_v43 }
 0x1ec   : > { %3660 = vmatmul.f32.vlgmr.msrb.gmra.mxu1 %v3412_v16  ;;  %v2573_v37 = vadd.f32 %v2572_v44, %v2508_v23 }
 0x1ed   : > { %3611 = vmatmul.f32.gmra.mxu0 %v6923_v52  ;;  %v2685_v32 = vpop.f32.mrf.mxu3 }
 0x1ee   : > { %v2686_v31 = vadd.f32 %v2685_v32, %v2573_v37 }
 0x1f1   : > { %3751 = vmatmul.f32.gmra.mxu2 %v6902_v13 }
 0x1f3   : > { %3800 = vmatmul.f32.gmra.mxu3 %v6902_v13  ;;  %v2793_v62 = vpop.f32.mrf.mxu1 }
 0x1f4   : > { %3666 = vmatmul.f32.gmra.mxu1 %v3420_v12  ;;  %v2744_v46 = vpop.f32.mrf.mxu0  ;;  %v2794_v47 = vadd.f32 %v2793_v62, %v2740_v54 }
 0x1f5   : > { %3616 = vmatmul.f32.gmra.mxu0 %v6956_v6  ;;  %v2745_v58 = vadd.f32 %v2744_v46, %v2678_v27  ;;  %v2880_v39 = vpop.f32.mrf.mxu2 }
 0x1f6   : > { %v2881_v11 = vadd.f32 %v2880_v39, %v2794_v47 }
 0x1f7   : > { %v2929_v16 = vpop.f32.mrf.mxu3 }
 0x1f8   : > { %v2930_v3 = vadd.f32 %v2929_v16, %v2881_v11 }
 0x1f9   : > { %3755 = vmatmul.f32.gmra.mxu2 %v6941_v48 }
 0x1fb   : > { %3804 = vmatmul.f32.gmra.mxu3 %v6941_v48 }
 0x1fc   : > { %3672 = vmatmul.f32.gmra.mxu1 %v3428_v35 }
 0x1fd   : > { %3621 = vmatmul.f32.gmra.mxu0 %v6992_v19  ;;  %v2799_v13 = vpop.f32.mrf.mxu1 }
 0x1fe   : > { %v2749_v52 = vpop.f32.mrf.mxu0  ;;  %v2800_v12 = vadd.f32 %v2799_v13, %v2745_v58  ;;  %v2884_v28 = vpop.f32.mrf.mxu2 }
 0x1ff   : > { %v2750_v2 = vadd.f32 %v2749_v52, %v2682_v30 }
 0x200   : > { %v2885_v5 = vadd.f32 %v2884_v28, %v2800_v12 }
 0x201   : > { %3759 = vmatmul.f32.gmra.mxu2 %v6975_v9  ;;  %v2933_v20 = vpop.f32.mrf.mxu3 }
 0x202   : > { %v2934_v15 = vadd.f32 %v2933_v20, %v2885_v5 }
 0x203   : > { %3808 = vmatmul.f32.gmra.mxu3 %v6975_v9 }
 0x204   : > { %3678 = vmatmul.f32.gmra.mxu1 %v3436_v53 }
 0x207   : > { %v2805_v48 = vpop.f32.mrf.mxu1 }
 0x208   : > { %v2754_v6 = vpop.f32.mrf.mxu0  ;;  %v2806_v35 = vadd.f32 %v2805_v48, %v2750_v2  ;;  %v2888_v0 = vpop.f32.mrf.mxu2 }
 0x209   : > { %v2755_v8 = vadd.f32 %v2754_v6, %v2686_v31 }
 0x20a   : > { %v2889_v49 = vadd.f32 %v2888_v0, %v2806_v35 }
 0x20b   : > { %v2937_v55 = vpop.f32.mrf.mxu3 }
 0x20c   : > { %v2938_v25 = vadd.f32 %v2937_v55, %v2889_v49 }
 0x211   : > { %v2811_v63 = vpop.f32.mrf.mxu1 }
 0x212   : > { %v2812_v43 = vadd.f32 %v2811_v63, %v2755_v8  ;;  %v2982_v1 = vpop.f32.mrf.mxu0  ;;  %v2892_v26 = vpop.f32.mrf.mxu2 }
 0x213   : > { %v2983_v45 = vadd.f32 %v2982_v1, %v2930_v3 }
 0x214   : > { %v2893_v38 = vadd.f32 %v2892_v26, %v2812_v43 }
 0x215   : > { %v2941_v18 = vpop.f32.mrf.mxu3 }
 0x216   : > { %v2942_v59 = vadd.f32 %v2941_v18, %v2893_v38 }
 0x21b   : > { %v3107_v14 = vpop.f32.mrf.mxu1 }
 0x21c   : > { %v2990_v9 = vpop.f32.mrf.mxu0  ;;  %v3108_v29 = vadd.f32 %v3107_v14, %v2983_v45 }
 0x21d   : > { %v3173_v36 = vpop.f32.mrf.mxu2  ;;  %v2991_v44 = vadd.f32 %v2990_v9, %v2934_v15 }
 0x21e   : > { %v3174_v23 = vadd.f32 %v3173_v36, %v3108_v29 }
 0x21f   : > { %v3227_v19 = vpop.f32.mrf.mxu3 }
 0x220   : > { %v3228_v32 = vadd.f32 %v3227_v19, %v3174_v23 }
 0x225   : > { %v3111_v53 = vpop.f32.mrf.mxu1  ;;  %v2998_v60 = vpop.f32.mrf.mxu0 }
 0x226   : > { %v3178_v50 = vpop.f32.mrf.mxu2  ;;  %v3112_v31 = vadd.f32 %v3111_v53, %v2991_v44  ;;  %v2999_v39 = vadd.f32 %v2998_v60, %v2938_v25 }
 0x228   : > { %v3179_v47 = vadd.f32 %v3178_v50, %v3112_v31 }
 0x229   : > { %v3233_v56 = vpop.f32.mrf.mxu3 }
 0x22a   : > { %v3234_v16 = vadd.f32 %v3233_v56, %v3179_v47 }
 0x22e   : > { %v3115_v40 = vpop.f32.mrf.mxu1 }
 0x22f   : > { %v3116_v13 = vadd.f32 %v3115_v40, %v2999_v39 }
 0x230   : > { %v3006_v17 = vpop.f32.mrf.mxu0  ;;  %v3183_v24 = vpop.f32.mrf.mxu2 }
 0x231   : > { %v3184_v5 = vadd.f32 %v3183_v24, %v3116_v13  ;;  %v3007_v48 = vadd.f32 %v3006_v17, %v2942_v59 }
 0x234   : > { %v3239_v7 = vpop.f32.mrf.mxu3 }
 0x235   : > { %v3240_v0 = vadd.f32 %v3239_v7, %v3184_v5 }
 0x239   : > { %v3119_v61 = vpop.f32.mrf.mxu1 }
 0x23a   : > { %v3314_v27 = vpop.f32.mrf.mxu0  ;;  %v3188_v22 = vpop.f32.mrf.mxu2  ;;  %v3120_v8 = vadd.f32 %v3119_v61, %v3007_v48 }
 0x23b   : > { %v3315_v46 = vadd.f32 %v3314_v27, %v3228_v32 }
 0x23c   : > { %v3189_v26 = vadd.f32 %v3188_v22, %v3120_v8 }
 0x23d   : > { %v3245_v4 = vpop.f32.mrf.mxu3 }
 0x23e   : > { %v3246_v59 = vadd.f32 %v3245_v4, %v3189_v26 }
 0x243   : > { %v3363_v51 = vpop.f32.mrf.mxu1 }
 0x244   : > { %v3318_v57 = vpop.f32.mrf.mxu0  ;;  %v3364_v58 = vadd.f32 %v3363_v51, %v3315_v46 }
 0x245   : > { %v3416_v21 = vpop.f32.mrf.mxu2  ;;  %v3319_v28 = vadd.f32 %v3318_v57, %v3234_v16 }
 0x246   : > { %v3417_v52 = vadd.f32 %v3416_v21, %v3364_v58 }
 0x247   : > { %v3541_v10 = vpop.f32.mrf.mxu3 }
 0x248   : > { %v3542_v20 = vadd.f32 %v3541_v10, %v3417_v52 }
 0x24d   : > { %v3367_v33 = vpop.f32.mrf.mxu1 }
 0x24e   : > { %v3322_v42 = vpop.f32.mrf.mxu0  ;;  %v3424_v41 = vpop.f32.mrf.mxu2  ;;  %v3368_v15 = vadd.f32 %v3367_v33, %v3319_v28 }
 0x24f   : > { %v3323_v25 = vadd.f32 %v3322_v42, %v3240_v0 }
 0x250   : > { %v3425_v49 = vadd.f32 %v3424_v41, %v3368_v15 }
 0x251   : > { %v3545_v30 = vpop.f32.mrf.mxu3 }
 0x252   : > { %v3546_v38 = vadd.f32 %v3545_v30, %v3425_v49 }
 0x257   : > { %v3371_v34 = vpop.f32.mrf.mxu1 }
 0x258   : > { %v3326_v54 = vpop.f32.mrf.mxu0  ;;  %v3432_v37 = vpop.f32.mrf.mxu2  ;;  %v3372_v18 = vadd.f32 %v3371_v34, %v3323_v25 }
 0x259   : > { %v3327_v40 = vadd.f32 %v3326_v54, %v3246_v59 }
 0x25a   : > { %v3433_v60 = vadd.f32 %v3432_v37, %v3372_v18 }
 0x25b   : > { %v3549_v62 = vpop.f32.mrf.mxu3 }
 0x25c   : > { %v3550_v7 = vadd.f32 %v3549_v62, %v3433_v60 }
 0x261   : > { %v3375_v11 = vpop.f32.mrf.mxu1 }
 0x262   : > { %v3607_v12 = vpop.f32.mrf.mxu0  ;;  %v3440_v3 = vpop.f32.mrf.mxu2  ;;  %v3376_v61 = vadd.f32 %v3375_v11, %v3327_v40 }
 0x263   : > { %v3608_v6 = vadd.f32 %v3607_v12, %v3542_v20 }
 0x264   : > { %v3441_v10 = vadd.f32 %v3440_v3, %v3376_v61 }
 0x265   : > { %v3553_v2 = vpop.f32.mrf.mxu3 }
 0x266   : > { %v3554_v30 = vadd.f32 %v3553_v2, %v3441_v10 }
 0x269   : > { %v3661_v35 = vpop.f32.mrf.mxu1 }
 0x26a   : > { %v3612_v55 = vpop.f32.mrf.mxu0  ;;  %v3662_v63 = vadd.f32 %v3661_v35, %v3608_v6 }
 0x26b   : > { %v3613_v36 = vadd.f32 %v3612_v55, %v3546_v38 }
 0x26c   : > { %v3748_v43 = vpop.f32.mrf.mxu2 }
 0x26d   : > { %v3749_v1 = vadd.f32 %v3748_v43, %v3662_v63 }
 0x26e   : > { %v3797_v14 = vpop.f32.mrf.mxu3 }
 0x26f   : > { %v3798_v9 = vadd.f32 %v3797_v14, %v3749_v1 }
 0x271   : > { %v3812_v19 = vmul.f32 1.442695, %v3798_v9  ;;  %v3667_v53 = vpop.f32.mrf.mxu1 }
 0x272   : > { %v3668_v50 = vadd.f32 %v3667_v53, %v3613_v36  ;;  %v3617_v56 = vpop.f32.mrf.mxu0 }
 0x273   : > { %3902 = vpow2.f32 %v3812_v19  ;;  %v3618_v4 = vadd.f32 %v3617_v56, %v3550_v7 }
 0x274   : > { %v3752_v17 = vpop.f32.mrf.mxu2 }
 0x275   : > { %v3753_v24 = vadd.f32 %v3752_v17, %v3668_v50 }
 0x276   : > { %v3801_v27 = vpop.f32.mrf.mxu3 }
 0x277   : > { %v3802_v22 = vadd.f32 %v3801_v27, %v3753_v24 }
 0x279   : > { %v3903_v51 = vpop.eup %3902  ;;  %v3814_v57 = vmul.f32 1.442695, %v3802_v22  ;;  %v3673_v21 = vpop.f32.mrf.mxu1 }
 0x27a   : > { %3821 = vst.msk [vmem:[%s7086_s28] sm:$0xff] %vm3820_vm0, %v3903_v51  ;;  %v3674_v33 = vadd.f32 %v3673_v21, %v3618_v4  ;;  %v3622_v41 = vpop.f32.mrf.mxu0 }
 0x27b   : > { %3904 = vpow2.f32 %v3814_v57  ;;  %v3623_v34 = vadd.f32 %v3622_v41, %v3554_v30 }
 0x27c   : > { %v3756_v42 = vpop.f32.mrf.mxu2 }
 0x27d   : > { %v3757_v45 = vadd.f32 %v3756_v42, %v3674_v33 }
 0x27e   : > { %v3805_v29 = vpop.f32.mrf.mxu3 }
 0x27f   : > { %v3806_v23 = vadd.f32 %v3805_v29, %v3757_v45 }
 0x281   : > { %v3905_v44 = vpop.eup %3904  ;;  %v3816_v54 = vmul.f32 1.442695, %v3806_v23  ;;  %v3679_v37 = vpop.f32.mrf.mxu1 }
 0x282   : > { %3822 = vst.msk [vmem:[%s7086_s28 + $0x8] sm:$0xff] %vm3820_vm0, %v3905_v44  ;;  %v3680_v32 = vadd.f32 %v3679_v37, %v3623_v34 }
 0x283   : > { %3906 = vpow2.f32 %v3816_v54 }
 0x284   : > { %v3760_v31 = vpop.f32.mrf.mxu2 }
 0x285   : > { %v3761_v62 = vadd.f32 %v3760_v31, %v3680_v32 }
 0x286   : > { %v3809_v46 = vpop.f32.mrf.mxu3 }
 0x287   : > { %v3810_v47 = vadd.f32 %v3809_v46, %v3761_v62 }
 0x289   : > { %v3907_v58 = vpop.eup %3906  ;;  %v3818_v39 = vmul.f32 1.442695, %v3810_v47 }
 0x28a   : > { %3823 = vst.msk [vmem:[%s7086_s28 + $0x10] sm:$0xff] %vm3820_vm0, %v3907_v58 }
 0x28b   : > { %3908 = vpow2.f32 %v3818_v39 }
 0x291   : > { %v3909_v11 = vpop.eup %3908 }
 0x292   : > { %3824 = vst.msk [vmem:[%s7086_s28 + $0x18] sm:$0xff] %vm3820_vm0, %v3909_v11 }
 0x293 PF: > { %s14_s14 = sadd.s32 1, %s3916_s14  }
 0x294   : > { %p11_p4 = scmp.ge.s32.totalorder %s14_s14, 6  }
 0x296   :  { %13 = sbr.rel (!%p11_p4) target bundleno = 2 (0x2), region = 62 }

</bundles_post_ra>
